<compile_context>
chip_gen: v7x
topology: tpu7x:2x2x1
jax: 0.10.0
libtpu: 0.0.40
codegen_flags: <defaults>
</compile_context>

<pallas_src>
import functools

import jax
import jax.numpy as jnp
from jax import lax
from jax.experimental import pallas as pl
from jax.experimental.pallas import tpu as pltpu

EPS = 1e-5  # nn.GroupNorm default eps


# ----------------------------- kernel helpers -----------------------------

def _dx_shifted_variants(y, H, W):
    """Three dx-shifted, replicate-clamped copies of y along W, cast to bf16.

    y: (H, W, C) f32.  Returns (reads w-1, reads w, reads w+1), each bf16.
    The shift is a pltpu.roll on the sublane (W) axis — XLU slot, which has
    slack — plus a jnp.where fix-up on the edge column, instead of slicing a
    sublane-misaligned (W+2)-wide buffer.  Rolls run in f32 (unrestricted
    sublane rotate); the bf16 cast happens right after, before all further
    padding/slicing/concat.
    """
    col = lax.broadcasted_iota(jnp.int32, (H, W, 1), 1)
    left = jnp.where(col == 0, y[:, 0:1, :],
                     pltpu.roll(y, shift=1, axis=1))          # reads w-1
    right = jnp.where(col == W - 1, y[:, W - 1:W, :],
                      pltpu.roll(y, shift=W - 1, axis=1))     # reads w+1
    return (left.astype(jnp.bfloat16),
            y.astype(jnp.bfloat16),
            right.astype(jnp.bfloat16))


def _conv3x3_replicate(y, w_ref, b_ref, H, W):
    """3x3 conv with replicate padding as 9 accumulated MXU dots (no im2col).

    y: (H, W, Cin) f32 activation (post norm + ReLU).
    w_ref: (9*Cin, Cout) bf16, row order (ky*3 + kx)*Cin + cin  (PyTorch
           cross-correlation tap order).
    Returns (H*W, Cout) f32.
    """
    cin = y.shape[-1]
    cout = w_ref.shape[-1]
    variants = _dx_shifted_variants(y, H, W)          # bf16, dx in {0,1,2}
    acc = jnp.zeros((H * W, cout), jnp.float32)
    for dx in range(3):
        yv = variants[dx]                             # (H, W, Cin) bf16
        # Replicate rows: (H+2, W, Cin).  Leading-dim concat/slices pick whole
        # (W, Cin) tiles, so they stay sublane-aligned.
        yr = jnp.concatenate([yv[0:1], yv, yv[H - 1:H]], axis=0)
        for dy in range(3):
            k = dy * 3 + dx                           # static tap index
            slab = yr[dy:dy + H].reshape(H * W, cin)  # aligned relabel
            acc = acc + jnp.dot(slab, w_ref[k * cin:(k + 1) * cin, :],
                                preferred_element_type=jnp.float32)
    return acc + b_ref[...]                           # (H*W, Cout) f32


def _fused_kernel(x_ref, g1_ref, b1_ref, w1_ref, cb1_ref,
                  g2_ref, b2_ref, w2_ref, cb2_ref, gavg_ref,
                  o_ref, *, H, W, CH, COUT):
    x = x_ref[0]                                      # (H, W, C) f32

    # ---- GroupNorm(1, C) ('layer_norm' flavour) + ReLU, one-pass f32 stats --
    mean = jnp.mean(x)
    var = jnp.mean(x * x) - mean * mean
    inv = lax.rsqrt(var + EPS)
    scale1 = inv * g1_ref[...]                        # (1, C)
    shift1 = b1_ref[...] - mean * scale1
    y = jnp.maximum(x * scale1 + shift1, 0.0)

    # ---- Conv1: 9 accumulated bf16 dots, f32 accumulation -------------------
    h = _conv3x3_replicate(y, w1_ref, cb1_ref, H, W)  # (H*W, CH) f32

    # ---- GroupNorm(CH//32, CH): one-pass stats, group pooling via matmul ----
    s = jnp.sum(h, axis=0, keepdims=True)                        # (1, CH)
    ss = jnp.sum(h * h, axis=0, keepdims=True)                   # (1, CH)
    pooled = jnp.dot(jnp.concatenate([s, ss], axis=0), gavg_ref[...],
                     preferred_element_type=jnp.float32)         # (2, CH)
    mean_c = pooled[0:1]
    var_c = pooled[1:2] - mean_c * mean_c
    inv_c = lax.rsqrt(var_c + EPS)
    scale2 = inv_c * g2_ref[...]                                 # (1, CH)
    shift2 = b2_ref[...] - mean_c * scale2
    y2 = jnp.maximum(h * scale2 + shift2, 0.0).reshape(H, W, CH)

    # ---- Conv2 + identity skip ----------------------------------------------
    o = _conv3x3_replicate(y2, w2_ref, cb2_ref, H, W)  # (H*W, COUT) f32
    o_ref[...] = o.reshape(1, H, W, COUT) + x_ref[...]


# ------------------------------ JAX wrapper -------------------------------

def residual_conv_block(x_nhwc, params):
    """x_nhwc: (N, H, W, C) float32.  params hold kernel-layout weights."""
    g1, b1, w1p, cb1 = params['g1'], params['b1'], params['w1p'], params['cb1']
    g2, b2, w2p, cb2 = params['g2'], params['b2'], params['w2p'], params['cb2']
    gavg = params['gavg']
    N, H, W, C = x_nhwc.shape
    CH = w1p.shape[-1]
    COUT = w2p.shape[-1]
    assert C == COUT, "identity skip requires in_channels == out_channels"
    # TODO(synk): 1x1-conv skip path for in_channels != out_channels not wired.
    # TODO(synk): production MoGe shapes (H,W >= 64, C >= 512) need an H-tile
    # grid axis (halo rows via overlapping index_map) with two-pass GroupNorm
    # statistics accumulated across the 'arbitrary' H steps, plus
    # pipeline_mode=pl.Buffered(1) on the constant weight/affine operands, to
    # fit v7x's 64 MiB VMEM and to give both of its TensorCores >= 2 grid
    # steps.  Whole-image-per-sample blocks are fine at these demo shapes.

    def full_spec(shape):
        nd = len(shape)
        return pl.BlockSpec(shape, lambda n, _nd=nd: (0,) * _nd)

    kern = functools.partial(_fused_kernel, H=H, W=W, CH=CH, COUT=COUT)

    flops = 2 * N * H * W * 9 * (C * CH + CH * COUT)
    bytes_accessed = (4 * N * H * W * (C + COUT)          # x in, out (f32)
                      + 2 * 9 * (C * CH + CH * COUT)      # bf16 conv weights
                      + 4 * (2 * C + 3 * CH + COUT + CH * CH))  # affine + gavg
    cost = pl.CostEstimate(flops=flops, transcendentals=N * (CH + 1),
                           bytes_accessed=bytes_accessed)

    # Explicit VMEM budget, sized from the actual block shapes (with headroom),
    # instead of relying on the scoped default (16/32 MiB depending on chip).
    cmax = max(C, CH, COUT)
    blk_io = 4 * H * W * (C + COUT) * 2                  # x/out blocks, 2-buffered
    blk_wt = 2 * 9 * (C * CH + CH * COUT) * 2            # bf16 weights, 2-buffered
    blk_misc = 4 * (CH * CH + 8 * cmax) * 2              # gavg + affine vectors
    act_tmp = (3 * (H + 2) * W * cmax * 2                # bf16 shifted/padded variants
               + 4 * H * W * cmax * 4)                   # f32 h / acc / y2 temporaries
    vmem_limit = int(min(100 * 2**20,
                         max(32 * 2**20,
                             2 * (blk_io + blk_wt + blk_misc + act_tmp))))

    return pl.pallas_call(
        kern,
        out_shape=jax.ShapeDtypeStruct((N, H, W, COUT), jnp.float32),
        grid=(N,),
        in_specs=[
            pl.BlockSpec((1, H, W, C), lambda n: (n, 0, 0, 0)),
            full_spec((1, C)), full_spec((1, C)),
            full_spec((9 * C, CH)), full_spec((1, CH)),
            full_spec((1, CH)), full_spec((1, CH)),
            full_spec((9 * CH, COUT)), full_spec((1, COUT)),
            full_spec((CH, CH)),
        ],
        out_specs=pl.BlockSpec((1, H, W, COUT), lambda n: (n, 0, 0, 0)),
        compiler_params=pltpu.CompilerParams(
            dimension_semantics=("parallel",),
            vmem_limit_bytes=vmem_limit),
        cost_estimate=cost,
    )(x_nhwc, g1, b1, w1p, cb1, g2, b2, w2p, cb2, gavg)


# --------------------------- pure-JAX reference ---------------------------

def _group_norm_nchw(x, num_groups, gamma, beta, eps=EPS):
    N, C, H, W = x.shape
    xg = x.reshape(N, num_groups, -1)
    mean = xg.mean(axis=2, keepdims=True)
    var = ((xg - mean) ** 2).mean(axis=2, keepdims=True)
    xn = ((xg - mean) / jnp.sqrt(var + eps)).reshape(N, C, H, W)
    return xn * gamma.reshape(1, C, 1, 1) + beta.reshape(1, C, 1, 1)


def _conv3x3_rep_nchw(x, w_oihw, b):
    xp = jnp.pad(x, ((0, 0), (0, 0), (1, 1), (1, 1)), mode='edge')
    y = lax.conv_general_dilated(
        xp, w_oihw, window_strides=(1, 1), padding='VALID',
        dimension_numbers=('NCHW', 'OIHW', 'NCHW'))
    return y + b.reshape(1, -1, 1, 1)


def ref_forward_nchw(x, p):
    skip = x
    h = _group_norm_nchw(x, 1, p['g1'], p['b1'])
    h = jnp.maximum(h, 0.0)
    h = _conv3x3_rep_nchw(h, p['w1'], p['cb1'])
    h = _group_norm_nchw(h, p['w1'].shape[0] // 32, p['g2'], p['b2'])
    h = jnp.maximum(h, 0.0)
    h = _conv3x3_rep_nchw(h, p['w2'], p['cb2'])
    return h + skip


# --------------------------------- main -----------------------------------

if __name__ == "__main__":
    # C = 64 so the hidden GroupNorm has 64 // 32 = 2 groups (module default).
    N, C, H, W = 2, 64, 16, 16
    CH, COUT = C, C

    key = jax.random.PRNGKey(0)
    ks = jax.random.split(key, 9)
    x_nchw = jax.random.normal(ks[0], (N, C, H, W), jnp.float32)

    # deterministic synthetic parameters (PyTorch shapes)
    g1 = 1.0 + 0.1 * jax.random.normal(ks[1], (C,), jnp.float32)
    b1 = 0.1 * jax.random.normal(ks[2], (C,), jnp.float32)
    w1 = 0.05 * jax.random.normal(ks[3], (CH, C, 3, 3), jnp.float32)     # OIHW
    cb1 = 0.05 * jax.random.normal(ks[4], (CH,), jnp.float32)
    g2 = 1.0 + 0.1 * jax.random.normal(ks[5], (CH,), jnp.float32)
    b2 = 0.1 * jax.random.normal(ks[6], (CH,), jnp.float32)
    w2 = 0.05 * jax.random.normal(ks[7], (COUT, CH, 3, 3), jnp.float32)  # OIHW
    cb2 = 0.05 * jax.random.normal(ks[8], (COUT,), jnp.float32)

    # kernel-layout parameters:
    #   conv weights: OIHW -> (ky, kx, I, O) -> (9*I, O), bf16 (MXU operands)
    #   affine/bias vectors: (1, C), f32
    #   gavg: (CH, CH) block-diagonal group-averaging matrix (f32), encodes the
    #         hidden GroupNorm's CH//32 groups and the 1/(group_size*H*W) factor.
    G = CH // 32
    assert G >= 1 and CH % G == 0
    cs = CH // G
    gid = jnp.arange(CH) // cs
    gavg = (gid[:, None] == gid[None, :]).astype(jnp.float32) / float(cs * H * W)

    kparams = dict(
        g1=g1.reshape(1, C), b1=b1.reshape(1, C),
        w1p=jnp.transpose(w1, (2, 3, 1, 0)).reshape(9 * C, CH).astype(jnp.bfloat16),
        cb1=cb1.reshape(1, CH),
        g2=g2.reshape(1, CH), b2=b2.reshape(1, CH),
        w2p=jnp.transpose(w2, (2, 3, 1, 0)).reshape(9 * CH, COUT).astype(jnp.bfloat16),
        cb2=cb2.reshape(1, COUT),
        gavg=gavg,
    )

    x_nhwc = jnp.transpose(x_nchw, (0, 2, 3, 1))
    out_nhwc = residual_conv_block(x_nhwc, kparams)
    out_nhwc = jax.block_until_ready(out_nhwc)
    out_nchw = jnp.transpose(out_nhwc, (0, 3, 1, 2))

    ref = ref_forward_nchw(
        x_nchw, dict(g1=g1, b1=b1, w1=w1, cb1=cb1, g2=g2, b2=b2, w2=w2, cb2=cb2))
    # bf16 MXU operands (f32 accumulation) -> tolerance loosened vs pure-f32.
    err = float(jnp.max(jnp.abs(out_nchw - ref)))
    assert err < 5e-2, f"max abs error vs f32 reference: {err}"
    print("KERNEL_OK")
</pallas_src>

<mosaic_0001>
module attributes {stable_mosaic.version = 11 : i64} {
  func.func @_fused_kernel(%arg0: i32, %arg1: memref<1x16x16x64xf32, #tpu.memory_space<vmem>>, %arg2: memref<1x64xf32, #tpu.memory_space<vmem>>, %arg3: memref<1x64xf32, #tpu.memory_space<vmem>>, %arg4: memref<576x64xbf16, #tpu.memory_space<vmem>>, %arg5: memref<1x64xf32, #tpu.memory_space<vmem>>, %arg6: memref<1x64xf32, #tpu.memory_space<vmem>>, %arg7: memref<1x64xf32, #tpu.memory_space<vmem>>, %arg8: memref<576x64xbf16, #tpu.memory_space<vmem>>, %arg9: memref<1x64xf32, #tpu.memory_space<vmem>>, %arg10: memref<64x64xf32, #tpu.memory_space<vmem>>, %arg11: memref<1x16x16x64xf32, #tpu.memory_space<vmem>>) attributes {dimension_semantics = [#tpu.dimension_semantics<parallel>], iteration_bounds = array<i64: 2>, scalar_prefetch = 0 : i64, scratch_operands = 0 : i64, tpu.core_type = #tpu.core_type<tc>, window_params = [{transform_indices = @transform_0, window_bounds = array<i64: 1, 16, 16, 64>}, {pipeline_mode = #tpu.pipeline_mode<synchronous>, transform_indices = @transform_1, window_bounds = array<i64: 1, 64>}, {pipeline_mode = #tpu.pipeline_mode<synchronous>, transform_indices = @transform_2, window_bounds = array<i64: 1, 64>}, {pipeline_mode = #tpu.pipeline_mode<synchronous>, transform_indices = @transform_3, window_bounds = array<i64: 576, 64>}, {pipeline_mode = #tpu.pipeline_mode<synchronous>, transform_indices = @transform_4, window_bounds = array<i64: 1, 64>}, {pipeline_mode = #tpu.pipeline_mode<synchronous>, transform_indices = @transform_5, window_bounds = array<i64: 1, 64>}, {pipeline_mode = #tpu.pipeline_mode<synchronous>, transform_indices = @transform_6, window_bounds = array<i64: 1, 64>}, {pipeline_mode = #tpu.pipeline_mode<synchronous>, transform_indices = @transform_7, window_bounds = array<i64: 576, 64>}, {pipeline_mode = #tpu.pipeline_mode<synchronous>, transform_indices = @transform_8, window_bounds = array<i64: 1, 64>}, {pipeline_mode = #tpu.pipeline_mode<synchronous>, transform_indices = @transform_9, window_bounds = array<i64: 64, 64>}, {transform_indices = @transform_10, window_bounds = array<i64: 1, 16, 16, 64>}]} {
    %c0 = arith.constant 0 : index
    %c0_0 = arith.constant 0 : index
    %c0_1 = arith.constant 0 : index
    %c0_2 = arith.constant 0 : index
    %0 = vector.load %arg1[%c0, %c0_0, %c0_1, %c0_2] : memref<1x16x16x64xf32, #tpu.memory_space<vmem>>, vector<1x16x16x64xf32>
    %1 = vector.shape_cast %0 : vector<1x16x16x64xf32> to vector<16x16x64xf32>
    %2 = vector.shape_cast %1 : vector<16x16x64xf32> to vector<1x16x16x64xf32>
    %cst = arith.constant dense<0.000000e+00> : vector<1xf32>
    %3 = vector.multi_reduction <add>, %2, %cst [1, 2, 3] : vector<1x16x16x64xf32> to vector<1xf32>
    %4 = vector.shape_cast %3 : vector<1xf32> to vector<1x1x1x1xf32>
    %5 = vector.extract %4[0, 0, 0, 0] : f32 from vector<1x1x1x1xf32>
    %cst_3 = arith.constant 1.638400e+04 : f32
    %6 = arith.divf %5, %cst_3 : f32
    %7 = arith.mulf %1, %1 : vector<16x16x64xf32>
    %8 = vector.shape_cast %7 : vector<16x16x64xf32> to vector<1x16x16x64xf32>
    %cst_4 = arith.constant dense<0.000000e+00> : vector<1xf32>
    %9 = vector.multi_reduction <add>, %8, %cst_4 [1, 2, 3] : vector<1x16x16x64xf32> to vector<1xf32>
    %10 = vector.shape_cast %9 : vector<1xf32> to vector<1x1x1x1xf32>
    %11 = vector.extract %10[0, 0, 0, 0] : f32 from vector<1x1x1x1xf32>
    %cst_5 = arith.constant 1.638400e+04 : f32
    %12 = arith.divf %11, %cst_5 : f32
    %13 = arith.mulf %6, %6 : f32
    %14 = arith.subf %12, %13 : f32
    %cst_6 = arith.constant 9.99999974E-6 : f32
    %15 = arith.addf %14, %cst_6 : f32
    %16 = math.rsqrt %15 : f32
    %c0_7 = arith.constant 0 : index
    %c0_8 = arith.constant 0 : index
    %17 = vector.load %arg2[%c0_7, %c0_8] : memref<1x64xf32, #tpu.memory_space<vmem>>, vector<1x64xf32>
    %18 = vector.broadcast %16 : f32 to vector<1x64xf32>
    %19 = arith.mulf %18, %17 : vector<1x64xf32>
    %c0_9 = arith.constant 0 : index
    %c0_10 = arith.constant 0 : index
    %20 = vector.load %arg3[%c0_9, %c0_10] : memref<1x64xf32, #tpu.memory_space<vmem>>, vector<1x64xf32>
    %21 = vector.broadcast %6 : f32 to vector<1x64xf32>
    %22 = arith.mulf %21, %19 : vector<1x64xf32>
    %23 = arith.subf %20, %22 : vector<1x64xf32>
    %24 = vector.shape_cast %19 : vector<1x64xf32> to vector<1x1x64xf32>
    %25 = vector.broadcast %24 : vector<1x1x64xf32> to vector<16x16x64xf32>
    %26 = arith.mulf %1, %25 : vector<16x16x64xf32>
    %27 = vector.shape_cast %23 : vector<1x64xf32> to vector<1x1x64xf32>
    %28 = vector.broadcast %27 : vector<1x1x64xf32> to vector<16x16x64xf32>
    %29 = arith.addf %26, %28 : vector<16x16x64xf32>
    %cst_11 = arith.constant 0.000000e+00 : f32
    %30 = vector.broadcast %cst_11 : f32 to vector<16x16x64xf32>
    %31 = arith.maximumf %29, %30 : vector<16x16x64xf32>
    %32 = tpu.iota {dimensions = array<i32: 1>} : vector<16x16x1xi32>
    %c0_i32 = arith.constant 0 : i32
    %33 = vector.broadcast %c0_i32 : i32 to vector<16x16x1xi32>
    %34 = arith.cmpi eq, %32, %33 : vector<16x16x1xi32>
    %35 = vector.extract_strided_slice %31 {offsets = [0, 0, 0], sizes = [16, 1, 64], strides = [1, 1, 1]} : vector<16x16x64xf32> to vector<16x1x64xf32>
    %c1_i32 = arith.constant 1 : i32
    %36 = tpu.dynamic_rotate %31 by %c1_i32 dim 1 : vector<16x16x64xf32>, i32 -> vector<16x16x64xf32>
    %37 = vector.shape_cast %34 : vector<16x16x1xi1> to vector<16x16x1xi1>
    %38 = vector.broadcast %37 : vector<16x16x1xi1> to vector<16x16x64xi1>
    %39 = vector.shape_cast %35 : vector<16x1x64xf32> to vector<16x1x64xf32>
    %40 = vector.broadcast %39 : vector<16x1x64xf32> to vector<16x16x64xf32>
    %41 = arith.select %38, %40, %36 : vector<16x16x64xi1>, vector<16x16x64xf32>
    %c15_i32 = arith.constant 15 : i32
    %42 = vector.broadcast %c15_i32 : i32 to vector<16x16x1xi32>
    %43 = arith.cmpi eq, %32, %42 : vector<16x16x1xi32>
    %44 = vector.extract_strided_slice %31 {offsets = [0, 15, 0], sizes = [16, 1, 64], strides = [1, 1, 1]} : vector<16x16x64xf32> to vector<16x1x64xf32>
    %c15_i32_12 = arith.constant 15 : i32
    %45 = tpu.dynamic_rotate %31 by %c15_i32_12 dim 1 : vector<16x16x64xf32>, i32 -> vector<16x16x64xf32>
    %46 = vector.shape_cast %43 : vector<16x16x1xi1> to vector<16x16x1xi1>
    %47 = vector.broadcast %46 : vector<16x16x1xi1> to vector<16x16x64xi1>
    %48 = vector.shape_cast %44 : vector<16x1x64xf32> to vector<16x1x64xf32>
    %49 = vector.broadcast %48 : vector<16x1x64xf32> to vector<16x16x64xf32>
    %50 = arith.select %47, %49, %45 : vector<16x16x64xi1>, vector<16x16x64xf32>
    %51 = arith.truncf %41 : vector<16x16x64xf32> to vector<16x16x64xbf16>
    %52 = arith.truncf %31 : vector<16x16x64xf32> to vector<16x16x64xbf16>
    %53 = arith.truncf %50 : vector<16x16x64xf32> to vector<16x16x64xbf16>
    %cst_13 = arith.constant 0.000000e+00 : f32
    %54 = vector.broadcast %cst_13 : f32 to vector<256x64xf32>
    %55 = vector.extract_strided_slice %51 {offsets = [0, 0, 0], sizes = [1, 16, 64], strides = [1, 1, 1]} : vector<16x16x64xbf16> to vector<1x16x64xbf16>
    %56 = vector.extract_strided_slice %51 {offsets = [15, 0, 0], sizes = [1, 16, 64], strides = [1, 1, 1]} : vector<16x16x64xbf16> to vector<1x16x64xbf16>
    %57 = tpu.concatenate %55, %51, %56 in 0 : vector<1x16x64xbf16>, vector<16x16x64xbf16>, vector<1x16x64xbf16> -> vector<18x16x64xbf16>
    %58 = vector.extract_strided_slice %57 {offsets = [0, 0, 0], sizes = [16, 16, 64], strides = [1, 1, 1]} : vector<18x16x64xbf16> to vector<16x16x64xbf16>
    %59 = vector.shape_cast %58 : vector<16x16x64xbf16> to vector<256x64xbf16>
    %c0_14 = arith.constant 0 : index
    %c0_15 = arith.constant 0 : index
    %60 = vector.load %arg4[%c0_14, %c0_15] : memref<576x64xbf16, #tpu.memory_space<vmem>>, vector<64x64xbf16>
    %cst_16 = arith.constant dense<0.000000e+00> : vector<256x64xf32>
    %61 = tpu.matmul %59, %60, %cst_16 {dimension_numbers = #tpu.dot_dimension_numbers<[1], [0], [0], [1], [0, 0, 1, 1], [], []>} : vector<256x64xbf16>, vector<64x64xbf16>, vector<256x64xf32> -> vector<256x64xf32>
    %62 = arith.addf %54, %61 : vector<256x64xf32>
    %63 = vector.extract_strided_slice %57 {offsets = [1, 0, 0], sizes = [16, 16, 64], strides = [1, 1, 1]} : vector<18x16x64xbf16> to vector<16x16x64xbf16>
    %64 = vector.shape_cast %63 : vector<16x16x64xbf16> to vector<256x64xbf16>
    %c192 = arith.constant 192 : index
    %c0_17 = arith.constant 0 : index
    %65 = vector.load %arg4[%c192, %c0_17] : memref<576x64xbf16, #tpu.memory_space<vmem>>, vector<64x64xbf16>
    %cst_18 = arith.constant dense<0.000000e+00> : vector<256x64xf32>
    %66 = tpu.matmul %64, %65, %cst_18 {dimension_numbers = #tpu.dot_dimension_numbers<[1], [0], [0], [1], [0, 0, 1, 1], [], []>} : vector<256x64xbf16>, vector<64x64xbf16>, vector<256x64xf32> -> vector<256x64xf32>
    %67 = arith.addf %62, %66 : vector<256x64xf32>
    %68 = vector.extract_strided_slice %57 {offsets = [2, 0, 0], sizes = [16, 16, 64], strides = [1, 1, 1]} : vector<18x16x64xbf16> to vector<16x16x64xbf16>
    %69 = vector.shape_cast %68 : vector<16x16x64xbf16> to vector<256x64xbf16>
    %c384 = arith.constant 384 : index
    %c0_19 = arith.constant 0 : index
    %70 = vector.load %arg4[%c384, %c0_19] : memref<576x64xbf16, #tpu.memory_space<vmem>>, vector<64x64xbf16>
    %cst_20 = arith.constant dense<0.000000e+00> : vector<256x64xf32>
    %71 = tpu.matmul %69, %70, %cst_20 {dimension_numbers = #tpu.dot_dimension_numbers<[1], [0], [0], [1], [0, 0, 1, 1], [], []>} : vector<256x64xbf16>, vector<64x64xbf16>, vector<256x64xf32> -> vector<256x64xf32>
    %72 = arith.addf %67, %71 : vector<256x64xf32>
    %73 = vector.extract_strided_slice %52 {offsets = [0, 0, 0], sizes = [1, 16, 64], strides = [1, 1, 1]} : vector<16x16x64xbf16> to vector<1x16x64xbf16>
    %74 = vector.extract_strided_slice %52 {offsets = [15, 0, 0], sizes = [1, 16, 64], strides = [1, 1, 1]} : vector<16x16x64xbf16> to vector<1x16x64xbf16>
    %75 = tpu.concatenate %73, %52, %74 in 0 : vector<1x16x64xbf16>, vector<16x16x64xbf16>, vector<1x16x64xbf16> -> vector<18x16x64xbf16>
    %76 = vector.extract_strided_slice %75 {offsets = [0, 0, 0], sizes = [16, 16, 64], strides = [1, 1, 1]} : vector<18x16x64xbf16> to vector<16x16x64xbf16>
    %77 = vector.shape_cast %76 : vector<16x16x64xbf16> to vector<256x64xbf16>
    %c64 = arith.constant 64 : index
    %c0_21 = arith.constant 0 : index
    %78 = vector.load %arg4[%c64, %c0_21] : memref<576x64xbf16, #tpu.memory_space<vmem>>, vector<64x64xbf16>
    %cst_22 = arith.constant dense<0.000000e+00> : vector<256x64xf32>
    %79 = tpu.matmul %77, %78, %cst_22 {dimension_numbers = #tpu.dot_dimension_numbers<[1], [0], [0], [1], [0, 0, 1, 1], [], []>} : vector<256x64xbf16>, vector<64x64xbf16>, vector<256x64xf32> -> vector<256x64xf32>
    %80 = arith.addf %72, %79 : vector<256x64xf32>
    %81 = vector.extract_strided_slice %75 {offsets = [1, 0, 0], sizes = [16, 16, 64], strides = [1, 1, 1]} : vector<18x16x64xbf16> to vector<16x16x64xbf16>
    %82 = vector.shape_cast %81 : vector<16x16x64xbf16> to vector<256x64xbf16>
    %c256 = arith.constant 256 : index
    %c0_23 = arith.constant 0 : index
    %83 = vector.load %arg4[%c256, %c0_23] : memref<576x64xbf16, #tpu.memory_space<vmem>>, vector<64x64xbf16>
    %cst_24 = arith.constant dense<0.000000e+00> : vector<256x64xf32>
    %84 = tpu.matmul %82, %83, %cst_24 {dimension_numbers = #tpu.dot_dimension_numbers<[1], [0], [0], [1], [0, 0, 1, 1], [], []>} : vector<256x64xbf16>, vector<64x64xbf16>, vector<256x64xf32> -> vector<256x64xf32>
    %85 = arith.addf %80, %84 : vector<256x64xf32>
    %86 = vector.extract_strided_slice %75 {offsets = [2, 0, 0], sizes = [16, 16, 64], strides = [1, 1, 1]} : vector<18x16x64xbf16> to vector<16x16x64xbf16>
    %87 = vector.shape_cast %86 : vector<16x16x64xbf16> to vector<256x64xbf16>
    %c448 = arith.constant 448 : index
    %c0_25 = arith.constant 0 : index
    %88 = vector.load %arg4[%c448, %c0_25] : memref<576x64xbf16, #tpu.memory_space<vmem>>, vector<64x64xbf16>
    %cst_26 = arith.constant dense<0.000000e+00> : vector<256x64xf32>
    %89 = tpu.matmul %87, %88, %cst_26 {dimension_numbers = #tpu.dot_dimension_numbers<[1], [0], [0], [1], [0, 0, 1, 1], [], []>} : vector<256x64xbf16>, vector<64x64xbf16>, vector<256x64xf32> -> vector<256x64xf32>
    %90 = arith.addf %85, %89 : vector<256x64xf32>
    %91 = vector.extract_strided_slice %53 {offsets = [0, 0, 0], sizes = [1, 16, 64], strides = [1, 1, 1]} : vector<16x16x64xbf16> to vector<1x16x64xbf16>
    %92 = vector.extract_strided_slice %53 {offsets = [15, 0, 0], sizes = [1, 16, 64], strides = [1, 1, 1]} : vector<16x16x64xbf16> to vector<1x16x64xbf16>
    %93 = tpu.concatenate %91, %53, %92 in 0 : vector<1x16x64xbf16>, vector<16x16x64xbf16>, vector<1x16x64xbf16> -> vector<18x16x64xbf16>
    %94 = vector.extract_strided_slice %93 {offsets = [0, 0, 0], sizes = [16, 16, 64], strides = [1, 1, 1]} : vector<18x16x64xbf16> to vector<16x16x64xbf16>
    %95 = vector.shape_cast %94 : vector<16x16x64xbf16> to vector<256x64xbf16>
    %c128 = arith.constant 128 : index
    %c0_27 = arith.constant 0 : index
    %96 = vector.load %arg4[%c128, %c0_27] : memref<576x64xbf16, #tpu.memory_space<vmem>>, vector<64x64xbf16>
    %cst_28 = arith.constant dense<0.000000e+00> : vector<256x64xf32>
    %97 = tpu.matmul %95, %96, %cst_28 {dimension_numbers = #tpu.dot_dimension_numbers<[1], [0], [0], [1], [0, 0, 1, 1], [], []>} : vector<256x64xbf16>, vector<64x64xbf16>, vector<256x64xf32> -> vector<256x64xf32>
    %98 = arith.addf %90, %97 : vector<256x64xf32>
    %99 = vector.extract_strided_slice %93 {offsets = [1, 0, 0], sizes = [16, 16, 64], strides = [1, 1, 1]} : vector<18x16x64xbf16> to vector<16x16x64xbf16>
    %100 = vector.shape_cast %99 : vector<16x16x64xbf16> to vector<256x64xbf16>
    %c320 = arith.constant 320 : index
    %c0_29 = arith.constant 0 : index
    %101 = vector.load %arg4[%c320, %c0_29] : memref<576x64xbf16, #tpu.memory_space<vmem>>, vector<64x64xbf16>
    %cst_30 = arith.constant dense<0.000000e+00> : vector<256x64xf32>
    %102 = tpu.matmul %100, %101, %cst_30 {dimension_numbers = #tpu.dot_dimension_numbers<[1], [0], [0], [1], [0, 0, 1, 1], [], []>} : vector<256x64xbf16>, vector<64x64xbf16>, vector<256x64xf32> -> vector<256x64xf32>
    %103 = arith.addf %98, %102 : vector<256x64xf32>
    %104 = vector.extract_strided_slice %93 {offsets = [2, 0, 0], sizes = [16, 16, 64], strides = [1, 1, 1]} : vector<18x16x64xbf16> to vector<16x16x64xbf16>
    %105 = vector.shape_cast %104 : vector<16x16x64xbf16> to vector<256x64xbf16>
    %c512 = arith.constant 512 : index
    %c0_31 = arith.constant 0 : index
    %106 = vector.load %arg4[%c512, %c0_31] : memref<576x64xbf16, #tpu.memory_space<vmem>>, vector<64x64xbf16>
    %cst_32 = arith.constant dense<0.000000e+00> : vector<256x64xf32>
    %107 = tpu.matmul %105, %106, %cst_32 {dimension_numbers = #tpu.dot_dimension_numbers<[1], [0], [0], [1], [0, 0, 1, 1], [], []>} : vector<256x64xbf16>, vector<64x64xbf16>, vector<256x64xf32> -> vector<256x64xf32>
    %108 = arith.addf %103, %107 : vector<256x64xf32>
    %c0_33 = arith.constant 0 : index
    %c0_34 = arith.constant 0 : index
    %109 = vector.load %arg5[%c0_33, %c0_34] : memref<1x64xf32, #tpu.memory_space<vmem>>, vector<1x64xf32>
    %110 = vector.broadcast %109 : vector<1x64xf32> to vector<256x64xf32>
    %111 = arith.addf %108, %110 : vector<256x64xf32>
    %cst_35 = arith.constant dense<0.000000e+00> : vector<64xf32>
    %112 = vector.multi_reduction <add>, %111, %cst_35 [0] : vector<256x64xf32> to vector<64xf32>
    %113 = vector.shape_cast %112 : vector<64xf32> to vector<1x64xf32>
    %114 = arith.mulf %111, %111 : vector<256x64xf32>
    %cst_36 = arith.constant dense<0.000000e+00> : vector<64xf32>
    %115 = vector.multi_reduction <add>, %114, %cst_36 [0] : vector<256x64xf32> to vector<64xf32>
    %116 = vector.shape_cast %115 : vector<64xf32> to vector<1x64xf32>
    %117 = tpu.concatenate %113, %116 in 0 : vector<1x64xf32>, vector<1x64xf32> -> vector<2x64xf32>
    %c0_37 = arith.constant 0 : index
    %c0_38 = arith.constant 0 : index
    %118 = vector.load %arg10[%c0_37, %c0_38] : memref<64x64xf32, #tpu.memory_space<vmem>>, vector<64x64xf32>
    %cst_39 = arith.constant dense<0.000000e+00> : vector<2x64xf32>
    %119 = tpu.matmul %117, %118, %cst_39 {dimension_numbers = #tpu.dot_dimension_numbers<[1], [0], [0], [1], [0, 0, 1, 1], [], []>} : vector<2x64xf32>, vector<64x64xf32>, vector<2x64xf32> -> vector<2x64xf32>
    %120 = vector.extract_strided_slice %119 {offsets = [0, 0], sizes = [1, 64], strides = [1, 1]} : vector<2x64xf32> to vector<1x64xf32>
    %121 = vector.extract_strided_slice %119 {offsets = [1, 0], sizes = [1, 64], strides = [1, 1]} : vector<2x64xf32> to vector<1x64xf32>
    %122 = arith.mulf %120, %120 : vector<1x64xf32>
    %123 = arith.subf %121, %122 : vector<1x64xf32>
    %cst_40 = arith.constant 9.99999974E-6 : f32
    %124 = vector.broadcast %cst_40 : f32 to vector<1x64xf32>
    %125 = arith.addf %123, %124 : vector<1x64xf32>
    %126 = math.rsqrt %125 : vector<1x64xf32>
    %c0_41 = arith.constant 0 : index
    %c0_42 = arith.constant 0 : index
    %127 = vector.load %arg6[%c0_41, %c0_42] : memref<1x64xf32, #tpu.memory_space<vmem>>, vector<1x64xf32>
    %128 = arith.mulf %126, %127 : vector<1x64xf32>
    %c0_43 = arith.constant 0 : index
    %c0_44 = arith.constant 0 : index
    %129 = vector.load %arg7[%c0_43, %c0_44] : memref<1x64xf32, #tpu.memory_space<vmem>>, vector<1x64xf32>
    %130 = arith.mulf %120, %128 : vector<1x64xf32>
    %131 = arith.subf %129, %130 : vector<1x64xf32>
    %132 = vector.broadcast %128 : vector<1x64xf32> to vector<256x64xf32>
    %133 = arith.mulf %111, %132 : vector<256x64xf32>
    %134 = vector.broadcast %131 : vector<1x64xf32> to vector<256x64xf32>
    %135 = arith.addf %133, %134 : vector<256x64xf32>
    %cst_45 = arith.constant 0.000000e+00 : f32
    %136 = vector.broadcast %cst_45 : f32 to vector<256x64xf32>
    %137 = arith.maximumf %135, %136 : vector<256x64xf32>
    %138 = vector.shape_cast %137 : vector<256x64xf32> to vector<16x16x64xf32>
    %139 = tpu.iota {dimensions = array<i32: 1>} : vector<16x16x1xi32>
    %c0_i32_46 = arith.constant 0 : i32
    %140 = vector.broadcast %c0_i32_46 : i32 to vector<16x16x1xi32>
    %141 = arith.cmpi eq, %139, %140 : vector<16x16x1xi32>
    %142 = vector.extract_strided_slice %138 {offsets = [0, 0, 0], sizes = [16, 1, 64], strides = [1, 1, 1]} : vector<16x16x64xf32> to vector<16x1x64xf32>
    %c1_i32_47 = arith.constant 1 : i32
    %143 = tpu.dynamic_rotate %138 by %c1_i32_47 dim 1 : vector<16x16x64xf32>, i32 -> vector<16x16x64xf32>
    %144 = vector.shape_cast %141 : vector<16x16x1xi1> to vector<16x16x1xi1>
    %145 = vector.broadcast %144 : vector<16x16x1xi1> to vector<16x16x64xi1>
    %146 = vector.shape_cast %142 : vector<16x1x64xf32> to vector<16x1x64xf32>
    %147 = vector.broadcast %146 : vector<16x1x64xf32> to vector<16x16x64xf32>
    %148 = arith.select %145, %147, %143 : vector<16x16x64xi1>, vector<16x16x64xf32>
    %c15_i32_48 = arith.constant 15 : i32
    %149 = vector.broadcast %c15_i32_48 : i32 to vector<16x16x1xi32>
    %150 = arith.cmpi eq, %139, %149 : vector<16x16x1xi32>
    %151 = vector.extract_strided_slice %138 {offsets = [0, 15, 0], sizes = [16, 1, 64], strides = [1, 1, 1]} : vector<16x16x64xf32> to vector<16x1x64xf32>
    %c15_i32_49 = arith.constant 15 : i32
    %152 = tpu.dynamic_rotate %138 by %c15_i32_49 dim 1 : vector<16x16x64xf32>, i32 -> vector<16x16x64xf32>
    %153 = vector.shape_cast %150 : vector<16x16x1xi1> to vector<16x16x1xi1>
    %154 = vector.broadcast %153 : vector<16x16x1xi1> to vector<16x16x64xi1>
    %155 = vector.shape_cast %151 : vector<16x1x64xf32> to vector<16x1x64xf32>
    %156 = vector.broadcast %155 : vector<16x1x64xf32> to vector<16x16x64xf32>
    %157 = arith.select %154, %156, %152 : vector<16x16x64xi1>, vector<16x16x64xf32>
    %158 = arith.truncf %148 : vector<16x16x64xf32> to vector<16x16x64xbf16>
    %159 = arith.truncf %138 : vector<16x16x64xf32> to vector<16x16x64xbf16>
    %160 = arith.truncf %157 : vector<16x16x64xf32> to vector<16x16x64xbf16>
    %cst_50 = arith.constant 0.000000e+00 : f32
    %161 = vector.broadcast %cst_50 : f32 to vector<256x64xf32>
    %162 = vector.extract_strided_slice %158 {offsets = [0, 0, 0], sizes = [1, 16, 64], strides = [1, 1, 1]} : vector<16x16x64xbf16> to vector<1x16x64xbf16>
    %163 = vector.extract_strided_slice %158 {offsets = [15, 0, 0], sizes = [1, 16, 64], strides = [1, 1, 1]} : vector<16x16x64xbf16> to vector<1x16x64xbf16>
    %164 = tpu.concatenate %162, %158, %163 in 0 : vector<1x16x64xbf16>, vector<16x16x64xbf16>, vector<1x16x64xbf16> -> vector<18x16x64xbf16>
    %165 = vector.extract_strided_slice %164 {offsets = [0, 0, 0], sizes = [16, 16, 64], strides = [1, 1, 1]} : vector<18x16x64xbf16> to vector<16x16x64xbf16>
    %166 = vector.shape_cast %165 : vector<16x16x64xbf16> to vector<256x64xbf16>
    %c0_51 = arith.constant 0 : index
    %c0_52 = arith.constant 0 : index
    %167 = vector.load %arg8[%c0_51, %c0_52] : memref<576x64xbf16, #tpu.memory_space<vmem>>, vector<64x64xbf16>
    %cst_53 = arith.constant dense<0.000000e+00> : vector<256x64xf32>
    %168 = tpu.matmul %166, %167, %cst_53 {dimension_numbers = #tpu.dot_dimension_numbers<[1], [0], [0], [1], [0, 0, 1, 1], [], []>} : vector<256x64xbf16>, vector<64x64xbf16>, vector<256x64xf32> -> vector<256x64xf32>
    %169 = arith.addf %161, %168 : vector<256x64xf32>
    %170 = vector.extract_strided_slice %164 {offsets = [1, 0, 0], sizes = [16, 16, 64], strides = [1, 1, 1]} : vector<18x16x64xbf16> to vector<16x16x64xbf16>
    %171 = vector.shape_cast %170 : vector<16x16x64xbf16> to vector<256x64xbf16>
    %c192_54 = arith.constant 192 : index
    %c0_55 = arith.constant 0 : index
    %172 = vector.load %arg8[%c192_54, %c0_55] : memref<576x64xbf16, #tpu.memory_space<vmem>>, vector<64x64xbf16>
    %cst_56 = arith.constant dense<0.000000e+00> : vector<256x64xf32>
    %173 = tpu.matmul %171, %172, %cst_56 {dimension_numbers = #tpu.dot_dimension_numbers<[1], [0], [0], [1], [0, 0, 1, 1], [], []>} : vector<256x64xbf16>, vector<64x64xbf16>, vector<256x64xf32> -> vector<256x64xf32>
    %174 = arith.addf %169, %173 : vector<256x64xf32>
    %175 = vector.extract_strided_slice %164 {offsets = [2, 0, 0], sizes = [16, 16, 64], strides = [1, 1, 1]} : vector<18x16x64xbf16> to vector<16x16x64xbf16>
    %176 = vector.shape_cast %175 : vector<16x16x64xbf16> to vector<256x64xbf16>
    %c384_57 = arith.constant 384 : index
    %c0_58 = arith.constant 0 : index
    %177 = vector.load %arg8[%c384_57, %c0_58] : memref<576x64xbf16, #tpu.memory_space<vmem>>, vector<64x64xbf16>
    %cst_59 = arith.constant dense<0.000000e+00> : vector<256x64xf32>
    %178 = tpu.matmul %176, %177, %cst_59 {dimension_numbers = #tpu.dot_dimension_numbers<[1], [0], [0], [1], [0, 0, 1, 1], [], []>} : vector<256x64xbf16>, vector<64x64xbf16>, vector<256x64xf32> -> vector<256x64xf32>
    %179 = arith.addf %174, %178 : vector<256x64xf32>
    %180 = vector.extract_strided_slice %159 {offsets = [0, 0, 0], sizes = [1, 16, 64], strides = [1, 1, 1]} : vector<16x16x64xbf16> to vector<1x16x64xbf16>
    %181 = vector.extract_strided_slice %159 {offsets = [15, 0, 0], sizes = [1, 16, 64], strides = [1, 1, 1]} : vector<16x16x64xbf16> to vector<1x16x64xbf16>
    %182 = tpu.concatenate %180, %159, %181 in 0 : vector<1x16x64xbf16>, vector<16x16x64xbf16>, vector<1x16x64xbf16> -> vector<18x16x64xbf16>
    %183 = vector.extract_strided_slice %182 {offsets = [0, 0, 0], sizes = [16, 16, 64], strides = [1, 1, 1]} : vector<18x16x64xbf16> to vector<16x16x64xbf16>
    %184 = vector.shape_cast %183 : vector<16x16x64xbf16> to vector<256x64xbf16>
    %c64_60 = arith.constant 64 : index
    %c0_61 = arith.constant 0 : index
    %185 = vector.load %arg8[%c64_60, %c0_61] : memref<576x64xbf16, #tpu.memory_space<vmem>>, vector<64x64xbf16>
    %cst_62 = arith.constant dense<0.000000e+00> : vector<256x64xf32>
    %186 = tpu.matmul %184, %185, %cst_62 {dimension_numbers = #tpu.dot_dimension_numbers<[1], [0], [0], [1], [0, 0, 1, 1], [], []>} : vector<256x64xbf16>, vector<64x64xbf16>, vector<256x64xf32> -> vector<256x64xf32>
    %187 = arith.addf %179, %186 : vector<256x64xf32>
    %188 = vector.extract_strided_slice %182 {offsets = [1, 0, 0], sizes = [16, 16, 64], strides = [1, 1, 1]} : vector<18x16x64xbf16> to vector<16x16x64xbf16>
    %189 = vector.shape_cast %188 : vector<16x16x64xbf16> to vector<256x64xbf16>
    %c256_63 = arith.constant 256 : index
    %c0_64 = arith.constant 0 : index
    %190 = vector.load %arg8[%c256_63, %c0_64] : memref<576x64xbf16, #tpu.memory_space<vmem>>, vector<64x64xbf16>
    %cst_65 = arith.constant dense<0.000000e+00> : vector<256x64xf32>
    %191 = tpu.matmul %189, %190, %cst_65 {dimension_numbers = #tpu.dot_dimension_numbers<[1], [0], [0], [1], [0, 0, 1, 1], [], []>} : vector<256x64xbf16>, vector<64x64xbf16>, vector<256x64xf32> -> vector<256x64xf32>
    %192 = arith.addf %187, %191 : vector<256x64xf32>
    %193 = vector.extract_strided_slice %182 {offsets = [2, 0, 0], sizes = [16, 16, 64], strides = [1, 1, 1]} : vector<18x16x64xbf16> to vector<16x16x64xbf16>
    %194 = vector.shape_cast %193 : vector<16x16x64xbf16> to vector<256x64xbf16>
    %c448_66 = arith.constant 448 : index
    %c0_67 = arith.constant 0 : index
    %195 = vector.load %arg8[%c448_66, %c0_67] : memref<576x64xbf16, #tpu.memory_space<vmem>>, vector<64x64xbf16>
    %cst_68 = arith.constant dense<0.000000e+00> : vector<256x64xf32>
    %196 = tpu.matmul %194, %195, %cst_68 {dimension_numbers = #tpu.dot_dimension_numbers<[1], [0], [0], [1], [0, 0, 1, 1], [], []>} : vector<256x64xbf16>, vector<64x64xbf16>, vector<256x64xf32> -> vector<256x64xf32>
    %197 = arith.addf %192, %196 : vector<256x64xf32>
    %198 = vector.extract_strided_slice %160 {offsets = [0, 0, 0], sizes = [1, 16, 64], strides = [1, 1, 1]} : vector<16x16x64xbf16> to vector<1x16x64xbf16>
    %199 = vector.extract_strided_slice %160 {offsets = [15, 0, 0], sizes = [1, 16, 64], strides = [1, 1, 1]} : vector<16x16x64xbf16> to vector<1x16x64xbf16>
    %200 = tpu.concatenate %198, %160, %199 in 0 : vector<1x16x64xbf16>, vector<16x16x64xbf16>, vector<1x16x64xbf16> -> vector<18x16x64xbf16>
    %201 = vector.extract_strided_slice %200 {offsets = [0, 0, 0], sizes = [16, 16, 64], strides = [1, 1, 1]} : vector<18x16x64xbf16> to vector<16x16x64xbf16>
    %202 = vector.shape_cast %201 : vector<16x16x64xbf16> to vector<256x64xbf16>
    %c128_69 = arith.constant 128 : index
    %c0_70 = arith.constant 0 : index
    %203 = vector.load %arg8[%c128_69, %c0_70] : memref<576x64xbf16, #tpu.memory_space<vmem>>, vector<64x64xbf16>
    %cst_71 = arith.constant dense<0.000000e+00> : vector<256x64xf32>
    %204 = tpu.matmul %202, %203, %cst_71 {dimension_numbers = #tpu.dot_dimension_numbers<[1], [0], [0], [1], [0, 0, 1, 1], [], []>} : vector<256x64xbf16>, vector<64x64xbf16>, vector<256x64xf32> -> vector<256x64xf32>
    %205 = arith.addf %197, %204 : vector<256x64xf32>
    %206 = vector.extract_strided_slice %200 {offsets = [1, 0, 0], sizes = [16, 16, 64], strides = [1, 1, 1]} : vector<18x16x64xbf16> to vector<16x16x64xbf16>
    %207 = vector.shape_cast %206 : vector<16x16x64xbf16> to vector<256x64xbf16>
    %c320_72 = arith.constant 320 : index
    %c0_73 = arith.constant 0 : index
    %208 = vector.load %arg8[%c320_72, %c0_73] : memref<576x64xbf16, #tpu.memory_space<vmem>>, vector<64x64xbf16>
    %cst_74 = arith.constant dense<0.000000e+00> : vector<256x64xf32>
    %209 = tpu.matmul %207, %208, %cst_74 {dimension_numbers = #tpu.dot_dimension_numbers<[1], [0], [0], [1], [0, 0, 1, 1], [], []>} : vector<256x64xbf16>, vector<64x64xbf16>, vector<256x64xf32> -> vector<256x64xf32>
    %210 = arith.addf %205, %209 : vector<256x64xf32>
    %211 = vector.extract_strided_slice %200 {offsets = [2, 0, 0], sizes = [16, 16, 64], strides = [1, 1, 1]} : vector<18x16x64xbf16> to vector<16x16x64xbf16>
    %212 = vector.shape_cast %211 : vector<16x16x64xbf16> to vector<256x64xbf16>
    %c512_75 = arith.constant 512 : index
    %c0_76 = arith.constant 0 : index
    %213 = vector.load %arg8[%c512_75, %c0_76] : memref<576x64xbf16, #tpu.memory_space<vmem>>, vector<64x64xbf16>
    %cst_77 = arith.constant dense<0.000000e+00> : vector<256x64xf32>
    %214 = tpu.matmul %212, %213, %cst_77 {dimension_numbers = #tpu.dot_dimension_numbers<[1], [0], [0], [1], [0, 0, 1, 1], [], []>} : vector<256x64xbf16>, vector<64x64xbf16>, vector<256x64xf32> -> vector<256x64xf32>
    %215 = arith.addf %210, %214 : vector<256x64xf32>
    %c0_78 = arith.constant 0 : index
    %c0_79 = arith.constant 0 : index
    %216 = vector.load %arg9[%c0_78, %c0_79] : memref<1x64xf32, #tpu.memory_space<vmem>>, vector<1x64xf32>
    %217 = vector.broadcast %216 : vector<1x64xf32> to vector<256x64xf32>
    %218 = arith.addf %215, %217 : vector<256x64xf32>
    %219 = vector.shape_cast %218 : vector<256x64xf32> to vector<1x16x16x64xf32>
    %c0_80 = arith.constant 0 : index
    %c0_81 = arith.constant 0 : index
    %c0_82 = arith.constant 0 : index
    %c0_83 = arith.constant 0 : index
    %220 = vector.load %arg1[%c0_80, %c0_81, %c0_82, %c0_83] : memref<1x16x16x64xf32, #tpu.memory_space<vmem>>, vector<1x16x16x64xf32>
    %221 = arith.addf %219, %220 : vector<1x16x16x64xf32>
    %c0_84 = arith.constant 0 : index
    %c0_85 = arith.constant 0 : index
    %c0_86 = arith.constant 0 : index
    %c0_87 = arith.constant 0 : index
    %222 = vector.load %arg11[%c0_84, %c0_85, %c0_86, %c0_87] : memref<1x16x16x64xf32, #tpu.memory_space<vmem>>, vector<1x16x16x64xf32>
    tpu.vector_store %arg11[%c0_84, %c0_85, %c0_86, %c0_87], %221 {strides = array<i32>} : memref<1x16x16x64xf32, #tpu.memory_space<vmem>>, vector<1x16x16x64xf32>,
    return
  }
  func.func @transform_0(%arg0: i32) -> (i32, i32, i32, i32) {
    %c0_i32 = arith.constant 0 : i32
    %c0_i32_0 = arith.constant 0 : i32
    %c0_i32_1 = arith.constant 0 : i32
    %c0_i32_2 = arith.constant 0 : i32
    return %arg0, %c0_i32, %c0_i32_0, %c0_i32_1 : i32, i32, i32, i32
  }
  func.func @transform_1(%arg0: i32) -> (i32, i32) {
    %c0_i32 = arith.constant 0 : i32
    %c0_i32_0 = arith.constant 0 : i32
    %c0_i32_1 = arith.constant 0 : i32
    return %c0_i32, %c0_i32_0 : i32, i32
  }
  func.func @transform_2(%arg0: i32) -> (i32, i32) {
    %c0_i32 = arith.constant 0 : i32
    %c0_i32_0 = arith.constant 0 : i32
    %c0_i32_1 = arith.constant 0 : i32
    return %c0_i32, %c0_i32_0 : i32, i32
  }
  func.func @transform_3(%arg0: i32) -> (i32, i32) {
    %c0_i32 = arith.constant 0 : i32
    %c0_i32_0 = arith.constant 0 : i32
    %c0_i32_1 = arith.constant 0 : i32
    return %c0_i32, %c0_i32_0 : i32, i32
  }
  func.func @transform_4(%arg0: i32) -> (i32, i32) {
    %c0_i32 = arith.constant 0 : i32
    %c0_i32_0 = arith.constant 0 : i32
    %c0_i32_1 = arith.constant 0 : i32
    return %c0_i32, %c0_i32_0 : i32, i32
  }
  func.func @transform_5(%arg0: i32) -> (i32, i32) {
    %c0_i32 = arith.constant 0 : i32
    %c0_i32_0 = arith.constant 0 : i32
    %c0_i32_1 = arith.constant 0 : i32
    return %c0_i32, %c0_i32_0 : i32, i32
  }
  func.func @transform_6(%arg0: i32) -> (i32, i32) {
    %c0_i32 = arith.constant 0 : i32
    %c0_i32_0 = arith.constant 0 : i32
    %c0_i32_1 = arith.constant 0 : i32
    return %c0_i32, %c0_i32_0 : i32, i32
  }
  func.func @transform_7(%arg0: i32) -> (i32, i32) {
    %c0_i32 = arith.constant 0 : i32
    %c0_i32_0 = arith.constant 0 : i32
    %c0_i32_1 = arith.constant 0 : i32
    return %c0_i32, %c0_i32_0 : i32, i32
  }
  func.func @transform_8(%arg0: i32) -> (i32, i32) {
    %c0_i32 = arith.constant 0 : i32
    %c0_i32_0 = arith.constant 0 : i32
    %c0_i32_1 = arith.constant 0 : i32
    return %c0_i32, %c0_i32_0 : i32, i32
  }
  func.func @transform_9(%arg0: i32) -> (i32, i32) {
    %c0_i32 = arith.constant 0 : i32
    %c0_i32_0 = arith.constant 0 : i32
    %c0_i32_1 = arith.constant 0 : i32
    return %c0_i32, %c0_i32_0 : i32, i32
  }
  func.func @transform_10(%arg0: i32) -> (i32, i32, i32, i32) {
    %c0_i32 = arith.constant 0 : i32
    %c0_i32_0 = arith.constant 0 : i32
    %c0_i32_1 = arith.constant 0 : i32
    %c0_i32_2 = arith.constant 0 : i32
    return %arg0, %c0_i32, %c0_i32_0, %c0_i32_1 : i32, i32, i32, i32
  }
}

</mosaic_0001>

<bundles_post_ra>
// kernel: tpu_custom_call.1
= control target key start
LH: loop header
LB: loop body
LE: loop exit
PB: predicated region body
PF: predicated region fallthrough
CT: control target
= control target key end

     0   :  { %s11403_s0 = inlined_call_operand.vmem [shape: f32[2,16,16,64], index: 0, kind: input, shape index: {}]   ;;  %s11404_s1 = inlined_call_operand.vmem [shape: f32[1,64], index: 1, kind: input, shape index: {}]   ;;  %s11405_s2 = inlined_call_operand.vmem [shape: f32[1,64], index: 2, kind: input, shape index: {}]   ;;  %s11406_s3 = inlined_call_operand.vmem [shape: bf16[576,64], index: 3, kind: input, shape index: {}]   ;;  %s11407_s4 = inlined_call_operand.vmem [shape: f32[1,64], index: 4, kind: input, shape index: {}]   ;;  %s11408_s5 = inlined_call_operand.vmem [shape: f32[1,64], index: 5, kind: input, shape index: {}]   ;;  %s11409_s6 = inlined_call_operand.vmem [shape: f32[1,64], index: 6, kind: input, shape index: {}]   ;;  %s11410_s7 = inlined_call_operand.vmem [shape: bf16[576,64], index: 7, kind: input, shape index: {}]   ;;  %s11411_s8 = inlined_call_operand.vmem [shape: f32[1,64], index: 8, kind: input, shape index: {}]   ;;  %s11412_s9 = inlined_call_operand.vmem [shape: f32[64,64], index: 9, kind: input, shape index: {}]   ;;  %s11413_s10 = inlined_call_operand.hbm [shape: f32[2,16,16,64], index: 10, kind: output, shape index: {}]  }
   0x1   :  { %11473 = sst [smem:[#allocation26_spill]] %s11403_s0 }
   0x2   :  { %15 = vsyncpa [#allocation3], 0 }
   0x3   :  { %17 = vsyncpa [#allocation3 + $0x1], 0  ;;  %s8549_s13 = smov 0   ;;  %s8551_s14 = smov 0  }
   0x4   :  { %s8553_s15 = smov 0   ;;  %s8555_s16 = smov 0  }
   0x5 LB: > { %s8570_s17 = sadd.s32 4294967295, %s8486_s16   ;;  %s6256_s18 = sadd.s32 4294967294, %s8486_s16   ;;  %s8486_s16 = sphi %s8555_s16, %s11586_s16   ;;  %s8482_s15 = sphi %s8553_s15, %s11585_s15   ;;  %s8478_s14 = sphi %s8551_s14, %s11584_s14   ;;  %s8474_s13 = sphi %s8549_s13, %s11583_s13  }
   0x6   : > { %s8574_s19 = sadd.s32 1, %s8486_s16   ;;  %s245_s20 = sadd.s32 1, %s8482_s15 }
   0x7   : > { %s242_s21 = ssub.s32 %s8486_s16, %s8574_s19  ;;  %p255_p0 = scmp.ne.s32.totalorder %s8482_s15, %s8478_s14 }
   0x8   : > { %p243_p1 = scmp.eq.s32.totalorder %s242_s21, 0  ;;  %p256_p2 = scmp.eq.s32.totalorder %s8570_s17, 1 }
   0x9   : > { %p261_p3 = scmp.ne.s32.totalorder %s8478_s14, %s8474_s13  ;;  %p262_p4 = scmp.eq.s32.totalorder %s6256_s18, 1 }
   0xa   : > { %s8585_s22 = scalar_select %p243_p1, %s8482_s15, %s245_s20  }
   0xb   : > { %p8587_p5 = por %p256_p2, %p255_p0  ;;  %p8591_p6 = por %p262_p4, %p261_p3 }
   0xc   : > { %p6259_p7 = scmp.ge.s32.totalorder %s8486_s16, 1  ;;  %p315_p8 = scmp.lt.s32.totalorder %s8486_s16, 3 }
   0xe   : > { %p316_p9 = pnand %p6259_p7, %p315_p8 }
  0x10   : > { %319 = sbr.rel (%p316_p9) target bundleno = 2281 (0x8e9), region = 60 }
  0x17   : > { %p353_p10 = scmp.lt.s32.totalorder %s8570_s17, 1  ;;  %vm391_vm0 = vcmask 523264   ;;  %s11476_s0 = sld [smem:[#allocation26_spill]]  ;;  %vm8489_vm5 = vmmov 0   ;;  %vm3394_vm6 = vcmask 1040384  }
  0x19   : > { %s354_s25 = scalar_select %p353_p10, %s8570_s17, 1 }
  0x1b   : > { %s6632_s26 = sshll.u32 %s354_s25, 8 }
  0x1d   : > { %s8602_s29 = scalar_lea.vmem %s11476_s0, %s6632_s26  ;;  %s6633_s26 = sshll.u32 %s8570_s17, 12 }
  0x1e   : > { %v8605_v0 = vld [vmem:[%s8602_s29] sm:$0xff]  ;;  %v8608_v1 = vld [vmem:[%s8602_s29 + $0x8] sm:$0xff]  ;;  %v8611_v2 = vld [vmem:[%s8602_s29 + $0x10] sm:$0xff] }
  0x1f   : > { %11477 = vst [vmem:[#allocation5_spill] sm:$0xff] %v8611_v2  ;;  %v8614_v3 = vld [vmem:[%s8602_s29 + $0x18] sm:$0xff]  ;;  %v8617_v4 = vld [vmem:[%s8602_s29 + $0x20] sm:$0xff]  ;;  %v8620_v5 = vld [vmem:[%s8602_s29 + $0x28] sm:$0xff]  ;;  %v392_v6 = vsel %vm391_vm0, %v8605_v0, 0.0  ;;  %v393_v7 = vsel %vm391_vm0, %v8608_v1, 0.0 }
  0x20   : > { %11478 = vst [vmem:[#allocation6_spill] sm:$0xff] %v8614_v3  ;;  %11479 = vst [vmem:[#allocation7_spill] sm:$0xff] %v8617_v4  ;;  %v395_v8 = vsel %vm391_vm0, %v8611_v2, 0.0  ;;  %v8629_v9 = vld [vmem:[%s8602_s29 + $0x30] sm:$0xff]  ;;  %v8632_v10 = vld [vmem:[%s8602_s29 + $0x38] sm:$0xff]  ;;  %v394_v12 = vadd.f32 %v393_v7, %v392_v6  ;;  %v397_v13 = vsel %vm391_vm0, %v8614_v3, 0.0 }
  0x21   : > { %11480 = vst [vmem:[#allocation8_spill] sm:$0xff] %v8620_v5  ;;  %11481 = vst [vmem:[#allocation9_spill] sm:$0xff] %v8629_v9  ;;  %v8635_v11 = vld [vmem:[%s8602_s29 + $0x40] sm:$0xff]  ;;  %v399_v14 = vsel %vm391_vm0, %v8617_v4, 0.0  ;;  %v401_v15 = vsel %vm391_vm0, %v8620_v5, 0.0  ;;  %v8644_v16 = vld [vmem:[%s8602_s29 + $0x48] sm:$0xff] }
  0x22   : > { %11482 = vst [vmem:[#allocation10_spill] sm:$0xff] %v8632_v10  ;;  %11483 = vst [vmem:[#allocation11_spill] sm:$0xff] %v8635_v11  ;;  %v8647_v17 = vld [vmem:[%s8602_s29 + $0x50] sm:$0xff]  ;;  %v8650_v18 = vld [vmem:[%s8602_s29 + $0x58] sm:$0xff]  ;;  %v403_v19 = vsel %vm391_vm0, %v8629_v9, 0.0  ;;  %v405_v20 = vsel %vm391_vm0, %v8632_v10, 0.0  ;;  %v396_v25 = vadd.f32 %v395_v8, %v394_v12 }
  0x23   : > { %11484 = vst [vmem:[#allocation12_spill] sm:$0xff] %v8647_v17  ;;  %11485 = vst [vmem:[#allocation13_spill] sm:$0xff] %v8650_v18  ;;  %v407_v21 = vsel %vm391_vm0, %v8635_v11, 0.0  ;;  %v8659_v22 = vld [vmem:[%s8602_s29 + $0x60] sm:$0xff]  ;;  %v8662_v23 = vld [vmem:[%s8602_s29 + $0x68] sm:$0xff]  ;;  %v409_v26 = vsel %vm391_vm0, %v8644_v16, 0.0 }
  0x24   : > { %11486 = vst [vmem:[#allocation14_spill] sm:$0xff] %v8659_v22  ;;  %v8665_v24 = vld [vmem:[%s8602_s29 + $0x70] sm:$0xff]  ;;  %v411_v27 = vsel %vm391_vm0, %v8647_v17, 0.0  ;;  %v8673_v28 = vsel %vm391_vm0, %v8650_v18, 0.0  ;;  %v8676_v29 = vld [vmem:[%s8602_s29 + $0x78] sm:$0xff]  ;;  %v8679_v30 = vld [vmem:[%s8602_s29 + $0x80] sm:$0xff]  ;;  %v398_v38 = vadd.f32 %v397_v13, %v396_v25  ;;  %v467_v25 = vmul.f32 %v8605_v0, %v8605_v0 }
  0x25   : > { %11487 = vst [vmem:[#allocation15_spill] sm:$0xff] %v8676_v29  ;;  %11488 = vst [vmem:[#allocation16_spill] sm:$0xff] %v8679_v30  ;;  %v8682_v31 = vld [vmem:[%s8602_s29 + $0x88] sm:$0xff]  ;;  %v8686_v32 = vsel %vm391_vm0, %v8659_v22, 0.0  ;;  %v8690_v33 = vsel %vm391_vm0, %v8662_v23, 0.0  ;;  %v8694_v34 = vsel %vm391_vm0, %v8665_v24, 0.0 }
  0x26   : > { %11489 = vst [vmem:[#allocation17_spill] sm:$0xff] %v8682_v31  ;;  %v8697_v35 = vld [vmem:[%s8602_s29 + $0x90] sm:$0xff]  ;;  %v8700_v36 = vld [vmem:[%s8602_s29 + $0x98] sm:$0xff]  ;;  %v8703_v37 = vld [vmem:[%s8602_s29 + $0xa0] sm:$0xff]  ;;  %v8707_v39 = vsel %vm391_vm0, %v8676_v29, 0.0  ;;  %v8711_v40 = vsel %vm391_vm0, %v8679_v30, 0.0  ;;  %v400_v51 = vadd.f32 %v399_v14, %v398_v38  ;;  %v468_v38 = vmul.f32 %v8608_v1, %v8608_v1 }
  0x27   : > { %11490 = vst [vmem:[#allocation18_spill] sm:$0xff] %v8697_v35  ;;  %11491 = vst [vmem:[#allocation19_spill] sm:$0xff] %v8700_v36  ;;  %v8715_v41 = vsel %vm391_vm0, %v8682_v31, 0.0  ;;  %v8718_v42 = vld [vmem:[%s8602_s29 + $0xa8] sm:$0xff]  ;;  %v8721_v43 = vld [vmem:[%s8602_s29 + $0xb0] sm:$0xff]  ;;  %v8728_v45 = vsel %vm391_vm0, %v8697_v35, 0.0 }
  0x28   : > { %11492 = vst [vmem:[#allocation20_spill] sm:$0xff] %v8703_v37  ;;  %11493 = vst [vmem:[#allocation21_spill] sm:$0xff] %v8718_v42  ;;  %v8724_v44 = vld [vmem:[%s8602_s29 + $0xb8] sm:$0xff]  ;;  %v8732_v46 = vsel %vm391_vm0, %v8700_v36, 0.0  ;;  %v8736_v47 = vsel %vm391_vm0, %v8703_v37, 0.0  ;;  %v8739_v48 = vld [vmem:[%s8602_s29 + $0xc0] sm:$0xff]  ;;  %v402_v63 = vadd.f32 %v401_v15, %v400_v51  ;;  %v469_v51 = vmul.f32 %v8611_v2, %v8611_v2 }
  0x29   : > { %11494 = vst [vmem:[#allocation22_spill] sm:$0xff] %v8721_v43  ;;  %v8742_v49 = vld [vmem:[%s8602_s29 + $0xc8] sm:$0xff]  ;;  %v8745_v50 = vld [vmem:[%s8602_s29 + $0xd0] sm:$0xff]  ;;  %v8749_v52 = vsel %vm391_vm0, %v8718_v42, 0.0  ;;  %v8753_v53 = vsel %vm391_vm0, %v8721_v43, 0.0  ;;  %v8757_v54 = vsel %vm391_vm0, %v8724_v44, 0.0 }
  0x2a   : > { %v8760_v55 = vld [vmem:[%s8602_s29 + $0xd8] sm:$0xff]  ;;  %v8763_v56 = vld [vmem:[%s8602_s29 + $0xe0] sm:$0xff]  ;;  %v8766_v57 = vld [vmem:[%s8602_s29 + $0xe8] sm:$0xff]  ;;  %v8770_v58 = vsel %vm391_vm0, %v8739_v48, 0.0  ;;  %v8774_v59 = vsel %vm391_vm0, %v8742_v49, 0.0  ;;  %v8778_v60 = vsel %vm391_vm0, %v8745_v50, 0.0  ;;  %v404_v14 = vadd.f32 %v403_v19, %v402_v63 }
  0x2b   : > { %11495 = vst [vmem:[#allocation23_spill] sm:$0xff] %v8763_v56  ;;  %11496 = vst [vmem:[#allocation24_spill] sm:$0xff] %v8766_v57  ;;  %v8781_v61 = vld [vmem:[%s8602_s29 + $0xf0] sm:$0xff]  ;;  %v8784_v62 = vld [vmem:[%s8602_s29 + $0xf8] sm:$0xff]  ;;  %v8788_v6 = vsel %vm391_vm0, %v8760_v55, 0.0  ;;  %v8792_v7 = vsel %vm391_vm0, %v8763_v56, 0.0  ;;  %v471_v56 = vmul.f32 %v8617_v4, %v8617_v4  ;;  %v472_v19 = vmul.f32 %v8620_v5, %v8620_v5 }
  0x2c   : > { %11497 = vst [vmem:[#allocation25_spill] sm:$0xff] %v8781_v61  ;;  %v8796_v8 = vsel %vm391_vm0, %v8766_v57, 0.0  ;;  %v8800_v12 = vsel %vm391_vm0, %v8781_v61, 0.0  ;;  %v8804_v13 = vsel %vm391_vm0, %v8784_v62, 0.0  ;;  %v406_v15 = vadd.f32 %v405_v20, %v404_v14 }
  0x2d   : > { %v470_v61 = vmul.f32 %v8614_v3, %v8614_v3  ;;  %v473_v20 = vmul.f32 %v8629_v9, %v8629_v9  ;;  %v474_v63 = vmul.f32 %v8632_v10, %v8632_v10  ;;  %v475_v14 = vmul.f32 %v8635_v11, %v8635_v11 }
  0x2e   : > { %v408_v57 = vadd.f32 %v407_v21, %v406_v15  ;;  %v476_v21 = vmul.f32 %v8644_v16, %v8644_v16  ;;  %v477_v15 = vmul.f32 %v8647_v17, %v8647_v17  ;;  %v478_v4 = vmul.f32 %v8650_v18, %v8650_v18 }
  0x2f   : > { %v479_v5 = vmul.f32 %v8659_v22, %v8659_v22  ;;  %v499_v9 = vsel %vm391_vm0, %v467_v25, 0.0  ;;  %v500_v10 = vsel %vm391_vm0, %v468_v38, 0.0  ;;  %v502_v3 = vsel %vm391_vm0, %v469_v51, 0.0 }
  0x30   : > { %v410_v2 = vadd.f32 %v409_v26, %v408_v57  ;;  %v480_v26 = vmul.f32 %v8662_v23, %v8662_v23  ;;  %v481_v57 = vmul.f32 %v8665_v24, %v8665_v24  ;;  %v501_v17 = vadd.f32 %v500_v10, %v499_v9 }
  0x31   : > { %v482_v18 = vmul.f32 %v8676_v29, %v8676_v29  ;;  %v483_v22 = vmul.f32 %v8679_v30, %v8679_v30  ;;  %v484_v25 = vmul.f32 %v8682_v31, %v8682_v31  ;;  %v504_v38 = vsel %vm391_vm0, %v470_v61, 0.0 }
  0x32   : > { %v412_v11 = vadd.f32 %v411_v27, %v410_v2  ;;  %v485_v27 = vmul.f32 %v8697_v35, %v8697_v35  ;;  %v486_v51 = vmul.f32 %v8700_v36, %v8700_v36  ;;  %v503_v9 = vadd.f32 %v502_v3, %v501_v17 }
  0x33   : > { %v487_v10 = vmul.f32 %v8703_v37, %v8703_v37  ;;  %v488_v30 = vmul.f32 %v8718_v42, %v8718_v42  ;;  %v489_v31 = vmul.f32 %v8721_v43, %v8721_v43  ;;  %v506_v61 = vsel %vm391_vm0, %v471_v56, 0.0 }
  0x34   : > { %v414_v2 = vadd.f32 %v8673_v28, %v412_v11  ;;  %v505_v28 = vadd.f32 %v504_v38, %v503_v9  ;;  %v508_v35 = vsel %vm391_vm0, %v472_v19, 0.0  ;;  %v510_v29 = vsel %vm391_vm0, %v473_v20, 0.0 }
  0x35   : > { %v512_v3 = vsel %vm391_vm0, %v474_v63, 0.0  ;;  %v514_v17 = vsel %vm391_vm0, %v475_v14, 0.0  ;;  %v516_v37 = vsel %vm391_vm0, %v476_v21, 0.0  ;;  %v518_v42 = vsel %vm391_vm0, %v477_v15, 0.0 }
  0x36   : > { %v416_v11 = vadd.f32 %v8686_v32, %v414_v2  ;;  %v507_v43 = vadd.f32 %v506_v61, %v505_v28  ;;  %v520_v56 = vsel %vm391_vm0, %v478_v4, 0.0  ;;  %v522_v32 = vsel %vm391_vm0, %v479_v5, 0.0 }
  0x37   : > { %v524_v38 = vsel %vm391_vm0, %v480_v26, 0.0  ;;  %v526_v19 = vsel %vm391_vm0, %v481_v57, 0.0  ;;  %v528_v20 = vsel %vm391_vm0, %v482_v18, 0.0  ;;  %v530_v63 = vsel %vm391_vm0, %v483_v22, 0.0 }
  0x38   : > { %v418_v36 = vadd.f32 %v8690_v33, %v416_v11  ;;  %v509_v21 = vadd.f32 %v508_v35, %v507_v43  ;;  %v532_v15 = vsel %vm391_vm0, %v484_v25, 0.0  ;;  %v534_v33 = vsel %vm391_vm0, %v485_v27, 0.0 }
  0x39   : > { %v536_v2 = vsel %vm391_vm0, %v486_v51, 0.0  ;;  %v538_v4 = vsel %vm391_vm0, %v487_v10, 0.0  ;;  %v540_v5 = vsel %vm391_vm0, %v488_v30, 0.0  ;;  %v542_v26 = vsel %vm391_vm0, %v489_v31, 0.0 }
  0x3a   : > { %v420_v14 = vadd.f32 %v8694_v34, %v418_v36  ;;  %v511_v18 = vadd.f32 %v510_v29, %v509_v21 }
  0x3c   : > { %v422_v57 = vadd.f32 %v8707_v39, %v420_v14  ;;  %v513_v9 = vadd.f32 %v512_v3, %v511_v18  ;;  %v11498_v14 = vld [vmem:[#allocation23_spill] sm:$0xff] }
  0x3d   : > { %v495_v21 = vmul.f32 %v11498_v14, %v11498_v14 }
  0x3e   : > { %v424_v22 = vadd.f32 %v8711_v40, %v422_v57  ;;  %v515_v35 = vadd.f32 %v514_v17, %v513_v9  ;;  %v498_v9 = vmul.f32 %v8784_v62, %v8784_v62 }
  0x3f   : > { %v554_v18 = vsel %vm391_vm0, %v495_v21, 0.0 }
  0x40   : > { %v426_v34 = vadd.f32 %v8715_v41, %v424_v22  ;;  %v517_v43 = vadd.f32 %v516_v37, %v515_v35 }
  0x42   : > { %v428_v36 = vadd.f32 %v8728_v45, %v426_v34  ;;  %v519_v27 = vadd.f32 %v518_v42, %v517_v43 }
  0x44   : > { %v430_v25 = vadd.f32 %v8732_v46, %v428_v36  ;;  %v521_v30 = vadd.f32 %v520_v56, %v519_v27 }
  0x46   : > { %v432_v51 = vadd.f32 %v8736_v47, %v430_v25  ;;  %v523_v10 = vadd.f32 %v522_v32, %v521_v30  ;;  %v560_v25 = vsel %vm391_vm0, %v498_v9, 0.0  ;;  %v11504_v9 = vld [vmem:[#allocation7_spill] sm:$0xff] }
  0x48   : > { %v434_v31 = vadd.f32 %v8749_v52, %v432_v51  ;;  %v525_v39 = vadd.f32 %v524_v38, %v523_v10  ;;  %v493_v38 = vmul.f32 %v8745_v50, %v8745_v50 }
  0x4a   : > { %v436_v29 = vadd.f32 %v8753_v53, %v434_v31  ;;  %v527_v61 = vadd.f32 %v526_v19, %v525_v39  ;;  %v490_v53 = vmul.f32 %v8724_v44, %v8724_v44 }
  0x4c   : > { %v438_v40 = vadd.f32 %v8757_v54, %v436_v29  ;;  %v529_v11 = vadd.f32 %v528_v20, %v527_v61  ;;  %v494_v20 = vmul.f32 %v8760_v55, %v8760_v55 }
  0x4e   : > { %v440_v41 = vadd.f32 %v8770_v58, %v438_v40  ;;  %v531_v45 = vadd.f32 %v530_v63, %v529_v11  ;;  %v491_v58 = vmul.f32 %v8739_v48, %v8739_v48 }
  0x50   : > { %v442_v37 = vadd.f32 %v8774_v59, %v440_v41  ;;  %v533_v46 = vadd.f32 %v532_v15, %v531_v45  ;;  %v550_v15 = vsel %vm391_vm0, %v493_v38, 0.0 }
  0x52   : > { %v444_v42 = vadd.f32 %v8778_v60, %v442_v37  ;;  %v535_v28 = vadd.f32 %v534_v33, %v533_v46  ;;  %v492_v60 = vmul.f32 %v8742_v49, %v8742_v49  ;;  %v11499_v33 = vld [vmem:[#allocation24_spill] sm:$0xff]  ;;  %v8316_v46 = vld [vmem:[%s11406_s3 + $0x60] sm:$0xff]  }
  0x53   : > { %7003 = vmatprep.subr.bf16.mxu0 %v8316_v46 }
  0x54   : > { %v446_v47 = vadd.f32 %v8788_v6, %v444_v42  ;;  %v537_v3 = vadd.f32 %v536_v2, %v535_v28  ;;  %v544_v6 = vsel %vm391_vm0, %v490_v53, 0.0  ;;  %v496_v2 = vmul.f32 %v11499_v33, %v11499_v33  ;;  %7004 = vmatpush3.bf16.msra.mxu0 %v8316_v46  ;;  %v8319_v53 = vld [vmem:[%s11406_s3 + $0x78] sm:$0xff]  }
  0x56   : > { %v448_v52 = vadd.f32 %v8792_v7, %v446_v47  ;;  %v539_v17 = vadd.f32 %v538_v4, %v537_v3  ;;  %v552_v4 = vsel %vm391_vm0, %v494_v20, 0.0  ;;  %v556_v34 = vsel %vm391_vm0, %v496_v2, 0.0  ;;  %v8318_v3 = vld [vmem:[%s11406_s3 + $0x70] sm:$0xff]  }
  0x58   : > { %v450_v54 = vadd.f32 %v8796_v8, %v448_v52  ;;  %v541_v56 = vadd.f32 %v540_v5, %v539_v17  ;;  %v546_v8 = vsel %vm391_vm0, %v491_v58, 0.0  ;;  %v8317_v52 = vld [vmem:[%s11406_s3 + $0x68] sm:$0xff]  }
  0x59   : > { %7005 = vmatprep.subr.bf16.mxu0 %v8317_v52 }
  0x5a   : > { %v452_v59 = vadd.f32 %v8800_v12, %v450_v54  ;;  %v543_v32 = vadd.f32 %v542_v26, %v541_v56  ;;  %v548_v12 = vsel %vm391_vm0, %v492_v60, 0.0  ;;  %v11500_v26 = vld [vmem:[#allocation25_spill] sm:$0xff]  ;;  %7006 = vmatpush3.bf16.msra.mxu0 %v8317_v52 }
  0x5b   : > { %v497_v57 = vmul.f32 %v11500_v26, %v11500_v26  ;;  %7007 = vmatprep.subr.bf16.mxu0 %v8318_v3  ;;  %v8938_v54 = vld [vmem:[%s11406_s3] sm:$0xff]  }
  0x5c   : > { %v454_v7 = vadd.f32 %v8804_v13, %v452_v59  ;;  %v545_v19 = vadd.f32 %v544_v6, %v543_v32  ;;  %v588_v59 = vlaneseq  ;;  %v580_v60 = vld [vmem:[%s11404_s1] sm:$0x1] }
  0x5d   : > { %v558_v36 = vsel %vm391_vm0, %v497_v57, 0.0 }
  0x5e   : > { %455 = vadd.xlane.f32.xlu0 %v454_v7  ;;  %v547_v63 = vadd.f32 %v546_v8, %v545_v19  ;;  %7008 = vmatpush3.bf16.msra.mxu0 %v8318_v3  ;;  %v8941_v56 = vshrl.u32 %v588_v59, 7  ;;  %v583_v8 = vld [vmem:[%s11405_s2] sm:$0x1] }
  0x5f   : > { %7009 = vmatprep.subr.bf16.mxu0 %v8319_v53  ;;  %v11506_v3 = vld [vmem:[#allocation9_spill] sm:$0xff] }
  0x60   : > { %v549_v13 = vadd.f32 %v548_v12, %v547_v63  ;;  %v8947_v6 = vsub.s32 0, %v8941_v56  ;;  %v8956_v12 = vsub.s32 7, %v8941_v56  ;;  %v8959_v63 = vadd.s32 8, %v8941_v56 }
  0x61   : > { %vm732_vm1 = vcmp.lt.s32.totalorder %v8941_v56, 1  ;;  %vm698_vm2 = vcmp.eq.s32.totalorder %v8941_v56, 0  ;;  %vm899_vm3 = vcmp.lt.s32.totalorder %v8941_v56, 7 }
  0x62   : > { %v551_v5 = vadd.f32 %v550_v15, %v549_v13  ;;  %7010 = vmatpush3.bf16.msra.mxu0 %v8319_v53  ;;  %11501 = vst [vmem:[#allocation23_spill] sm:$0xff] %v8947_v6  ;;  %vm866_vm4 = vcmp.eq.s32.totalorder %v8959_v63, 15  ;;  %v8363_v63 = vld [vmem:[%s11410_s7 + $0xd8] sm:$0xff]  }
  0x63   : > { %7043 = vmatprep.subr.bf16.mxu0 %v8938_v54 }
  0x64   : > { %v553_v22 = vadd.f32 %v552_v4, %v551_v5 }
  0x66   : > { %v555_v35 = vadd.f32 %v554_v18, %v553_v22  ;;  %v11502_v18 = vld [vmem:[#allocation5_spill] sm:$0xff]  ;;  %v11503_v22 = vld [vmem:[#allocation6_spill] sm:$0xff] }
  0x68   : > { %v557_v43 = vadd.f32 %v556_v34, %v555_v35  ;;  %v11505_v35 = vld [vmem:[#allocation8_spill] sm:$0xff] }
  0x6a   : > { %v559_v27 = vadd.f32 %v558_v36, %v557_v43 }
  0x6c   : > { %v561_v51 = vadd.f32 %v560_v25, %v559_v27 }
  0x6e   : > { %562 = vadd.xlane.f32.xlu0 %v561_v51 }
  0xeb   : > { %v456_v30 = vpop.xlane.xlu0 %455 }
  0xec   : > { %v457_v31 = vrot.slane %v456_v30, 4 }
  0xee   : > { %v458_v10 = vadd.f32 %v457_v31, %v456_v30 }
  0xf0   : > { %v459_v29 = vrot.slane %v458_v10, 2 }
  0xf2   : > { %v460_v39 = vadd.f32 %v459_v29, %v458_v10 }
  0xf4   : > { %v461_v40 = vrot.slane %v460_v39, 1 }
  0xf6   : > { %v462_v61 = vadd.f32 %v461_v40, %v460_v39 }
  0xf8   : > { %8266 = vpush %v462_v61 }
  0xfb   : > { %v563_v41 = vpop.xlane.xlu0 %562 }
  0xfc   : > { %v564_v11 = vrot.slane %v563_v41, 4 }
  0xfe   : > { %v565_v37 = vadd.f32 %v564_v11, %v563_v41 }
 0x100   : > { %v566_v45 = vrot.slane %v565_v37, 2 }
 0x102   : > { %v567_v42 = vadd.f32 %v566_v45, %v565_v37 }
 0x104   : > { %v568_v47 = vrot.slane %v567_v42, 1 }
 0x106   : > { %v569_v28 = vadd.f32 %v568_v47, %v567_v42 }
 0x108   : > { %8268 = vpush %v569_v28 }
 0x129   : > { %s8267_s30 = spop %8266 }
 0x12a   : > { %s466_s11 = smul.f32 6.1035156e-05, %s8267_s30  ;;  %s11349_s30 = scalar_lea.hbm %s11413_s10, %s6633_s26 }
 0x12c   : > { %s574_s12 = smul.f32 %s466_s11, %s466_s11  ;;  %v584_v38 = vstv %s466_s11 }
 0x139   : > { %s8269_s18 = spop %8268 }
 0x13a   : > { %s573_s20 = smul.f32 6.1035156e-05, %s8269_s18  ;;  %s8491_s18 = smov [#allocation2]  }
 0x13c   : > { %s575_s21 = ssub.f32 %s573_s20, %s574_s12  ;;  %s350_s12 = sand.u32 1, %s8478_s14  }
 0x13d   : > { %s8428_s20 = sshll.u32 %s8491_s18, 4  ;;  %s8429_s20 = int_to_ptr.vmem [resolvable:$false] %s8428_s20 }
 0x13e   : > { %s576_s0 = sadd.f32 1e-05, %s575_s21  ;;  %s6260_s21 = sshll.u32 %s350_s12, 8 }
 0x13f   : > { %s11227_s25 = scalar_lea.vmem [#allocation2], %s6260_s21  ;;  %s8430_s21 = scalar_lea.vmem %s8429_s20, 8192 }
 0x140   : > { %v577_v17 = vstv %s576_s0  ;;  %s11362_s0 = scalar_lea.sflag [#allocation3], %s350_s12 }
 0x141   : > { %8388 = vrsqrt.f32 %v577_v17 }
 0x14b   : > { %v8389_v58 = vpop.eup %8388 }
 0x14c   : > { %8270 = vpush %v8389_v58 }
 0x17d   : > { %s8271_s27 = spop %8270 }
 0x17e   : > { %v581_v7 = vstv %s8271_s27  ;;  %s6194_s27 = sshll.u32 %s11227_s25, 4  ;;  %s11351_s27 = int_to_ptr.vmem [resolvable:$true] %s6194_s27 }
 0x17f   : > { %v582_v32 = vmul.f32 %v581_v7, %v580_v60  ;;  %s8424_s11 = scalar_lea.vmem %s11351_s27, 4096  ;;  %p8431_p0 = scmp.lt.s32.totalorder %s11351_s27, %s8429_s20 }
 0x180   : > { %p8425_p11 = scmp.ne.s32.totalorder %s11351_s27, %s8424_s11  ;;  %p8432_p1 = scmp.lt.s32.totalorder %s8430_s21, %s8424_s11 }
 0x181   : > { %v585_v19 = vmul.f32 %v584_v38, %v582_v32  ;;  %v8953_v20 = vrot.slane %v582_v32, %v8947_v6 }
 0x182   : > { %p8426_p12 = pnand %p8425_p11, %p8587_p5  ;;  %p8433_p2 = por %p8432_p1, %p8431_p0 }
 0x183   : > { %v586_v21 = vsub.f32 %v583_v8, %v585_v19  ;;  %v8963_v15 = vmul.f32 %v8953_v20, %v8739_v48  ;;  %v8967_v13 = vmul.f32 %v8953_v20, %v8742_v49  ;;  %v619_v2 = vmul.f32 %v8953_v20, %v8745_v50  ;;  %v11507_v8 = vld [vmem:[#allocation10_spill] sm:$0xff] }
 0x184   : > { %v620_v4 = vmul.f32 %v8953_v20, %v8760_v55  ;;  %v621_v5 = vmul.f32 %v8953_v20, %v11498_v14  ;;  %v622_v57 = vmul.f32 %v8953_v20, %v11499_v33  ;;  %v623_v48 = vmul.f32 %v8953_v20, %v11500_v26  ;;  %p8427_p13 = pneg %p8426_p12 }
 0x185   : > { %v8982_v49 = vrot.slane %v586_v21, %v8947_v6  ;;  %v624_v50 = vmul.f32 %v8953_v20, %v8784_v62  ;;  %v593_v55 = vmul.f32 %v8953_v20, %v8605_v0  ;;  %v594_v14 = vmul.f32 %v8953_v20, %v8608_v1 }
 0x186   : > { %v595_v33 = vmul.f32 %v8953_v20, %v11502_v18  ;;  %v596_v26 = vmul.f32 %v8953_v20, %v11503_v22  ;;  %v597_v34 = vmul.f32 %v8953_v20, %v11504_v9  ;;  %v598_v36 = vmul.f32 %v8953_v20, %v11505_v35  ;;  %p8434_p3 = pnand %p8433_p2, %p8427_p13 }
 0x187   : > { %v8999_v62 = vadd.f32 %v8982_v49, %v619_v2  ;;  %v658_v0 = vadd.f32 %v8982_v49, %v620_v4  ;;  %v659_v43 = vadd.f32 %v8982_v49, %v621_v5  ;;  %v660_v1 = vadd.f32 %v8982_v49, %v622_v57 }
 0x188   : > { %v661_v25 = vadd.f32 %v8982_v49, %v623_v48  ;;  %v662_v27 = vadd.f32 %v8982_v49, %v624_v50  ;;  %v631_v51 = vadd.f32 %v8982_v49, %v593_v55  ;;  %v632_v30 = vadd.f32 %v8982_v49, %v594_v14 }
 0x189   : > { %v9008_v31 = vmax.f32 %v658_v0, 0.0  ;;  %v9010_v10 = vmax.f32 %v659_v43, 0.0  ;;  %v9012_v29 = vmax.f32 %v660_v1, 0.0  ;;  %v633_v39 = vadd.f32 %v8982_v49, %v595_v33  ;;  %v11508_v33 = vld [vmem:[#allocation11_spill] sm:$0xff] }
 0x18a   : > { %v9015_v40 = vmax.f32 %v661_v25, 0.0  ;;  %v9017_v61 = vmax.f32 %v662_v27, 0.0  ;;  %v9019_v41 = vmax.f32 %v631_v51, 0.0  ;;  %v9021_v11 = vmax.f32 %v632_v30, 0.0  ;;  %v8321_v25 = vld [vmem:[%s11406_s3 + $0x8] sm:$0xff]  }
 0x18b   : > { %v634_v37 = vadd.f32 %v8982_v49, %v596_v26  ;;  %v9024_v45 = vmax.f32 %v633_v39, 0.0  ;;  %v635_v42 = vadd.f32 %v8982_v49, %v597_v34  ;;  %v636_v46 = vadd.f32 %v8982_v49, %v598_v36 }
 0x18c   : > { %v700_v47 = vrot.slane %v9019_v41, 7  ;;  %v716_v28 = vrot.slane %v9021_v11, 7  ;;  %v772_v52 = vrot.slane %v9019_v41, %v8947_v6  ;;  %v599_v53 = vmul.f32 %v8953_v20, %v11506_v3 }
 0x18d   : > { %v9034_v17 = vmax.f32 %v634_v37, 0.0  ;;  %v701_v58 = vrot.slane %v9024_v45, 7  ;;  %v776_v59 = vrot.slane %v9024_v45, %v8947_v6  ;;  %v9039_v60 = vmax.f32 %v635_v42, 0.0 }
 0x18e   : > { %v733_v7 = vsel %vm732_vm1, %v700_v47, %v716_v28  ;;  %v749_v32 = vsel %vm732_vm1, %v716_v28, %v700_v47  ;;  %v9045_v38 = vmax.f32 %v636_v46, 0.0  ;;  %v600_v19 = vmul.f32 %v8953_v20, %v11507_v8  ;;  %v11509_v46 = vld [vmem:[#allocation12_spill] sm:$0xff]  ;;  %v11510_v28 = vld [vmem:[#allocation13_spill] sm:$0xff] }
 0x18f   : > { %v833_v21 = vsel %vm698_vm2, %v772_v52, %v749_v32  ;;  %v717_v2 = vrot.slane %v9034_v17, 7  ;;  %v702_v4 = vrot.slane %v9039_v60, 7  ;;  %v780_v5 = vrot.slane %v9039_v60, %v8947_v6 }
 0x190   : > { %v9055_v57 = vpack.c.bf16 %v733_v7, %v833_v21  ;;  %v718_v48 = vrot.slane %v9045_v38, 7  ;;  %v637_v50 = vadd.f32 %v8982_v49, %v599_v53  ;;  %v638_v55 = vadd.f32 %v8982_v49, %v600_v19  ;;  %v11511_v53 = vld [vmem:[#allocation14_spill] sm:$0xff]  ;;  %v8322_v21 = vld [vmem:[%s11406_s3 + $0x10] sm:$0xff]  }
 0x191   : > { %v734_v14 = vsel %vm732_vm1, %v701_v58, %v717_v2  ;;  %v750_v18 = vsel %vm732_vm1, %v717_v2, %v701_v58  ;;  %v601_v22 = vmul.f32 %v8953_v20, %v11508_v33  ;;  %v602_v26 = vmul.f32 %v8953_v20, %v8644_v16 }
 0x192   : > { %7011 = vmatprep.mubr.msk.bf16.mxu0 %vm391_vm0, %v9055_v57  ;;  %v835_v9 = vsel %vm698_vm2, %v776_v59, %v750_v18  ;;  %v735_v34 = vsel %vm732_vm1, %v702_v4, %v718_v48  ;;  %v751_v35 = vsel %vm732_vm1, %v718_v48, %v702_v4  ;;  %v9076_v36 = vmax.f32 %v637_v50, 0.0 }
 0x193   : > { %v9078_v0 = vpack.c.bf16 %v734_v14, %v835_v9  ;;  %v837_v43 = vsel %vm698_vm2, %v780_v5, %v751_v35  ;;  %v9082_v16 = vmax.f32 %v638_v55, 0.0  ;;  %v639_v1 = vadd.f32 %v8982_v49, %v601_v22  ;;  %v11512_v55 = vld [vmem:[#allocation15_spill] sm:$0xff] }
 0x194   : > { %v9088_v27 = vpack.c.bf16 %v735_v34, %v837_v43  ;;  %v703_v51 = vrot.slane %v9076_v36, 7  ;;  %v784_v30 = vrot.slane %v9076_v36, %v8947_v6  ;;  %v640_v39 = vadd.f32 %v8982_v49, %v602_v26 }
 0x195   : > { %7012 = vmatmul.mubr.msk.bf16.vlgmr.msra.gmra.mrb[0].mxu0 %vm391_vm0, %v9078_v0  ;;  %v719_v37 = vrot.slane %v9082_v16, 7  ;;  %v9097_v42 = vmax.f32 %v639_v1, 0.0  ;;  %v603_v47 = vmul.f32 %v8953_v20, %v11509_v46  ;;  %v604_v52 = vmul.f32 %v8953_v20, %v11510_v28  ;;  %v8323_v1 = vld [vmem:[%s11406_s3 + $0x18] sm:$0xff]  }
 0x196   : > { %7044 = vmatpush3.bf16.msra.mxu0 %v8938_v54  ;;  %7015 = vmatprep.mubr.msk.bf16.mxu0 %vm391_vm0, %v9088_v27  ;;  %v9106_v3 = vmax.f32 %v640_v39, 0.0  ;;  %v605_v58 = vmul.f32 %v8953_v20, %v11511_v53  ;;  %v606_v59 = vmul.f32 %v8953_v20, %v8662_v23  ;;  %v607_v7 = vmul.f32 %v8953_v20, %v8665_v24 }
 0x197   : > { %v736_v32 = vsel %vm732_vm1, %v703_v51, %v719_v37  ;;  %v752_v54 = vsel %vm732_vm1, %v719_v37, %v703_v51  ;;  %v704_v8 = vrot.slane %v9097_v42, 7  ;;  %v788_v19 = vrot.slane %v9097_v42, %v8947_v6  ;;  %7045 = vmatprep.subr.bf16.mxu0 %v8321_v25 }
 0x198   : > { %v839_v23 = vsel %vm698_vm2, %v784_v30, %v752_v54  ;;  %v720_v24 = vrot.slane %v9106_v3, 7  ;;  %v641_v2 = vadd.f32 %v8982_v49, %v603_v47  ;;  %v642_v4 = vadd.f32 %v8982_v49, %v604_v52 }
 0x199   : > { %v9129_v5 = vpack.c.bf16 %v736_v32, %v839_v23  ;;  %v643_v48 = vadd.f32 %v8982_v49, %v605_v58  ;;  %v644_v50 = vadd.f32 %v8982_v49, %v606_v59  ;;  %v608_v14 = vmul.f32 %v8953_v20, %v11512_v55  ;;  %v11513_v59 = vld [vmem:[#allocation16_spill] sm:$0xff]  ;;  %v9187_v23 = vld [vmem:[%s11406_s3 + $0xc0] sm:$0xff]  }
 0x19a   : > { %v737_v18 = vsel %vm732_vm1, %v704_v8, %v720_v24  ;;  %v753_v33 = vsel %vm732_vm1, %v720_v24, %v704_v8  ;;  %v9139_v22 = vmax.f32 %v641_v2, 0.0  ;;  %v9141_v26 = vmax.f32 %v642_v4, 0.0  ;;  %7046 = vmatpush3.bf16.msra.mxu0 %v8321_v25  ;;  %v11514_v55 = vld [vmem:[#allocation17_spill] sm:$0xff] }
 0x19b   : > { %v841_v9 = vsel %vm698_vm2, %v788_v19, %v753_v33  ;;  %v9145_v34 = vmax.f32 %v643_v48, 0.0  ;;  %v9147_v35 = vmax.f32 %v644_v50, 0.0  ;;  %v645_v43 = vadd.f32 %v8982_v49, %v607_v7  ;;  %7047 = vmatprep.subr.bf16.mxu0 %v8322_v21  ;;  %v11515_v33 = vld [vmem:[#allocation18_spill] sm:$0xff] }
 0x19c   : > { %v9153_v51 = vpack.c.bf16 %v737_v18, %v841_v9  ;;  %v705_v30 = vrot.slane %v9139_v22, 7  ;;  %v721_v25 = vrot.slane %v9141_v26, 7  ;;  %v792_v39 = vrot.slane %v9139_v22, %v8947_v6 }
 0x19d   : > { %7016 = vmatmul.mubr.msk.bf16.gmra.mrb[4].mxu0 %vm391_vm0, %v9129_v5  ;;  %v706_v37 = vrot.slane %v9145_v34, 7  ;;  %v722_v46 = vrot.slane %v9147_v35, 7  ;;  %v796_v47 = vrot.slane %v9145_v34, %v8947_v6  ;;  %v646_v28 = vadd.f32 %v8982_v49, %v608_v14 }
 0x19e   : > { %7019 = vmatprep.mubr.msk.bf16.mxu0 %vm391_vm0, %v9153_v51  ;;  %v738_v52 = vsel %vm732_vm1, %v705_v30, %v721_v25  ;;  %v754_v53 = vsel %vm732_vm1, %v721_v25, %v705_v30  ;;  %v9172_v58 = vmax.f32 %v645_v43, 0.0  ;;  %v609_v7 = vmul.f32 %v8953_v20, %v11513_v59  ;;  %7048 = vmatpush3.bf16.msra.mxu0 %v8322_v21  ;;  %v11516_v43 = vld [vmem:[#allocation19_spill] sm:$0xff]  ;;  %v11517_v25 = vld [vmem:[#allocation20_spill] sm:$0xff] }
 0x19f   : > { %v843_v32 = vsel %vm698_vm2, %v792_v39, %v754_v53  ;;  %v739_v54 = vsel %vm732_vm1, %v706_v37, %v722_v46  ;;  %v755_v8 = vsel %vm732_vm1, %v722_v46, %v706_v37  ;;  %v9182_v19 = vmax.f32 %v646_v28, 0.0  ;;  %7049 = vmatprep.subr.bf16.mxu0 %v8323_v1  ;;  %v11518_v37 = vld [vmem:[#allocation21_spill] sm:$0xff] }
 0x1a0   : > { %v9189_v24 = vpack.c.bf16 %v738_v52, %v843_v32  ;;  %v845_v21 = vsel %vm698_vm2, %v796_v47, %v755_v8  ;;  %v707_v2 = vrot.slane %v9172_v58, 7  ;;  %v800_v4 = vrot.slane %v9172_v58, %v8947_v6 }
 0x1a1   : > { %v9196_v48 = vpack.c.bf16 %v739_v54, %v845_v21  ;;  %v723_v50 = vrot.slane %v9182_v19, 7  ;;  %v610_v14 = vmul.f32 %v8953_v20, %v11514_v55  ;;  %v647_v18 = vadd.f32 %v8982_v49, %v609_v7 }
 0x1a2   : > { %v611_v9 = vmul.f32 %v8953_v20, %v11515_v33  ;;  %v612_v30 = vmul.f32 %v8953_v20, %v11516_v43  ;;  %v613_v39 = vmul.f32 %v8953_v20, %v11517_v25  ;;  %v614_v46 = vmul.f32 %v8953_v20, %v11518_v37  ;;  %7050 = vmatpush3.bf16.msra.mxu0 %v8323_v1  ;;  %v11520_v33 = vld [vmem:[#allocation22_spill] sm:$0xff] }
 0x1a3   : > { %v740_v47 = vsel %vm732_vm1, %v707_v2, %v723_v50  ;;  %v756_v28 = vsel %vm732_vm1, %v723_v50, %v707_v2  ;;  %v648_v52 = vadd.f32 %v8982_v49, %v610_v14  ;;  %v9215_v53 = vmax.f32 %v647_v18, 0.0  ;;  %7083 = vmatprep.subr.bf16.mxu0 %v9187_v23 }
 0x1a4   : > { %v847_v59 = vsel %vm698_vm2, %v800_v4, %v756_v28  ;;  %v649_v7 = vadd.f32 %v8982_v49, %v611_v9  ;;  %v650_v32 = vadd.f32 %v8982_v49, %v612_v30  ;;  %v651_v1 = vadd.f32 %v8982_v49, %v613_v39 }
 0x1a5   : > { %7020 = vmatmul.mubr.msk.bf16.gmra.mrb[8].mxu0 %vm391_vm0, %v9189_v24  ;;  %v9225_v54 = vpack.c.bf16 %v740_v47, %v847_v59  ;;  %v9227_v8 = vmax.f32 %v648_v52, 0.0  ;;  %v708_v21 = vrot.slane %v9215_v53, 7  ;;  %v804_v2 = vrot.slane %v9215_v53, %v8947_v6 }
 0x1a6   : > { %7023 = vmatprep.mubr.msk.bf16.mxu0 %vm391_vm0, %v9196_v48  ;;  %v9234_v4 = vmax.f32 %v649_v7, 0.0  ;;  %v9236_v50 = vmax.f32 %v650_v32, 0.0  ;;  %v652_v55 = vadd.f32 %v8982_v49, %v614_v46  ;;  %v9239_v14 = vmax.f32 %v651_v1, 0.0 }
 0x1a7   : > { %11519 = vst [vmem:[#allocation24_spill] sm:$0xff] %v9225_v54  ;;  %v724_v18 = vrot.slane %v9227_v8, 7  ;;  %v615_v9 = vmul.f32 %v8953_v20, %v11520_v33  ;;  %v616_v43 = vmul.f32 %v8953_v20, %v8724_v44  ;;  %v655_v30 = vadd.f32 %v8982_v49, %v8963_v15 }
 0x1a8   : > { %v709_v25 = vrot.slane %v9234_v4, 7  ;;  %v725_v39 = vrot.slane %v9236_v50, 7  ;;  %v808_v37 = vrot.slane %v9234_v4, %v8947_v6  ;;  %v9252_v46 = vmax.f32 %v652_v55, 0.0 }
 0x1a9   : > { %v741_v47 = vsel %vm732_vm1, %v708_v21, %v724_v18  ;;  %v757_v28 = vsel %vm732_vm1, %v724_v18, %v708_v21  ;;  %v710_v44 = vrot.slane %v9239_v14, 7  ;;  %v812_v20 = vrot.slane %v9239_v14, %v8947_v6 }
 0x1aa   : > { %v849_v15 = vsel %vm698_vm2, %v804_v2, %v757_v28  ;;  %v742_v52 = vsel %vm732_vm1, %v709_v25, %v725_v39  ;;  %v758_v59 = vsel %vm732_vm1, %v725_v39, %v709_v25  ;;  %v726_v7 = vrot.slane %v9252_v46, 7 }
 0x1ab   : > { %v9268_v32 = vpack.c.bf16 %v741_v47, %v849_v15  ;;  %v851_v1 = vsel %vm698_vm2, %v808_v37, %v758_v59  ;;  %v653_v21 = vadd.f32 %v8982_v49, %v615_v9  ;;  %v654_v55 = vadd.f32 %v8982_v49, %v616_v43 }
 0x1ac   : > { %v9274_v18 = vpack.c.bf16 %v742_v52, %v851_v1  ;;  %v743_v2 = vsel %vm732_vm1, %v710_v44, %v726_v7  ;;  %v759_v33 = vsel %vm732_vm1, %v726_v7, %v710_v44  ;;  %v656_v25 = vadd.f32 %v8982_v49, %v8967_v13 }
 0x1ad   : > { %11521 = vst [vmem:[#allocation25_spill] sm:$0xff] %v9268_v32  ;;  %7024 = vmatmul.mubr.msk.bf16.gmra.mrb[12].mxu0 %vm391_vm0, %v9225_v54  ;;  %v853_v39 = vsel %vm698_vm2, %v812_v20, %v759_v33  ;;  %v9286_v9 = vmax.f32 %v653_v21, 0.0  ;;  %v9288_v43 = vmax.f32 %v654_v55, 0.0  ;;  %v9290_v37 = vmax.f32 %v655_v30, 0.0 }
 0x1ae   : > { %7027 = vmatprep.mubr.msk.bf16.mxu0 %vm391_vm0, %v9268_v32  ;;  %v9294_v47 = vpack.c.bf16 %v743_v2, %v853_v39  ;;  %v9296_v28 = vmax.f32 %v656_v25, 0.0  ;;  %v9299_v13 = vmax.f32 %v8999_v62, 0.0  ;;  %v729_v49 = vrot.slane %v9008_v31, 7 }
 0x1af   : > { %v711_v44 = vrot.slane %v9286_v9, 7  ;;  %v727_v20 = vrot.slane %v9288_v43, 7  ;;  %v816_v30 = vrot.slane %v9286_v9, %v8947_v6  ;;  %v712_v15 = vrot.slane %v9290_v37, 7 }
 0x1b0   : > { %v728_v52 = vrot.slane %v9296_v28, 7  ;;  %v820_v59 = vrot.slane %v9290_v37, %v8947_v6  ;;  %v713_v7 = vrot.slane %v9299_v13, 7  ;;  %v824_v62 = vrot.slane %v9299_v13, %v8947_v6 }
 0x1b1   : > { %v744_v1 = vsel %vm732_vm1, %v711_v44, %v727_v20  ;;  %v760_v21 = vsel %vm732_vm1, %v727_v20, %v711_v44  ;;  %v714_v55 = vrot.slane %v9010_v10, 7  ;;  %v730_v2 = vrot.slane %v9012_v29, 7 }
 0x1b2   : > { %v855_v33 = vsel %vm698_vm2, %v816_v30, %v760_v21  ;;  %v745_v25 = vsel %vm732_vm1, %v712_v15, %v728_v52  ;;  %v761_v39 = vsel %vm732_vm1, %v728_v52, %v712_v15  ;;  %v746_v32 = vsel %vm732_vm1, %v713_v7, %v729_v49 }
 0x1b3   : > { %v9328_v54 = vpack.c.bf16 %v744_v1, %v855_v33  ;;  %v857_v44 = vsel %vm698_vm2, %v820_v59, %v761_v39  ;;  %v762_v20 = vsel %vm732_vm1, %v729_v49, %v713_v7  ;;  %v747_v30 = vsel %vm732_vm1, %v714_v55, %v730_v2 }
 0x1b4   : > { %v9337_v21 = vpack.c.bf16 %v745_v25, %v857_v44  ;;  %v859_v15 = vsel %vm698_vm2, %v824_v62, %v762_v20  ;;  %v763_v52 = vsel %vm732_vm1, %v730_v2, %v714_v55  ;;  %v828_v1 = vrot.slane %v9010_v10, %v8947_v6 }
 0x1b5   : > { %7028 = vmatmul.mubr.msk.bf16.gmra.mrb[16].mxu0 %vm391_vm0, %v9274_v18  ;;  %v9347_v49 = vpack.c.bf16 %v746_v32, %v859_v15  ;;  %v715_v59 = vrot.slane %v9015_v40, 7  ;;  %v731_v7 = vrot.slane %v9017_v61, 7  ;;  %v832_v33 = vrot.slane %v9015_v40, %v8947_v6 }
 0x1b6   : > { %7031 = vmatprep.mubr.msk.bf16.mxu0 %vm391_vm0, %v9294_v47  ;;  %v861_v62 = vsel %vm698_vm2, %v828_v1, %v763_v52  ;;  %v9359_v55 = vpack.c.bf16 %v9021_v11, %v9019_v41  ;;  %v9363_v32 = vpack.c.bf16 %v9034_v17, %v9024_v45  ;;  %v9367_v2 = vpack.c.bf16 %v9045_v38, %v9039_v60 }
 0x1b7   : > { %v9369_v25 = vpack.c.bf16 %v747_v30, %v861_v62  ;;  %v748_v39 = vsel %vm732_vm1, %v715_v59, %v731_v7  ;;  %v764_v44 = vsel %vm732_vm1, %v731_v7, %v715_v59  ;;  %v9377_v20 = vpack.c.bf16 %v9082_v16, %v9076_v36 }
 0x1b8   : > { %v863_v15 = vsel %vm698_vm2, %v832_v33, %v764_v44  ;;  %v9383_v52 = vpack.c.bf16 %v9106_v3, %v9097_v42  ;;  %v9387_v30 = vpack.c.bf16 %v9141_v26, %v9139_v22  ;;  %v9391_v1 = vpack.c.bf16 %v9147_v35, %v9145_v34 }
 0x1b9   : > { %11522 = vst [vmem:[#allocation5_spill] sm:$0xff] %v9377_v20  ;;  %v9393_v59 = vpack.c.bf16 %v748_v39, %v863_v15  ;;  %v9397_v7 = vpack.c.bf16 %v9182_v19, %v9172_v58  ;;  %v9401_v33 = vpack.c.bf16 %v9227_v8, %v9215_v53  ;;  %v9405_v62 = vpack.c.bf16 %v9236_v50, %v9234_v4 }
 0x1ba   : > { %11523 = vst [vmem:[#allocation6_spill] sm:$0xff] %v9383_v52  ;;  %11524 = vst [vmem:[#allocation7_spill] sm:$0xff] %v9387_v30  ;;  %v9409_v44 = vpack.c.bf16 %v9252_v46, %v9239_v14  ;;  %v9413_v39 = vpack.c.bf16 %v9288_v43, %v9286_v9  ;;  %v9417_v15 = vpack.c.bf16 %v9296_v28, %v9290_v37 }
 0x1bb   : > { %11525 = vst [vmem:[#allocation8_spill] sm:$0xff] %v9391_v1  ;;  %11526 = vst [vmem:[#allocation9_spill] sm:$0xff] %v9397_v7  ;;  %v9421_v6 = vpack.c.bf16 %v9008_v31, %v9299_v13  ;;  %v939_v7 = vrot.slane %v9021_v11, %v8956_v12  ;;  %v884_v1 = vrot.slane %v9034_v17, 1  ;;  %v947_v52 = vrot.slane %v9045_v38, %v8956_v12 }
 0x1bc   : > { %11527 = vst [vmem:[#allocation10_spill] sm:$0xff] %v9401_v33  ;;  %11528 = vst [vmem:[#allocation11_spill] sm:$0xff] %v9405_v62  ;;  %v9425_v33 = vpack.c.bf16 %v9012_v29, %v9010_v10  ;;  %v9429_v62 = vpack.c.bf16 %v9017_v61, %v9015_v40 }
 0x1bd   : > { %11529 = vst [vmem:[#allocation12_spill] sm:$0xff] %v9409_v44  ;;  %11530 = vst [vmem:[#allocation13_spill] sm:$0xff] %v9413_v39  ;;  %v867_v44 = vrot.slane %v9019_v41, 1  ;;  %v883_v39 = vrot.slane %v9021_v11, 1  ;;  %7032 = vmatmul.mubr.msk.bf16.gmra.mrb[20].mxu0 %vm391_vm0, %v9328_v54  ;;  %v885_v11 = vrot.slane %v9045_v38, 1  ;;  %v886_v38 = vrot.slane %v9082_v16, 1 }
 0x1be   : > { %11531 = vst [vmem:[#allocation14_spill] sm:$0xff] %v9417_v15  ;;  %11532 = vst [vmem:[#allocation15_spill] sm:$0xff] %v9421_v6  ;;  %v868_v15 = vrot.slane %v9024_v45, 1  ;;  %v943_v6 = vrot.slane %v9034_v17, %v8956_v12  ;;  %7035 = vmatprep.mubr.msk.bf16.mxu0 %vm391_vm0, %v9337_v21 }
 0x1bf   : > { %11533 = vst [vmem:[#allocation16_spill] sm:$0xff] %v9425_v33  ;;  %11534 = vst [vmem:[#allocation17_spill] sm:$0xff] %v9429_v62  ;;  %v900_v62 = vsel %vm899_vm3, %v867_v44, %v883_v39  ;;  %v916_v41 = vsel %vm899_vm3, %v883_v39, %v867_v44  ;;  %v869_v33 = vrot.slane %v9039_v60, 1 }
 0x1c0   : > { %v1001_v45 = vsel %vm866_vm4, %v939_v7, %v916_v41  ;;  %v901_v17 = vsel %vm899_vm3, %v868_v15, %v884_v1  ;;  %v917_v30 = vsel %vm899_vm3, %v884_v1, %v868_v15  ;;  %v870_v1 = vrot.slane %v9076_v36, 1 }
 0x1c1   : > { %v9457_v44 = vpack.c.bf16 %v1001_v45, %v900_v62  ;;  %v1003_v60 = vsel %vm866_vm4, %v943_v6, %v917_v30  ;;  %v902_v39 = vsel %vm899_vm3, %v869_v33, %v885_v11  ;;  %v918_v7 = vsel %vm899_vm3, %v885_v11, %v869_v33 }
 0x1c2   : > { %v9465_v41 = vpack.c.bf16 %v1003_v60, %v901_v17  ;;  %v1005_v20 = vsel %vm866_vm4, %v947_v52, %v918_v7  ;;  %v951_v6 = vrot.slane %v9082_v16, %v8956_v12  ;;  %v871_v30 = vrot.slane %v9097_v42, 1 }
 0x1c3   : > { %v9471_v62 = vpack.c.bf16 %v1005_v20, %v902_v39  ;;  %v887_v15 = vrot.slane %v9106_v3, 1  ;;  %v903_v33 = vsel %vm899_vm3, %v870_v1, %v886_v38  ;;  %v919_v11 = vsel %vm899_vm3, %v886_v38, %v870_v1 }
 0x1c4   : > { %v955_v36 = vrot.slane %v9106_v3, %v8956_v12  ;;  %v872_v52 = vrot.slane %v9139_v22, 1  ;;  %v1007_v20 = vsel %vm866_vm4, %v951_v6, %v919_v11  ;;  %v888_v45 = vrot.slane %v9141_v26, 1 }
 0x1c5   : > { %v904_v16 = vsel %vm899_vm3, %v871_v30, %v887_v15  ;;  %v920_v42 = vsel %vm899_vm3, %v887_v15, %v871_v30  ;;  %v9491_v17 = vpack.c.bf16 %v1007_v20, %v903_v33  ;;  %v959_v3 = vrot.slane %v9141_v26, %v8956_v12  ;;  %7036 = vmatmul.mubr.msk.bf16.gmra.mrb[24].mxu0 %vm391_vm0, %v9347_v49 }
 0x1c6   : > { %v1009_v60 = vsel %vm866_vm4, %v955_v36, %v920_v42  ;;  %v873_v22 = vrot.slane %v9145_v34, 1  ;;  %v905_v7 = vsel %vm899_vm3, %v872_v52, %v888_v45  ;;  %v921_v1 = vsel %vm899_vm3, %v888_v45, %v872_v52  ;;  %7039 = vmatprep.mubr.msk.bf16.mxu0 %vm391_vm0, %v9369_v25 }
 0x1c7   : > { %v9500_v39 = vpack.c.bf16 %v1009_v60, %v904_v16  ;;  %v889_v38 = vrot.slane %v9147_v35, 1  ;;  %v1011_v26 = vsel %vm866_vm4, %v959_v3, %v921_v1  ;;  %v963_v34 = vrot.slane %v9147_v35, %v8956_v12 }
 0x1c8   : > { %v874_v6 = vrot.slane %v9172_v58, 1  ;;  %v890_v30 = vrot.slane %v9182_v19, 1  ;;  %v9515_v15 = vpack.c.bf16 %v1011_v26, %v905_v7  ;;  %v967_v36 = vrot.slane %v9182_v19, %v8956_v12 }
 0x1c9   : > { %v906_v33 = vsel %vm899_vm3, %v873_v22, %v889_v38  ;;  %v922_v11 = vsel %vm899_vm3, %v889_v38, %v873_v22  ;;  %v875_v20 = vrot.slane %v9215_v53, 1  ;;  %v891_v45 = vrot.slane %v9227_v8, 1 }
 0x1ca   : > { %v1013_v52 = vsel %vm866_vm4, %v963_v34, %v922_v11  ;;  %v907_v35 = vsel %vm899_vm3, %v874_v6, %v890_v30  ;;  %v923_v58 = vsel %vm899_vm3, %v890_v30, %v874_v6  ;;  %v971_v19 = vrot.slane %v9227_v8, %v8956_v12 }
 0x1cb   : > { %v9530_v16 = vpack.c.bf16 %v1013_v52, %v906_v33  ;;  %v1015_v42 = vsel %vm866_vm4, %v967_v36, %v923_v58  ;;  %v876_v3 = vrot.slane %v9234_v4, 1  ;;  %v892_v22 = vrot.slane %v9236_v50, 1 }
 0x1cc   : > { %v9537_v60 = vpack.c.bf16 %v1015_v42, %v907_v35  ;;  %v975_v7 = vrot.slane %v9236_v50, %v8956_v12  ;;  %v908_v53 = vsel %vm899_vm3, %v875_v20, %v891_v45  ;;  %v924_v1 = vsel %vm899_vm3, %v891_v45, %v875_v20 }
 0x1cd   : > { %v877_v38 = vrot.slane %v9239_v14, 1  ;;  %v893_v26 = vrot.slane %v9252_v46, 1  ;;  %v1017_v8 = vsel %vm866_vm4, %v971_v19, %v924_v1  ;;  %v909_v4 = vsel %vm899_vm3, %v876_v3, %v892_v22  ;;  %7040 = vmatmul.mubr.msk.bf16.gmra.mrb[28].mxu0 %vm391_vm0, %v9393_v59 }
 0x1ce   : > { %v925_v34 = vsel %vm899_vm3, %v892_v22, %v876_v3  ;;  %v979_v50 = vrot.slane %v9252_v46, %v8956_v12  ;;  %v9559_v6 = vpack.c.bf16 %v1017_v8, %v908_v53  ;;  %7051 = vmatprep.mubr.msk.bf16.mxu0 %vm391_vm0, %v9055_v57  ;;  %v878_v36 = vrot.slane %v9286_v9, 1 }
 0x1cf   : > { %v1019_v14 = vsel %vm866_vm4, %v975_v7, %v925_v34  ;;  %v910_v30 = vsel %vm899_vm3, %v877_v38, %v893_v26  ;;  %v926_v33 = vsel %vm899_vm3, %v893_v26, %v877_v38  ;;  %v894_v52 = vrot.slane %v9288_v43, 1  ;;  %v8325_v38 = vld [vmem:[%s11406_s3 + $0xc8] sm:$0xff]  }
 0x1d0   : > { %v9569_v11 = vpack.c.bf16 %v1019_v14, %v909_v4  ;;  %v1021_v46 = vsel %vm866_vm4, %v979_v50, %v926_v33  ;;  %v983_v58 = vrot.slane %v9288_v43, %v8956_v12  ;;  %v879_v20 = vrot.slane %v9290_v37, 1 }
 0x1d1   : > { %v9575_v35 = vpack.c.bf16 %v1021_v46, %v910_v30  ;;  %v895_v42 = vrot.slane %v9296_v28, 1  ;;  %v911_v45 = vsel %vm899_vm3, %v878_v36, %v894_v52  ;;  %v927_v19 = vsel %vm899_vm3, %v894_v52, %v878_v36  ;;  %v8326_v52 = vld [vmem:[%s11406_s3 + $0xd0] sm:$0xff]  }
 0x1d2   : > { %v987_v9 = vrot.slane %v9296_v28, %v8956_v12  ;;  %v880_v3 = vrot.slane %v9299_v13, 1  ;;  %v1023_v22 = vsel %vm866_vm4, %v983_v58, %v927_v19  ;;  %v896_v7 = vrot.slane %v9008_v31, 1  ;;  %v11536_v19 = vld [vmem:[#allocation25_spill] sm:$0xff] }
 0x1d3   : > { %v912_v43 = vsel %vm899_vm3, %v879_v20, %v895_v42  ;;  %v928_v37 = vsel %vm899_vm3, %v895_v42, %v879_v20  ;;  %v9595_v53 = vpack.c.bf16 %v1023_v22, %v911_v45  ;;  %v991_v28 = vrot.slane %v9008_v31, %v8956_v12  ;;  %v8327_v20 = vld [vmem:[%s11406_s3 + $0xd8] sm:$0xff]   ;;  %v8328_v42 = vld [vmem:[%s11406_s3 + $0x20] sm:$0xff]  }
 0x1d4   : > { %v1025_v1 = vsel %vm866_vm4, %v987_v9, %v928_v37  ;;  %v881_v13 = vrot.slane %v9010_v10, 1  ;;  %v913_v8 = vsel %vm899_vm3, %v880_v3, %v896_v7  ;;  %v929_v4 = vsel %vm899_vm3, %v896_v7, %v880_v3  ;;  %v11535_v45 = vld [vmem:[#allocation24_spill] sm:$0xff]  ;;  %v8329_v9 = vld [vmem:[%s11406_s3 + $0x28] sm:$0xff]   ;;  %v8330_v3 = vld [vmem:[%s11406_s3 + $0x30] sm:$0xff]  }
 0x1d5   : > { %v9605_v26 = vpack.c.bf16 %v1025_v1, %v912_v43  ;;  %v897_v34 = vrot.slane %v9012_v29, 1  ;;  %v1027_v50 = vsel %vm866_vm4, %v991_v28, %v929_v4  ;;  %v995_v31 = vrot.slane %v9012_v29, %v8956_v12  ;;  %7052 = vmatmul.mubr.msk.bf16.vlgmr.msra.gmra.mrb[0].mxu0 %vm391_vm0, %v9055_v57  ;;  %v11544_v22 = vld [vmem:[#allocation12_spill] sm:$0xff]  ;;  %v11545_v43 = vld [vmem:[#allocation13_spill] sm:$0xff]  ;;  %v11546_v37 = vld [vmem:[#allocation14_spill] sm:$0xff] }
 0x1d6   : > { %v882_v10 = vrot.slane %v9015_v40, 1  ;;  %v898_v14 = vrot.slane %v9017_v61, 1  ;;  %v9620_v30 = vpack.c.bf16 %v1027_v50, %v913_v8  ;;  %v999_v36 = vrot.slane %v9017_v61, %v8956_v12  ;;  %7084 = vmatpush3.bf16.msra.mxu0 %v9187_v23  ;;  %7055 = vmatprep.mubr.msk.bf16.mxu0 %vm391_vm0, %v9078_v0  ;;  %v11547_v7 = vld [vmem:[#allocation15_spill] sm:$0xff]  ;;  %v11548_v1 = vld [vmem:[#allocation16_spill] sm:$0xff]  ;;  %v8337_v28 = vld [vmem:[%s11406_s3 + $0xe8] sm:$0xff]  }
 0x1d7   : > { %v914_v33 = vsel %vm899_vm3, %v881_v13, %v897_v34  ;;  %v930_v46 = vsel %vm899_vm3, %v897_v34, %v881_v13  ;;  %7085 = vmatprep.subr.bf16.mxu0 %v8325_v38  ;;  %v8338_v13 = vld [vmem:[%s11406_s3 + $0xf0] sm:$0xff]   ;;  %v11549_v8 = vld [vmem:[#allocation17_spill] sm:$0xff]  ;;  %v8341_v4 = vld [vmem:[%s11406_s3 + $0x48] sm:$0xff]  }
 0x1d8   : > { %v1029_v29 = vsel %vm866_vm4, %v995_v31, %v930_v46  ;;  %v915_v40 = vsel %vm899_vm3, %v882_v10, %v898_v14  ;;  %v931_v57 = vsel %vm899_vm3, %v898_v14, %v882_v10  ;;  %v8342_v34 = vld [vmem:[%s11406_s3 + $0x50] sm:$0xff]   ;;  %v8345_v50 = vld [vmem:[%s11406_s3 + $0xa8] sm:$0xff]   ;;  %v8347_v10 = vld [vmem:[%s11406_s3 + $0xb8] sm:$0xff]  }
 0x1d9   : > { %v9640_v61 = vpack.c.bf16 %v1029_v29, %v914_v33  ;;  %v1031_v23 = vsel %vm866_vm4, %v999_v36, %v931_v57  ;;  %v8346_v31 = vld [vmem:[%s11406_s3 + $0xb0] sm:$0xff]   ;;  %v8348_v14 = vld [vmem:[%s11406_s3 + $0x100] sm:$0xff]   ;;  %v8349_v33 = vld [vmem:[%s11406_s3 + $0x108] sm:$0xff]   ;;  %v8490_v36 = vmov 0.0  }
 0x1da   : > { %v9644_v58 = vpack.c.bf16 %v1031_v23, %v915_v40  ;;  %7086 = vmatpush3.bf16.msra.mxu0 %v8325_v38  ;;  %v8340_v38 = vld [vmem:[%s11406_s3 + $0x40] sm:$0xff]   ;;  %v8350_v46 = vld [vmem:[%s11406_s3 + $0x110] sm:$0xff]  }
 0x1db   : > { %7087 = vmatprep.subr.bf16.mxu0 %v8326_v52  ;;  %v9998_v29 = vld [vmem:[%s11407_s4] ss:$0 sm:$0xff] }
 0x1dd   : > { %7056 = vmatmul.mubr.msk.bf16.gmra.mrb[4].mxu0 %vm391_vm0, %v9088_v27 }
 0x1de   : > { %7059 = vmatprep.mubr.msk.bf16.mxu0 %vm391_vm0, %v9129_v5  ;;  %7088 = vmatpush3.bf16.msra.mxu0 %v8326_v52 }
 0x1df   : > { %7089 = vmatprep.subr.bf16.mxu0 %v8327_v20 }
 0x1e2   : > { %7090 = vmatpush3.bf16.msra.mxu0 %v8327_v20 }
 0x1e3   : > { %7123 = vmatprep.subr.bf16.mxu0 %v8328_v42 }
 0x1e5   : > { %7060 = vmatmul.mubr.msk.bf16.gmra.mrb[8].mxu0 %vm391_vm0, %v9153_v51 }
 0x1e6   : > { %7063 = vmatprep.mubr.msk.bf16.mxu0 %vm391_vm0, %v9189_v24 }
 0x1ed   : > { %7064 = vmatmul.mubr.msk.bf16.gmra.mrb[12].mxu0 %vm391_vm0, %v9196_v48 }
 0x1ee   : > { %7067 = vmatprep.mubr.msk.bf16.mxu0 %vm391_vm0, %v11535_v45 }
 0x1f5   : > { %7068 = vmatmul.mubr.msk.bf16.gmra.mrb[16].mxu0 %vm391_vm0, %v11536_v19 }
 0x1f6   : > { %7071 = vmatprep.mubr.msk.bf16.mxu0 %vm391_vm0, %v9274_v18 }
 0x1fd   : > { %7072 = vmatmul.mubr.msk.bf16.gmra.mrb[20].mxu0 %vm391_vm0, %v9294_v47 }
 0x1fe   : > { %7075 = vmatprep.mubr.msk.bf16.mxu0 %vm391_vm0, %v9328_v54 }
 0x205   : > { %7076 = vmatmul.mubr.msk.bf16.gmra.mrb[24].mxu0 %vm391_vm0, %v9337_v21 }
 0x206   : > { %7079 = vmatprep.mubr.msk.bf16.mxu0 %vm391_vm0, %v9347_v49 }
 0x20d   : > { %7080 = vmatmul.mubr.msk.bf16.gmra.mrb[28].mxu0 %vm391_vm0, %v9369_v25 }
 0x20e   : > { %7091 = vmatprep.mubr.msk.bf16.mxu0 %vm391_vm0, %v9078_v0  ;;  %v8331_v0 = vld [vmem:[%s11406_s3 + $0x38] sm:$0xff]  }
 0x215   : > { %7092 = vmatmul.mubr.msk.bf16.vlgmr.msra.gmra.mrb[0].mxu0 %vm391_vm0, %v9088_v27  ;;  %v8332_v27 = vld [vmem:[%s11406_s3 + $0x80] sm:$0xff]  }
 0x216   : > { %7124 = vmatpush3.bf16.msra.mxu0 %v8328_v42  ;;  %7095 = vmatprep.mubr.msk.bf16.mxu0 %vm391_vm0, %v9129_v5  ;;  %v8333_v5 = vld [vmem:[%s11406_s3 + $0x88] sm:$0xff]  }
 0x217   : > { %7125 = vmatprep.subr.bf16.mxu0 %v8329_v9 }
 0x21a   : > { %7126 = vmatpush3.bf16.msra.mxu0 %v8329_v9 }
 0x21b   : > { %7127 = vmatprep.subr.bf16.mxu0 %v8330_v3 }
 0x21d   : > { %7096 = vmatmul.mubr.msk.bf16.gmra.mrb[4].mxu0 %vm391_vm0, %v9153_v51  ;;  %v8334_v51 = vld [vmem:[%s11406_s3 + $0x90] sm:$0xff]  }
 0x21e   : > { %7099 = vmatprep.mubr.msk.bf16.mxu0 %vm391_vm0, %v9189_v24  ;;  %7128 = vmatpush3.bf16.msra.mxu0 %v8330_v3  ;;  %v8335_v24 = vld [vmem:[%s11406_s3 + $0x98] sm:$0xff]  }
 0x21f   : > { %7129 = vmatprep.subr.bf16.mxu0 %v8331_v0 }
 0x222   : > { %7130 = vmatpush3.bf16.msra.mxu0 %v8331_v0 }
 0x223   : > { %7163 = vmatprep.subr.bf16.mxu0 %v8332_v27 }
 0x225   : > { %7100 = vmatmul.mubr.msk.bf16.gmra.mrb[8].mxu0 %vm391_vm0, %v9196_v48  ;;  %v11537_v48 = vld [vmem:[#allocation5_spill] sm:$0xff] }
 0x226   : > { %7103 = vmatprep.mubr.msk.bf16.mxu0 %vm391_vm0, %v11535_v45 }
 0x22d   : > { %7104 = vmatmul.mubr.msk.bf16.gmra.mrb[12].mxu0 %vm391_vm0, %v11536_v19 }
 0x22e   : > { %7107 = vmatprep.mubr.msk.bf16.mxu0 %vm391_vm0, %v9274_v18  ;;  %v11538_v18 = vld [vmem:[#allocation6_spill] sm:$0xff] }
 0x235   : > { %7108 = vmatmul.mubr.msk.bf16.gmra.mrb[16].mxu0 %vm391_vm0, %v9294_v47  ;;  %v11539_v47 = vld [vmem:[#allocation7_spill] sm:$0xff] }
 0x236   : > { %7111 = vmatprep.mubr.msk.bf16.mxu0 %vm391_vm0, %v9328_v54  ;;  %v8336_v54 = vld [vmem:[%s11406_s3 + $0xe0] sm:$0xff]  }
 0x23d   : > { %7112 = vmatmul.mubr.msk.bf16.gmra.mrb[20].mxu0 %vm391_vm0, %v9337_v21  ;;  %v11540_v21 = vld [vmem:[#allocation8_spill] sm:$0xff] }
 0x23e   : > { %7115 = vmatprep.mubr.msk.bf16.mxu0 %vm391_vm0, %v9347_v49  ;;  %v11541_v49 = vld [vmem:[#allocation9_spill] sm:$0xff] }
 0x245   : > { %7116 = vmatmul.mubr.msk.bf16.gmra.mrb[24].mxu0 %vm391_vm0, %v9369_v25  ;;  %v11542_v25 = vld [vmem:[#allocation10_spill] sm:$0xff] }
 0x246   : > { %7119 = vmatprep.mubr.msk.bf16.mxu0 %vm391_vm0, %v9393_v59 }
 0x24d   : > { %7120 = vmatmul.mubr.msk.bf16.gmra.mrb[28].mxu0 %vm391_vm0, %v9393_v59  ;;  %v11543_v59 = vld [vmem:[#allocation11_spill] sm:$0xff] }
 0x24e   : > { %7131 = vmatprep.mubr.msk.bf16.mxu0 %vm391_vm0, %v9359_v55 }
 0x255   : > { %7132 = vmatmul.mubr.msk.bf16.vlgmr.msra.gmra.mrb[0].mxu0 %vm391_vm0, %v9359_v55 }
 0x256   : > { %7164 = vmatpush3.bf16.msra.mxu0 %v8332_v27  ;;  %7135 = vmatprep.mubr.msk.bf16.mxu0 %vm391_vm0, %v9363_v32 }
 0x257   : > { %7165 = vmatprep.subr.bf16.mxu0 %v8333_v5 }
 0x25a   : > { %7166 = vmatpush3.bf16.msra.mxu0 %v8333_v5 }
 0x25b   : > { %7167 = vmatprep.subr.bf16.mxu0 %v8334_v51 }
 0x25d   : > { %7136 = vmatmul.mubr.msk.bf16.gmra.mrb[4].mxu0 %vm391_vm0, %v9367_v2 }
 0x25e   : > { %7139 = vmatprep.mubr.msk.bf16.mxu0 %vm391_vm0, %v11537_v48  ;;  %7168 = vmatpush3.bf16.msra.mxu0 %v8334_v51 }
 0x25f   : > { %7169 = vmatprep.subr.bf16.mxu0 %v8335_v24 }
 0x262   : > { %7170 = vmatpush3.bf16.msra.mxu0 %v8335_v24 }
 0x263   : > { %7203 = vmatprep.subr.bf16.mxu0 %v8336_v54 }
 0x265   : > { %7140 = vmatmul.mubr.msk.bf16.gmra.mrb[8].mxu0 %vm391_vm0, %v11538_v18 }
 0x266   : > { %7143 = vmatprep.mubr.msk.bf16.mxu0 %vm391_vm0, %v11539_v47 }
 0x26d   : > { %7144 = vmatmul.mubr.msk.bf16.gmra.mrb[12].mxu0 %vm391_vm0, %v11540_v21 }
 0x26e   : > { %7147 = vmatprep.mubr.msk.bf16.mxu0 %vm391_vm0, %v11541_v49 }
 0x275   : > { %7148 = vmatmul.mubr.msk.bf16.gmra.mrb[16].mxu0 %vm391_vm0, %v11542_v25 }
 0x276   : > { %7151 = vmatprep.mubr.msk.bf16.mxu0 %vm391_vm0, %v11543_v59 }
 0x27d   : > { %7152 = vmatmul.mubr.msk.bf16.gmra.mrb[20].mxu0 %vm391_vm0, %v11544_v22 }
 0x27e   : > { %7155 = vmatprep.mubr.msk.bf16.mxu0 %vm391_vm0, %v11545_v43 }
 0x285   : > { %7156 = vmatmul.mubr.msk.bf16.gmra.mrb[24].mxu0 %vm391_vm0, %v11546_v37 }
 0x286   : > { %7159 = vmatprep.mubr.msk.bf16.mxu0 %vm391_vm0, %v11547_v7 }
 0x28d   : > { %7160 = vmatmul.mubr.msk.bf16.gmra.mrb[28].mxu0 %vm391_vm0, %v11548_v1 }
 0x28e   : > { %7171 = vmatprep.mubr.msk.bf16.mxu0 %vm391_vm0, %v9359_v55  ;;  %v8339_v55 = vld [vmem:[%s11406_s3 + $0xf8] sm:$0xff]  }
 0x295   : > { %7172 = vmatmul.mubr.msk.bf16.vlgmr.msra.gmra.mrb[0].mxu0 %vm391_vm0, %v9363_v32 }
 0x296   : > { %7204 = vmatpush3.bf16.msra.mxu0 %v8336_v54  ;;  %7175 = vmatprep.mubr.msk.bf16.mxu0 %vm391_vm0, %v9367_v2 }
 0x297   : > { %7205 = vmatprep.subr.bf16.mxu0 %v8337_v28 }
 0x29a   : > { %7206 = vmatpush3.bf16.msra.mxu0 %v8337_v28 }
 0x29b   : > { %7207 = vmatprep.subr.bf16.mxu0 %v8338_v13 }
 0x29d   : > { %7176 = vmatmul.mubr.msk.bf16.gmra.mrb[4].mxu0 %vm391_vm0, %v11537_v48 }
 0x29e   : > { %7179 = vmatprep.mubr.msk.bf16.mxu0 %vm391_vm0, %v11538_v18  ;;  %7208 = vmatpush3.bf16.msra.mxu0 %v8338_v13 }
 0x29f   : > { %7209 = vmatprep.subr.bf16.mxu0 %v8339_v55 }
 0x2a2   : > { %7210 = vmatpush3.bf16.msra.mxu0 %v8339_v55 }
 0x2a3   : > { %7243 = vmatprep.subr.bf16.mxu0 %v8340_v38 }
 0x2a5   : > { %7180 = vmatmul.mubr.msk.bf16.gmra.mrb[8].mxu0 %vm391_vm0, %v11539_v47 }
 0x2a6   : > { %7183 = vmatprep.mubr.msk.bf16.mxu0 %vm391_vm0, %v11540_v21 }
 0x2ad   : > { %7184 = vmatmul.mubr.msk.bf16.gmra.mrb[12].mxu0 %vm391_vm0, %v11541_v49 }
 0x2ae   : > { %7187 = vmatprep.mubr.msk.bf16.mxu0 %vm391_vm0, %v11542_v25 }
 0x2b5   : > { %7188 = vmatmul.mubr.msk.bf16.gmra.mrb[16].mxu0 %vm391_vm0, %v11543_v59 }
 0x2b6   : > { %7191 = vmatprep.mubr.msk.bf16.mxu0 %vm391_vm0, %v11544_v22 }
 0x2bd   : > { %7192 = vmatmul.mubr.msk.bf16.gmra.mrb[20].mxu0 %vm391_vm0, %v11545_v43 }
 0x2be   : > { %7195 = vmatprep.mubr.msk.bf16.mxu0 %vm391_vm0, %v11546_v37 }
 0x2c5   : > { %7196 = vmatmul.mubr.msk.bf16.gmra.mrb[24].mxu0 %vm391_vm0, %v11547_v7 }
 0x2c6   : > { %7199 = vmatprep.mubr.msk.bf16.mxu0 %vm391_vm0, %v11548_v1 }
 0x2cd   : > { %7200 = vmatmul.mubr.msk.bf16.gmra.mrb[28].mxu0 %vm391_vm0, %v11549_v8 }
 0x2ce   : > { %7211 = vmatprep.mubr.msk.bf16.mxu0 %vm391_vm0, %v9363_v32  ;;  %v8343_v32 = vld [vmem:[%s11406_s3 + $0x58] sm:$0xff]  }
 0x2d5   : > { %7212 = vmatmul.mubr.msk.bf16.vlgmr.msra.gmra.mrb[0].mxu0 %vm391_vm0, %v9367_v2  ;;  %v8344_v2 = vld [vmem:[%s11406_s3 + $0xa0] sm:$0xff]  }
 0x2d6   : > { %7244 = vmatpush3.bf16.msra.mxu0 %v8340_v38  ;;  %7215 = vmatprep.mubr.msk.bf16.mxu0 %vm391_vm0, %v11537_v48 }
 0x2d7   : > { %7245 = vmatprep.subr.bf16.mxu0 %v8341_v4 }
 0x2da   : > { %7246 = vmatpush3.bf16.msra.mxu0 %v8341_v4 }
 0x2db   : > { %7247 = vmatprep.subr.bf16.mxu0 %v8342_v34 }
 0x2dd   : > { %7216 = vmatmul.mubr.msk.bf16.gmra.mrb[4].mxu0 %vm391_vm0, %v11538_v18 }
 0x2de   : > { %7219 = vmatprep.mubr.msk.bf16.mxu0 %vm391_vm0, %v11539_v47  ;;  %7248 = vmatpush3.bf16.msra.mxu0 %v8342_v34 }
 0x2df   : > { %7249 = vmatprep.subr.bf16.mxu0 %v8343_v32 }
 0x2e2   : > { %7250 = vmatpush3.bf16.msra.mxu0 %v8343_v32 }
 0x2e3   : > { %7283 = vmatprep.subr.bf16.mxu0 %v8344_v2 }
 0x2e5   : > { %7220 = vmatmul.mubr.msk.bf16.gmra.mrb[8].mxu0 %vm391_vm0, %v11540_v21 }
 0x2e6   : > { %7223 = vmatprep.mubr.msk.bf16.mxu0 %vm391_vm0, %v11541_v49 }
 0x2ed   : > { %7224 = vmatmul.mubr.msk.bf16.gmra.mrb[12].mxu0 %vm391_vm0, %v11542_v25 }
 0x2ee   : > { %7227 = vmatprep.mubr.msk.bf16.mxu0 %vm391_vm0, %v11543_v59 }
 0x2f5   : > { %7228 = vmatmul.mubr.msk.bf16.gmra.mrb[16].mxu0 %vm391_vm0, %v11544_v22 }
 0x2f6   : > { %7231 = vmatprep.mubr.msk.bf16.mxu0 %vm391_vm0, %v11545_v43 }
 0x2fd   : > { %7232 = vmatmul.mubr.msk.bf16.gmra.mrb[20].mxu0 %vm391_vm0, %v11546_v37 }
 0x2fe   : > { %7235 = vmatprep.mubr.msk.bf16.mxu0 %vm391_vm0, %v11547_v7 }
 0x305   : > { %7236 = vmatmul.mubr.msk.bf16.gmra.mrb[24].mxu0 %vm391_vm0, %v11548_v1 }
 0x306   : > { %7239 = vmatprep.mubr.msk.bf16.mxu0 %vm391_vm0, %v11549_v8 }
 0x30d   : > { %7240 = vmatmul.mubr.msk.bf16.gmra.mrb[28].mxu0 %vm391_vm0, %v11549_v8 }
 0x30e   : > { %7251 = vmatprep.mubr.msk.bf16.mxu0 %vm391_vm0, %v9457_v44 }
 0x315   : > { %7252 = vmatmul.mubr.msk.bf16.vlgmr.msra.gmra.mrb[0].mxu0 %vm391_vm0, %v9457_v44 }
 0x316   : > { %7284 = vmatpush3.bf16.msra.mxu0 %v8344_v2  ;;  %7255 = vmatprep.mubr.msk.bf16.mxu0 %vm391_vm0, %v9465_v41 }
 0x317   : > { %7285 = vmatprep.subr.bf16.mxu0 %v8345_v50 }
 0x31a   : > { %7286 = vmatpush3.bf16.msra.mxu0 %v8345_v50 }
 0x31b   : > { %7287 = vmatprep.subr.bf16.mxu0 %v8346_v31 }
 0x31d   : > { %7256 = vmatmul.mubr.msk.bf16.gmra.mrb[4].mxu0 %vm391_vm0, %v9471_v62 }
 0x31e   : > { %7259 = vmatprep.mubr.msk.bf16.mxu0 %vm391_vm0, %v9491_v17  ;;  %7288 = vmatpush3.bf16.msra.mxu0 %v8346_v31 }
 0x31f   : > { %7289 = vmatprep.subr.bf16.mxu0 %v8347_v10 }
 0x322   : > { %7290 = vmatpush3.bf16.msra.mxu0 %v8347_v10 }
 0x323   : > { %7323 = vmatprep.subr.bf16.mxu0 %v8348_v14 }
 0x325   : > { %7260 = vmatmul.mubr.msk.bf16.gmra.mrb[8].mxu0 %vm391_vm0, %v9500_v39 }
 0x326   : > { %7263 = vmatprep.mubr.msk.bf16.mxu0 %vm391_vm0, %v9515_v15 }
 0x32d   : > { %7264 = vmatmul.mubr.msk.bf16.gmra.mrb[12].mxu0 %vm391_vm0, %v9530_v16 }
 0x32e   : > { %7267 = vmatprep.mubr.msk.bf16.mxu0 %vm391_vm0, %v9537_v60 }
 0x335   : > { %7268 = vmatmul.mubr.msk.bf16.gmra.mrb[16].mxu0 %vm391_vm0, %v9559_v6 }
 0x336   : > { %7271 = vmatprep.mubr.msk.bf16.mxu0 %vm391_vm0, %v9569_v11 }
 0x33d   : > { %7272 = vmatmul.mubr.msk.bf16.gmra.mrb[20].mxu0 %vm391_vm0, %v9575_v35 }
 0x33e   : > { %7275 = vmatprep.mubr.msk.bf16.mxu0 %vm391_vm0, %v9595_v53 }
 0x345   : > { %7276 = vmatmul.mubr.msk.bf16.gmra.mrb[24].mxu0 %vm391_vm0, %v9605_v26 }
 0x346   : > { %7279 = vmatprep.mubr.msk.bf16.mxu0 %vm391_vm0, %v9620_v30 }
 0x34d   : > { %7280 = vmatmul.mubr.msk.bf16.gmra.mrb[28].mxu0 %vm391_vm0, %v9640_v61 }
 0x34e   : > { %7291 = vmatprep.mubr.msk.bf16.mxu0 %vm391_vm0, %v9457_v44  ;;  %v8351_v44 = vld [vmem:[%s11406_s3 + $0x118] sm:$0xff]  }
 0x355   : > { %7292 = vmatmul.mubr.msk.bf16.vlgmr.msra.gmra.mrb[0].mxu0 %vm391_vm0, %v9465_v41 }
 0x356   : > { %7324 = vmatpush3.bf16.msra.mxu0 %v8348_v14  ;;  %7295 = vmatprep.mubr.msk.bf16.mxu0 %vm391_vm0, %v9471_v62 }
 0x357   : > { %7325 = vmatprep.subr.bf16.mxu0 %v8349_v33 }
 0x35a   : > { %7326 = vmatpush3.bf16.msra.mxu0 %v8349_v33 }
 0x35b   : > { %7327 = vmatprep.subr.bf16.mxu0 %v8350_v46 }
 0x35d   : > { %7296 = vmatmul.mubr.msk.bf16.gmra.mrb[4].mxu0 %vm391_vm0, %v9491_v17 }
 0x35e   : > { %7299 = vmatprep.mubr.msk.bf16.mxu0 %vm391_vm0, %v9500_v39  ;;  %7328 = vmatpush3.bf16.msra.mxu0 %v8350_v46 }
 0x35f   : > { %7329 = vmatprep.subr.bf16.mxu0 %v8351_v44 }
 0x362   : > { %7330 = vmatpush3.bf16.msra.mxu0 %v8351_v44 }
 0x365   : > { %7300 = vmatmul.mubr.msk.bf16.gmra.mrb[8].mxu0 %vm391_vm0, %v9515_v15 }
 0x366   : > { %7303 = vmatprep.mubr.msk.bf16.mxu0 %vm391_vm0, %v9530_v16 }
 0x36d   : > { %7304 = vmatmul.mubr.msk.bf16.gmra.mrb[12].mxu0 %vm391_vm0, %v9537_v60 }
 0x36e   : > { %7307 = vmatprep.mubr.msk.bf16.mxu0 %vm391_vm0, %v9559_v6 }
 0x375   : > { %7308 = vmatmul.mubr.msk.bf16.gmra.mrb[16].mxu0 %vm391_vm0, %v9569_v11 }
 0x376   : > { %7311 = vmatprep.mubr.msk.bf16.mxu0 %vm391_vm0, %v9575_v35 }
 0x37d   : > { %7312 = vmatmul.mubr.msk.bf16.gmra.mrb[20].mxu0 %vm391_vm0, %v9595_v53 }
 0x37e   : > { %7315 = vmatprep.mubr.msk.bf16.mxu0 %vm391_vm0, %v9605_v26 }
 0x385   : > { %7316 = vmatmul.mubr.msk.bf16.gmra.mrb[24].mxu0 %vm391_vm0, %v9620_v30 }
 0x386   : > { %7319 = vmatprep.mubr.msk.bf16.mxu0 %vm391_vm0, %v9640_v61 }
 0x38d   : > { %7320 = vmatmul.mubr.msk.bf16.gmra.mrb[28].mxu0 %vm391_vm0, %v9644_v58 }
 0x38e   : > { %7331 = vmatprep.mubr.msk.bf16.mxu0 %vm391_vm0, %v9465_v41  ;;  %v3396_v41 = vld [vmem:[%s11412_s9] sm:$0xff] }
 0x395   : > { %7332 = vmatmul.mubr.msk.bf16.vlgmr.msra.gmra.mrb[0].mxu0 %vm391_vm0, %v9471_v62  ;;  %v3397_v62 = vld [vmem:[%s11412_s9 + $0x8] sm:$0xff] }
 0x396   : > { %7335 = vmatprep.mubr.msk.bf16.mxu0 %vm391_vm0, %v9491_v17  ;;  %v8488_v17 = vmov 0.0|0.0  }
 0x397   : > { %7742 = vmatprep.subr.bf16.mxu0 %v8488_v17 }
 0x39d   : > { %7336 = vmatmul.mubr.msk.bf16.gmra.mrb[4].mxu0 %vm391_vm0, %v9500_v39  ;;  %v7743_v39 = vpack.c.bf16 %v3397_v62, %v3396_v41 }
 0x39e   : > { %7339 = vmatprep.mubr.msk.bf16.mxu0 %vm391_vm0, %v9515_v15  ;;  %v3398_v15 = vld [vmem:[%s11412_s9 + $0x10] sm:$0xff] }
 0x39f   : > { %7744 = vmatpush3.bf16.msra.mxu0 %v7743_v39 }
 0x3a0   : > { %7745 = vmatprep.subr.bf16.mxu0 %v8488_v17 }
 0x3a5   : > { %7340 = vmatmul.mubr.msk.bf16.gmra.mrb[8].mxu0 %vm391_vm0, %v9530_v16  ;;  %v3399_v16 = vld [vmem:[%s11412_s9 + $0x18] sm:$0xff] }
 0x3a6   : > { %7343 = vmatprep.mubr.msk.bf16.mxu0 %vm391_vm0, %v9537_v60  ;;  %v7746_v60 = vpack.c.bf16 %v3399_v16, %v3398_v15 }
 0x3a8   : > { %7747 = vmatpush3.bf16.msra.mxu0 %v7746_v60 }
 0x3a9   : > { %7748 = vmatprep.subr.bf16.mxu0 %v8488_v17 }
 0x3ad   : > { %7344 = vmatmul.mubr.msk.bf16.gmra.mrb[12].mxu0 %vm391_vm0, %v9559_v6  ;;  %v3400_v6 = vld [vmem:[%s11412_s9 + $0x20] sm:$0xff] }
 0x3ae   : > { %7347 = vmatprep.mubr.msk.bf16.mxu0 %vm391_vm0, %v9569_v11  ;;  %v3401_v11 = vld [vmem:[%s11412_s9 + $0x28] sm:$0xff] }
 0x3b5   : > { %7348 = vmatmul.mubr.msk.bf16.gmra.mrb[16].mxu0 %vm391_vm0, %v9575_v35  ;;  %v7749_v35 = vpack.c.bf16 %v3401_v11, %v3400_v6 }
 0x3b6   : > { %7351 = vmatprep.mubr.msk.bf16.mxu0 %vm391_vm0, %v9595_v53  ;;  %v3402_v53 = vld [vmem:[%s11412_s9 + $0x30] sm:$0xff] }
 0x3b7   : > { %7750 = vmatpush3.bf16.msra.mxu0 %v7749_v35 }
 0x3b8   : > { %7751 = vmatprep.subr.bf16.mxu0 %v8488_v17 }
 0x3bd   : > { %7352 = vmatmul.mubr.msk.bf16.gmra.mrb[20].mxu0 %vm391_vm0, %v9605_v26  ;;  %v3403_v26 = vld [vmem:[%s11412_s9 + $0x38] sm:$0xff] }
 0x3be   : > { %7355 = vmatprep.mubr.msk.bf16.mxu0 %vm391_vm0, %v9620_v30  ;;  %v7752_v30 = vpack.c.bf16 %v3403_v26, %v3402_v53 }
 0x3c0   : > { %7753 = vmatpush3.bf16.msra.mxu0 %v7752_v30 }
 0x3c5   : > { %7356 = vmatmul.mubr.msk.bf16.gmra.mrb[24].mxu0 %vm391_vm0, %v9640_v61 }
 0x3c6   : > { %7359 = vmatprep.mubr.msk.bf16.mxu0 %vm391_vm0, %v9644_v58 }
 0x3cd   : > { %7360 = vmatmul.mubr.msk.bf16.gmra.mrb[28].mxu0 %vm391_vm0, %v9644_v58 }
 0x3ce   : > { %7379 = vmatprep.mubr.msk.f32.mxu0 %vm8489_vm5, %v8490_v36 }
 0x468   : > { %v7333_v40 = vpop.f32.mrb[0].mxu0 }
 0x469   : > { %v3026_v57 = vpop.f32.mrb[1].mxu0  ;;  %v10001_v52 = vadd.f32 %v7333_v40, %v9998_v29 }
 0x46a   : > { %v10004_v61 = vadd.f32 %v9998_v29, %v3026_v57  ;;  %v7334_v23 = vpop.f32.mrb[2].mxu0 }
 0x46b   : > { %v3029_v58 = vpop.f32.mrb[3].mxu0  ;;  %v10009_v42 = vadd.f32 %v7334_v23, %v9998_v29  ;;  %v3295_v19 = vmul.f32 %v10001_v52, %v10001_v52  ;;  %v3227_v5 = vsel %vm391_vm0, %v10001_v52, 0.0 }
 0x46c   : > { %v3293_v20 = vmul.f32 %v10004_v61, %v10004_v61  ;;  %v10012_v45 = vadd.f32 %v9998_v29, %v3029_v58  ;;  %v3224_v9 = vsel %vm391_vm0, %v10004_v61, 0.0 }
 0x46d   : > { %v3296_v24 = vmul.f32 %v10009_v42, %v10009_v42  ;;  %v3328_v49 = vsel %vm391_vm0, %v3295_v19, 0.0  ;;  %v3229_v25 = vsel %vm391_vm0, %v10009_v42, 0.0 }
 0x46e   : > { %v3225_v3 = vsel %vm391_vm0, %v10012_v45, 0.0  ;;  %v3294_v0 = vmul.f32 %v10012_v45, %v10012_v45  ;;  %v3325_v51 = vsel %vm391_vm0, %v3293_v20, 0.0 }
 0x46f   : > { %v3226_v27 = vadd.f32 %v3225_v3, %v3224_v9  ;;  %v3330_v28 = vsel %vm391_vm0, %v3296_v24, 0.0 }
 0x470   : > { %v3326_v48 = vsel %vm391_vm0, %v3294_v0, 0.0  ;;  %v7337_v54 = vpop.f32.mrb[4].mxu0 }
 0x471   : > { %v3228_v18 = vadd.f32 %v3227_v5, %v3226_v27  ;;  %v3327_v47 = vadd.f32 %v3326_v48, %v3325_v51  ;;  %v3042_v21 = vpop.f32.mrb[5].mxu0  ;;  %v10035_v37 = vadd.f32 %v7337_v54, %v9998_v29 }
 0x472   : > { %v10032_v59 = vadd.f32 %v9998_v29, %v3042_v21  ;;  %v7338_v22 = vpop.f32.mrb[6].mxu0 }
 0x473   : > { %v3329_v43 = vadd.f32 %v3328_v49, %v3327_v47  ;;  %v3230_v7 = vadd.f32 %v3229_v25, %v3228_v18  ;;  %v3045_v1 = vpop.f32.mrb[7].mxu0  ;;  %v10046_v34 = vadd.f32 %v7338_v22, %v9998_v29  ;;  %v3299_v50 = vmul.f32 %v10035_v37, %v10035_v37 }
 0x474   : > { %v3231_v13 = vsel %vm391_vm0, %v10032_v59, 0.0  ;;  %v3297_v55 = vmul.f32 %v10032_v59, %v10032_v59  ;;  %v10043_v38 = vadd.f32 %v9998_v29, %v3045_v1  ;;  %v3235_v33 = vsel %vm391_vm0, %v10035_v37, 0.0 }
 0x475   : > { %v3232_v8 = vadd.f32 %v3231_v13, %v3230_v7  ;;  %v3331_v4 = vadd.f32 %v3330_v28, %v3329_v43  ;;  %v3300_v44 = vmul.f32 %v10046_v34, %v10046_v34  ;;  %v3237_v39 = vsel %vm391_vm0, %v10046_v34, 0.0 }
 0x476   : > { %v3332_v32 = vsel %vm391_vm0, %v3297_v55, 0.0  ;;  %v3233_v2 = vsel %vm391_vm0, %v10043_v38, 0.0  ;;  %v3298_v14 = vmul.f32 %v10043_v38, %v10043_v38  ;;  %v3336_v6 = vsel %vm391_vm0, %v3299_v50, 0.0 }
 0x477   : > { %v3333_v31 = vadd.f32 %v3332_v32, %v3331_v4  ;;  %v3234_v10 = vadd.f32 %v3233_v2, %v3232_v8  ;;  %v3338_v57 = vsel %vm391_vm0, %v3300_v44, 0.0 }
 0x478   : > { %v7341_v46 = vpop.f32.mrb[8].mxu0  ;;  %v3334_v62 = vsel %vm391_vm0, %v3298_v14, 0.0 }
 0x479   : > { %v3236_v41 = vadd.f32 %v3235_v33, %v3234_v10  ;;  %v3058_v17 = vpop.f32.mrb[9].mxu0  ;;  %v3335_v15 = vadd.f32 %v3334_v62, %v3333_v31  ;;  %v10067_v11 = vadd.f32 %v7341_v46, %v9998_v29 }
 0x47a   : > { %v10063_v16 = vadd.f32 %v9998_v29, %v3058_v17  ;;  %v7342_v60 = vpop.f32.mrb[10].mxu0 }
 0x47b   : > { %v3238_v35 = vadd.f32 %v3237_v39, %v3236_v41  ;;  %v3061_v53 = vpop.f32.mrb[11].mxu0  ;;  %v3337_v26 = vadd.f32 %v3336_v6, %v3335_v15  ;;  %v10078_v58 = vadd.f32 %v7342_v60, %v9998_v29  ;;  %v3303_v0 = vmul.f32 %v10067_v11, %v10067_v11 }
 0x47c   : > { %v3239_v30 = vsel %vm391_vm0, %v10063_v16, 0.0  ;;  %v3301_v36 = vmul.f32 %v10063_v16, %v10063_v16  ;;  %v10074_v40 = vadd.f32 %v9998_v29, %v3061_v53  ;;  %v3243_v5 = vsel %vm391_vm0, %v10067_v11, 0.0 }
 0x47d   : > { %v3240_v23 = vadd.f32 %v3239_v30, %v3238_v35  ;;  %v3339_v20 = vadd.f32 %v3338_v57, %v3337_v26  ;;  %v3304_v54 = vmul.f32 %v10078_v58, %v10078_v58  ;;  %v3245_v21 = vsel %vm391_vm0, %v10078_v58, 0.0 }
 0x47e   : > { %v3340_v19 = vsel %vm391_vm0, %v3301_v36, 0.0  ;;  %v3241_v9 = vsel %vm391_vm0, %v10074_v40, 0.0  ;;  %v3302_v3 = vmul.f32 %v10074_v40, %v10074_v40  ;;  %v3344_v43 = vsel %vm391_vm0, %v3303_v0, 0.0 }
 0x47f   : > { %v3242_v27 = vadd.f32 %v3241_v9, %v3240_v23  ;;  %v3341_v51 = vadd.f32 %v3340_v19, %v3339_v20  ;;  %v3346_v32 = vsel %vm391_vm0, %v3304_v54, 0.0 }
 0x480   : > { %v3342_v24 = vsel %vm391_vm0, %v3302_v3, 0.0  ;;  %v7345_v48 = vpop.f32.mrb[12].mxu0 }
 0x481   : > { %v3244_v18 = vadd.f32 %v3243_v5, %v3242_v27  ;;  %v3074_v47 = vpop.f32.mrb[13].mxu0  ;;  %v3343_v49 = vadd.f32 %v3342_v24, %v3341_v51  ;;  %v10099_v7 = vadd.f32 %v7345_v48, %v9998_v29 }
 0x482   : > { %v10095_v25 = vadd.f32 %v9998_v29, %v3074_v47  ;;  %v7346_v22 = vpop.f32.mrb[14].mxu0 }
 0x483   : > { %v3246_v1 = vadd.f32 %v3245_v21, %v3244_v18  ;;  %v3077_v28 = vpop.f32.mrb[15].mxu0  ;;  %v3345_v13 = vadd.f32 %v3344_v43, %v3343_v49  ;;  %v10110_v50 = vadd.f32 %v7346_v22, %v9998_v29  ;;  %v3307_v46 = vmul.f32 %v10099_v7, %v10099_v7 }
 0x484   : > { %v3247_v55 = vsel %vm391_vm0, %v10095_v25, 0.0  ;;  %v3305_v8 = vmul.f32 %v10095_v25, %v10095_v25  ;;  %v10106_v4 = vadd.f32 %v9998_v29, %v3077_v28  ;;  %v3251_v41 = vsel %vm391_vm0, %v10099_v7, 0.0 }
 0x485   : > { %v3248_v2 = vadd.f32 %v3247_v55, %v3246_v1  ;;  %v3347_v31 = vadd.f32 %v3346_v32, %v3345_v13  ;;  %v3308_v15 = vmul.f32 %v10110_v50, %v10110_v50  ;;  %v3253_v35 = vsel %vm391_vm0, %v10110_v50, 0.0 }
 0x486   : > { %v3348_v10 = vsel %vm391_vm0, %v3305_v8, 0.0  ;;  %v3249_v14 = vsel %vm391_vm0, %v10106_v4, 0.0  ;;  %v3306_v33 = vmul.f32 %v10106_v4, %v10106_v4  ;;  %v3352_v36 = vsel %vm391_vm0, %v3307_v46, 0.0 }
 0x487   : > { %v3250_v44 = vadd.f32 %v3249_v14, %v3248_v2  ;;  %v3349_v62 = vadd.f32 %v3348_v10, %v3347_v31  ;;  %v3354_v27 = vsel %vm391_vm0, %v3308_v15, 0.0 }
 0x488   : > { %v3350_v17 = vsel %vm391_vm0, %v3306_v33, 0.0  ;;  %v7349_v39 = vpop.f32.mrb[16].mxu0 }
 0x489   : > { %v3252_v60 = vadd.f32 %v3251_v41, %v3250_v44  ;;  %v3090_v6 = vpop.f32.mrb[17].mxu0  ;;  %v3351_v53 = vadd.f32 %v3350_v17, %v3349_v62  ;;  %v10131_v57 = vadd.f32 %v7349_v39, %v9998_v29 }
 0x48a   : > { %v10127_v26 = vadd.f32 %v9998_v29, %v3090_v6  ;;  %v7350_v30 = vpop.f32.mrb[18].mxu0 }
 0x48b   : > { %v3254_v23 = vadd.f32 %v3253_v35, %v3252_v60  ;;  %v3093_v20 = vpop.f32.mrb[19].mxu0  ;;  %v3353_v19 = vadd.f32 %v3352_v36, %v3351_v53  ;;  %v10142_v51 = vadd.f32 %v7350_v30, %v9998_v29  ;;  %v3311_v47 = vmul.f32 %v10131_v57, %v10131_v57 }
 0x48c   : > { %v3255_v9 = vsel %vm391_vm0, %v10127_v26, 0.0  ;;  %v3309_v3 = vmul.f32 %v10127_v26, %v10127_v26  ;;  %v10138_v0 = vadd.f32 %v9998_v29, %v3093_v20  ;;  %v3259_v49 = vsel %vm391_vm0, %v10131_v57, 0.0 }
 0x48d   : > { %v3256_v5 = vadd.f32 %v3255_v9, %v3254_v23  ;;  %v3355_v24 = vadd.f32 %v3354_v27, %v3353_v19  ;;  %v3312_v28 = vmul.f32 %v10142_v51, %v10142_v51  ;;  %v3261_v8 = vsel %vm391_vm0, %v10142_v51, 0.0 }
 0x48e   : > { %v3356_v48 = vsel %vm391_vm0, %v3309_v3, 0.0  ;;  %v3257_v54 = vsel %vm391_vm0, %v10138_v0, 0.0  ;;  %v3310_v18 = vmul.f32 %v10138_v0, %v10138_v0  ;;  %v3360_v10 = vsel %vm391_vm0, %v3311_v47, 0.0 }
 0x48f   : > { %v3258_v21 = vadd.f32 %v3257_v54, %v3256_v5  ;;  %v3357_v22 = vadd.f32 %v3356_v48, %v3355_v24  ;;  %v3362_v39 = vsel %vm391_vm0, %v3312_v28, 0.0 }
 0x490   : > { %v3358_v43 = vsel %vm391_vm0, %v3310_v18, 0.0  ;;  %v7353_v1 = vpop.f32.mrb[20].mxu0 }
 0x491   : > { %v3260_v13 = vadd.f32 %v3259_v49, %v3258_v21  ;;  %v3106_v55 = vpop.f32.mrb[21].mxu0  ;;  %v3359_v32 = vadd.f32 %v3358_v43, %v3357_v22  ;;  %v10163_v14 = vadd.f32 %v7353_v1, %v9998_v29 }
 0x492   : > { %v10159_v2 = vadd.f32 %v9998_v29, %v3106_v55  ;;  %v7354_v31 = vpop.f32.mrb[22].mxu0 }
 0x493   : > { %v3262_v33 = vadd.f32 %v3261_v8, %v3260_v13  ;;  %v3109_v46 = vpop.f32.mrb[23].mxu0  ;;  %v3361_v44 = vadd.f32 %v3360_v10, %v3359_v32  ;;  %v10174_v60 = vadd.f32 %v7354_v31, %v9998_v29  ;;  %v3315_v36 = vmul.f32 %v10163_v14, %v10163_v14 }
 0x494   : > { %v3263_v41 = vsel %vm391_vm0, %v10159_v2, 0.0  ;;  %v3313_v62 = vmul.f32 %v10159_v2, %v10159_v2  ;;  %v10170_v17 = vadd.f32 %v9998_v29, %v3109_v46  ;;  %v3267_v20 = vsel %vm391_vm0, %v10163_v14, 0.0 }
 0x495   : > { %v3264_v15 = vadd.f32 %v3263_v41, %v3262_v33  ;;  %v3363_v6 = vadd.f32 %v3362_v39, %v3361_v44  ;;  %v3316_v27 = vmul.f32 %v10174_v60, %v10174_v60  ;;  %v3269_v48 = vsel %vm391_vm0, %v10174_v60, 0.0 }
 0x496   : > { %v3364_v35 = vsel %vm391_vm0, %v3313_v62, 0.0  ;;  %v3265_v53 = vsel %vm391_vm0, %v10170_v17, 0.0  ;;  %v3314_v30 = vmul.f32 %v10170_v17, %v10170_v17  ;;  %v3368_v21 = vsel %vm391_vm0, %v3315_v36, 0.0 }
 0x497   : > { %v3266_v23 = vadd.f32 %v3265_v53, %v3264_v15  ;;  %v3365_v19 = vadd.f32 %v3364_v35, %v3363_v6  ;;  %v3370_v8 = vsel %vm391_vm0, %v3316_v27, 0.0 }
 0x498   : > { %v3366_v9 = vsel %vm391_vm0, %v3314_v30, 0.0  ;;  %v7357_v3 = vpop.f32.mrb[24].mxu0 }
 0x499   : > { %v3268_v5 = vadd.f32 %v3267_v20, %v3266_v23  ;;  %v3122_v24 = vpop.f32.mrb[25].mxu0  ;;  %v3367_v54 = vadd.f32 %v3366_v9, %v3365_v19  ;;  %v10195_v49 = vadd.f32 %v7357_v3, %v9998_v29 }
 0x49a   : > { %v10191_v18 = vadd.f32 %v9998_v29, %v3122_v24  ;;  %v7358_v47 = vpop.f32.mrb[26].mxu0 }
 0x49b   : > { %v3270_v22 = vadd.f32 %v3269_v48, %v3268_v5  ;;  %v3125_v43 = vpop.f32.mrb[27].mxu0  ;;  %v3369_v1 = vadd.f32 %v3368_v21, %v3367_v54  ;;  %v10206_v31 = vadd.f32 %v7358_v47, %v9998_v29  ;;  %v3319_v41 = vmul.f32 %v10195_v49, %v10195_v49 }
 0x49c   : > { %v3271_v28 = vsel %vm391_vm0, %v10191_v18, 0.0  ;;  %v3317_v13 = vmul.f32 %v10191_v18, %v10191_v18  ;;  %v10202_v55 = vadd.f32 %v9998_v29, %v3125_v43  ;;  %v3275_v39 = vsel %vm391_vm0, %v10195_v49, 0.0 }
 0x49d   : > { %v3272_v32 = vadd.f32 %v3271_v28, %v3270_v22  ;;  %v3371_v10 = vadd.f32 %v3370_v8, %v3369_v1  ;;  %v3320_v53 = vmul.f32 %v10206_v31, %v10206_v31  ;;  %v3277_v23 = vsel %vm391_vm0, %v10206_v31, 0.0 }
 0x49e   : > { %v3372_v33 = vsel %vm391_vm0, %v3317_v13, 0.0  ;;  %v3273_v46 = vsel %vm391_vm0, %v10202_v55, 0.0  ;;  %v3318_v44 = vmul.f32 %v10202_v55, %v10202_v55  ;;  %v3376_v3 = vsel %vm391_vm0, %v3319_v41, 0.0 }
 0x49f   : > { %v3274_v62 = vadd.f32 %v3273_v46, %v3272_v32  ;;  %v3373_v15 = vadd.f32 %v3372_v33, %v3371_v10  ;;  %v3378_v22 = vsel %vm391_vm0, %v3320_v53, 0.0 }
 0x4a0   : > { %v3374_v6 = vsel %vm391_vm0, %v3318_v44, 0.0  ;;  %v7361_v35 = vpop.f32.mrb[28].mxu0 }
 0x4a1   : > { %v3276_v30 = vadd.f32 %v3275_v39, %v3274_v62  ;;  %v3138_v36 = vpop.f32.mrb[29].mxu0  ;;  %v3375_v20 = vadd.f32 %v3374_v6, %v3373_v15  ;;  %v10227_v27 = vadd.f32 %v7361_v35, %v9998_v29 }
 0x4a2   : > { %v10223_v19 = vadd.f32 %v9998_v29, %v3138_v36  ;;  %v7362_v9 = vpop.f32.mrb[30].mxu0 }
 0x4a3   : > { %v3278_v5 = vadd.f32 %v3277_v23, %v3276_v30  ;;  %v3141_v24 = vpop.f32.mrb[31].mxu0  ;;  %v3377_v48 = vadd.f32 %v3376_v3, %v3375_v20  ;;  %v10238_v1 = vadd.f32 %v7362_v9, %v9998_v29  ;;  %v3323_v10 = vmul.f32 %v10227_v27, %v10227_v27 }
 0x4a4   : > { %v3279_v54 = vsel %vm391_vm0, %v10223_v19, 0.0  ;;  %v3321_v47 = vmul.f32 %v10223_v19, %v10223_v19  ;;  %v10234_v21 = vadd.f32 %v9998_v29, %v3141_v24  ;;  %v3283_v46 = vsel %vm391_vm0, %v10227_v27, 0.0 }
 0x4a5   : > { %v3280_v43 = vadd.f32 %v3279_v54, %v3278_v5  ;;  %v3379_v28 = vadd.f32 %v3378_v22, %v3377_v48  ;;  %v3324_v41 = vmul.f32 %v10238_v1, %v10238_v1  ;;  %v3285_v39 = vsel %vm391_vm0, %v10238_v1, 0.0 }
 0x4a6   : > { %v3380_v13 = vsel %vm391_vm0, %v3321_v47, 0.0  ;;  %v3281_v8 = vsel %vm391_vm0, %v10234_v21, 0.0  ;;  %v3322_v32 = vmul.f32 %v10234_v21, %v10234_v21  ;;  %v3384_v6 = vsel %vm391_vm0, %v3323_v10, 0.0  ;;  %v8354_v10 = vld [vmem:[%s11410_s7 + $0x70] sm:$0xff]  }
 0x4a7   : > { %v3282_v33 = vadd.f32 %v3281_v8, %v3280_v43  ;;  %v3381_v44 = vadd.f32 %v3380_v13, %v3379_v28  ;;  %v3386_v30 = vsel %vm391_vm0, %v3324_v41, 0.0  ;;  %v8352_v8 = vld [vmem:[%s11410_s7 + $0x60] sm:$0xff]  }
 0x4a8   : > { %v3382_v29 = vsel %vm391_vm0, %v3322_v32, 0.0  ;;  %v8353_v32 = vld [vmem:[%s11410_s7 + $0x68] sm:$0xff]   ;;  %7382 = vmatprep.subr.bf16.mxu1 %v8352_v8 }
 0x4a9   : > { %v3284_v62 = vadd.f32 %v3283_v46, %v3282_v33  ;;  %v3383_v15 = vadd.f32 %v3382_v29, %v3381_v44  ;;  %7383 = vmatpush3.bf16.msra.mxu1 %v8352_v8  ;;  %v8355_v33 = vld [vmem:[%s11410_s7 + $0x78] sm:$0xff]   ;;  %v10272_v46 = vld [vmem:[%s11410_s7] sm:$0xff]  }
 0x4aa   : > { %7384 = vmatprep.subr.bf16.mxu1 %v8353_v32 }
 0x4ab   : > { %v3286_v35 = vadd.f32 %v3285_v39, %v3284_v62  ;;  %v3385_v53 = vadd.f32 %v3384_v6, %v3383_v15  ;;  %v6445_v6 = vld [vmem:[%s11408_s5] ss:$0 sm:$0xff] }
 0x4ad   : > { %v3287_v36 = vrot.slane %v3286_v35, 4  ;;  %v3387_v23 = vadd.f32 %v3386_v30, %v3385_v53  ;;  %7385 = vmatpush3.bf16.msra.mxu1 %v8353_v32 }
 0x4ae   : > { %7386 = vmatprep.subr.bf16.mxu1 %v8354_v10 }
 0x4af   : > { %v3288_v20 = vadd.f32 %v3287_v36, %v3286_v35  ;;  %v3388_v9 = vrot.slane %v3387_v23, 4  ;;  %v3500_v35 = vsub.s32 1, %v8941_v56  ;;  %v8362_v56 = vld [vmem:[%s11410_s7 + $0xd0] sm:$0xff]  }
 0x4b1   : > { %v3289_v3 = vrot.slane %v3288_v20, 2  ;;  %v3389_v5 = vadd.f32 %v3388_v9, %v3387_v23  ;;  %7387 = vmatpush3.bf16.msra.mxu1 %v8354_v10 }
 0x4b2   : > { %7388 = vmatprep.subr.bf16.mxu1 %v8355_v33 }
 0x4b3   : > { %v3290_v24 = vadd.f32 %v3289_v3, %v3288_v20  ;;  %v3390_v48 = vrot.slane %v3389_v5, 2  ;;  %v3492_v20 = vld [vmem:[%s11409_s6] sm:$0x1] }
 0x4b5   : > { %v3291_v54 = vrot.slane %v3290_v24, 1  ;;  %v3391_v47 = vadd.f32 %v3390_v48, %v3389_v5  ;;  %7389 = vmatpush3.bf16.msra.mxu1 %v8355_v33 }
 0x4b6   : > { %7422 = vmatprep.subr.bf16.mxu1 %v10272_v46 }
 0x4b7   : > { %v3392_v22 = vrot.slane %v3391_v47, 1  ;;  %v3292_v43 = vadd.f32 %v3291_v54, %v3290_v24 }
 0x4b9   : > { %v3393_v28 = vadd.f32 %v3392_v22, %v3391_v47 }
 0x4bb   : > { %v3395_v13 = vsel %vm3394_vm6, %v3292_v43, %v3393_v28 }
 0x4bc   : > { %7380 = vmatmul.mubr.msk.f32.vlgmr.msra.gmra.mrb[32].mxu0 %vm391_vm0, %v3395_v13 }
 0x58f   : > { %v3473_v44 = vpop.f32.mrb[32].mxu0 }
 0x590   : > { %v3477_v29 = vmul.f32 %v3473_v44, %v3473_v44  ;;  %v7381_v41 = vpop.f32.mrb[33].mxu0 }
 0x592   : > { %v3479_v62 = vrot.slane %v3477_v29, 7 }
 0x594   : > { %v3481_v39 = vsub.f32 %v3473_v44, %v3479_v62 }
 0x596   : > { %v3482_v15 = vadd.f32 1e-05, %v3481_v39 }
 0x598   : > { %8390 = vrsqrt.f32 %v3482_v15 }
 0x5a2   : > { %v8391_v53 = vpop.eup %8390 }
 0x5a3   : > { %v3491_v30 = vmul.f32 %v8391_v53, %v6445_v6 }
 0x5a5   : > { %v3494_v36 = vrot.slane %v3491_v30, 1  ;;  %v3501_v23 = vrot.slane %v3491_v30, %v3500_v35 }
 0x5a7   : > { %v3496_v9 = vmul.f32 %v3494_v36, %v3473_v44  ;;  %v3502_v3 = vmul.f32 %v3501_v23, %v10004_v61  ;;  %v3503_v5 = vmul.f32 %v3501_v23, %v10012_v45  ;;  %v3504_v24 = vmul.f32 %v3501_v23, %v10001_v52 }
 0x5a8   : > { %v3505_v48 = vmul.f32 %v3501_v23, %v10009_v42  ;;  %v3506_v54 = vmul.f32 %v3501_v23, %v10032_v59  ;;  %v3507_v47 = vmul.f32 %v3501_v23, %v10043_v38  ;;  %v3508_v22 = vmul.f32 %v3501_v23, %v10035_v37  ;;  %v11550_v59 = vld [vmem:[#allocation23_spill] sm:$0xff] }
 0x5a9   : > { %v3497_v43 = vsub.f32 %v3492_v20, %v3496_v9  ;;  %v3509_v28 = vmul.f32 %v3501_v23, %v10046_v34  ;;  %v3510_v13 = vmul.f32 %v3501_v23, %v10063_v16  ;;  %v3511_v8 = vmul.f32 %v3501_v23, %v10074_v40 }
 0x5aa   : > { %v3512_v61 = vmul.f32 %v3501_v23, %v10067_v11  ;;  %v3513_v45 = vmul.f32 %v3501_v23, %v10078_v58  ;;  %v3514_v52 = vmul.f32 %v3501_v23, %v10095_v25  ;;  %v3515_v42 = vmul.f32 %v3501_v23, %v10106_v4 }
 0x5ab   : > { %v3538_v32 = vrot.slane %v3497_v43, %v11550_v59  ;;  %v3516_v38 = vmul.f32 %v3501_v23, %v10099_v7  ;;  %v3517_v37 = vmul.f32 %v3501_v23, %v10110_v50  ;;  %v3518_v34 = vmul.f32 %v3501_v23, %v10127_v26 }
 0x5ac   : > { %v3519_v16 = vmul.f32 %v3501_v23, %v10138_v0  ;;  %v3520_v40 = vmul.f32 %v3501_v23, %v10131_v57  ;;  %v3521_v11 = vmul.f32 %v3501_v23, %v10142_v51  ;;  %v3522_v58 = vmul.f32 %v3501_v23, %v10159_v2 }
 0x5ad   : > { %v3523_v25 = vmul.f32 %v3501_v23, %v10170_v17  ;;  %v3524_v4 = vmul.f32 %v3501_v23, %v10163_v14  ;;  %v3525_v10 = vmul.f32 %v3501_v23, %v10174_v60  ;;  %v3526_v7 = vmul.f32 %v3501_v23, %v10191_v18 }
 0x5ae   : > { %v3527_v50 = vmul.f32 %v3501_v23, %v10202_v55  ;;  %v3528_v26 = vmul.f32 %v3501_v23, %v10195_v49  ;;  %v3529_v0 = vmul.f32 %v3501_v23, %v10206_v31  ;;  %v3530_v57 = vmul.f32 %v3501_v23, %v10223_v19 }
 0x5af   : > { %v3531_v51 = vmul.f32 %v3501_v23, %v10234_v21  ;;  %v3532_v2 = vmul.f32 %v3501_v23, %v10227_v27  ;;  %v3533_v17 = vmul.f32 %v3501_v23, %v10238_v1  ;;  %v3540_v33 = vadd.f32 %v3538_v32, %v3502_v3 }
 0x5b0   : > { %v3541_v14 = vadd.f32 %v3538_v32, %v3503_v5  ;;  %v3542_v44 = vadd.f32 %v3538_v32, %v3504_v24  ;;  %v3543_v60 = vadd.f32 %v3538_v32, %v3505_v48  ;;  %v3544_v29 = vadd.f32 %v3538_v32, %v3506_v54 }
 0x5b1   : > { %v3545_v18 = vadd.f32 %v3538_v32, %v3507_v47  ;;  %v3546_v41 = vadd.f32 %v3538_v32, %v3508_v22  ;;  %v3547_v55 = vadd.f32 %v3538_v32, %v3509_v28  ;;  %v3548_v62 = vadd.f32 %v3538_v32, %v3510_v13 }
 0x5b2   : > { %v3549_v49 = vadd.f32 %v3538_v32, %v3511_v8  ;;  %v3550_v39 = vadd.f32 %v3538_v32, %v3512_v61  ;;  %v3551_v31 = vadd.f32 %v3538_v32, %v3513_v45  ;;  %v3552_v15 = vadd.f32 %v3538_v32, %v3514_v52 }
 0x5b3   : > { %v3553_v19 = vadd.f32 %v3538_v32, %v3515_v42  ;;  %v3554_v6 = vadd.f32 %v3538_v32, %v3516_v38  ;;  %v3555_v21 = vadd.f32 %v3538_v32, %v3517_v37  ;;  %v3556_v35 = vadd.f32 %v3538_v32, %v3518_v34 }
 0x5b4   : > { %v3557_v27 = vadd.f32 %v3538_v32, %v3519_v16  ;;  %v3558_v53 = vadd.f32 %v3538_v32, %v3520_v40  ;;  %v3559_v1 = vadd.f32 %v3538_v32, %v3521_v11  ;;  %v3560_v30 = vadd.f32 %v3538_v32, %v3522_v58 }
 0x5b5   : > { %v3561_v36 = vadd.f32 %v3538_v32, %v3523_v25  ;;  %v3562_v23 = vadd.f32 %v3538_v32, %v3524_v4  ;;  %v3563_v20 = vadd.f32 %v3538_v32, %v3525_v10  ;;  %v3564_v9 = vadd.f32 %v3538_v32, %v3526_v7 }
 0x5b6   : > { %v3565_v3 = vadd.f32 %v3538_v32, %v3527_v50  ;;  %v3566_v5 = vadd.f32 %v3538_v32, %v3528_v26  ;;  %v3567_v24 = vadd.f32 %v3538_v32, %v3529_v0  ;;  %v3568_v48 = vadd.f32 %v3538_v32, %v3530_v57 }
 0x5b7   : > { %v3569_v54 = vadd.f32 %v3538_v32, %v3531_v51  ;;  %v3570_v47 = vadd.f32 %v3538_v32, %v3532_v2  ;;  %v3571_v22 = vadd.f32 %v3538_v32, %v3533_v17  ;;  %v10315_v43 = vmax.f32 %v3540_v33, 0.0 }
 0x5b8   : > { %v10317_v28 = vmax.f32 %v3541_v14, 0.0  ;;  %v10319_v13 = vmax.f32 %v3542_v44, 0.0  ;;  %v10321_v8 = vmax.f32 %v3543_v60, 0.0  ;;  %v10323_v61 = vmax.f32 %v3544_v29, 0.0 }
 0x5b9   : > { %v10325_v45 = vmax.f32 %v3545_v18, 0.0  ;;  %v10327_v52 = vmax.f32 %v3546_v41, 0.0  ;;  %v10329_v42 = vmax.f32 %v3547_v55, 0.0  ;;  %v10331_v38 = vmax.f32 %v3548_v62, 0.0 }
 0x5ba   : > { %v10333_v37 = vmax.f32 %v3549_v49, 0.0  ;;  %v10335_v32 = vmax.f32 %v3550_v39, 0.0  ;;  %v10337_v34 = vmax.f32 %v3551_v31, 0.0  ;;  %v10339_v16 = vmax.f32 %v3552_v15, 0.0 }
 0x5bb   : > { %v10341_v40 = vmax.f32 %v3553_v19, 0.0  ;;  %v10343_v11 = vmax.f32 %v3554_v6, 0.0  ;;  %v10345_v58 = vmax.f32 %v3555_v21, 0.0  ;;  %v10347_v25 = vmax.f32 %v3556_v35, 0.0 }
 0x5bc   : > { %v10349_v4 = vmax.f32 %v3557_v27, 0.0  ;;  %v10351_v10 = vmax.f32 %v3558_v53, 0.0  ;;  %v10353_v7 = vmax.f32 %v3559_v1, 0.0  ;;  %v10355_v50 = vmax.f32 %v3560_v30, 0.0 }
 0x5bd   : > { %v10357_v26 = vmax.f32 %v3561_v36, 0.0  ;;  %v10359_v0 = vmax.f32 %v3562_v23, 0.0  ;;  %v10361_v57 = vmax.f32 %v3563_v20, 0.0  ;;  %v10363_v51 = vmax.f32 %v3564_v9, 0.0 }
 0x5be   : > { %v10365_v2 = vmax.f32 %v3565_v3, 0.0  ;;  %v10367_v17 = vmax.f32 %v3566_v5, 0.0  ;;  %v10369_v33 = vmax.f32 %v3567_v24, 0.0  ;;  %v10371_v14 = vmax.f32 %v3568_v48, 0.0 }
 0x5bf   : > { %v10373_v44 = vmax.f32 %v3569_v54, 0.0  ;;  %v10375_v60 = vmax.f32 %v3570_v47, 0.0  ;;  %v10377_v29 = vmax.f32 %v3571_v22, 0.0  ;;  %v3604_v18 = vrot.slane %v10315_v43, 7  ;;  %v8357_v47 = vld [vmem:[%s11410_s7 + $0x8] sm:$0xff]  }
 0x5c0   : > { %v3620_v41 = vrot.slane %v10317_v28, 7  ;;  %v3671_v55 = vrot.slane %v10315_v43, %v11550_v59  ;;  %v3605_v62 = vrot.slane %v10319_v13, 7  ;;  %v3621_v49 = vrot.slane %v10321_v8, 7 }
 0x5c1   : > { %v3675_v39 = vrot.slane %v10319_v13, %v11550_v59  ;;  %v3606_v31 = vrot.slane %v10323_v61, 7  ;;  %v3622_v15 = vrot.slane %v10325_v45, 7  ;;  %v3679_v19 = vrot.slane %v10323_v61, %v11550_v59 }
 0x5c2   : > { %v3636_v6 = vsel %vm732_vm1, %v3604_v18, %v3620_v41  ;;  %v3652_v21 = vsel %vm732_vm1, %v3620_v41, %v3604_v18  ;;  %v3637_v35 = vsel %vm732_vm1, %v3605_v62, %v3621_v49  ;;  %v3653_v27 = vsel %vm732_vm1, %v3621_v49, %v3605_v62 }
 0x5c3   : > { %v3732_v53 = vsel %vm698_vm2, %v3671_v55, %v3652_v21  ;;  %v3734_v1 = vsel %vm698_vm2, %v3675_v39, %v3653_v27  ;;  %v3638_v30 = vsel %vm732_vm1, %v3606_v31, %v3622_v15  ;;  %v3654_v36 = vsel %vm732_vm1, %v3622_v15, %v3606_v31 }
 0x5c4   : > { %v10407_v23 = vpack.c.bf16 %v3636_v6, %v3732_v53  ;;  %v10409_v20 = vpack.c.bf16 %v3637_v35, %v3734_v1  ;;  %v3736_v9 = vsel %vm698_vm2, %v3679_v19, %v3654_v36  ;;  %v3607_v3 = vrot.slane %v10327_v52, 7  ;;  %v8358_v1 = vld [vmem:[%s11410_s7 + $0x10] sm:$0xff]  }
 0x5c5   : > { %v10414_v5 = vpack.c.bf16 %v3638_v30, %v3736_v9  ;;  %v3623_v24 = vrot.slane %v10329_v42, 7  ;;  %v3683_v48 = vrot.slane %v10327_v52, %v11550_v59  ;;  %v3608_v54 = vrot.slane %v10331_v38, 7 }
 0x5c6   : > { %7390 = vmatprep.mubr.msk.bf16.mxu1 %vm391_vm0, %v10407_v23  ;;  %v3624_v22 = vrot.slane %v10333_v37, 7  ;;  %v3687_v18 = vrot.slane %v10331_v38, %v11550_v59  ;;  %v3609_v41 = vrot.slane %v10335_v32, 7  ;;  %v3625_v55 = vrot.slane %v10337_v34, 7 }
 0x5c7   : > { %7391 = vmatmul.mubr.msk.bf16.vlgmr.msra.gmra.mrb[0].mxu1 %vm391_vm0, %v10409_v20  ;;  %v3639_v62 = vsel %vm732_vm1, %v3607_v3, %v3623_v24  ;;  %v3655_v49 = vsel %vm732_vm1, %v3623_v24, %v3607_v3  ;;  %v3691_v39 = vrot.slane %v10335_v32, %v11550_v59  ;;  %v3610_v31 = vrot.slane %v10339_v16, 7 }
 0x5c8   : > { %7423 = vmatpush3.bf16.msra.mxu1 %v10272_v46  ;;  %7394 = vmatprep.mubr.msk.bf16.mxu1 %vm391_vm0, %v10414_v5  ;;  %v3738_v15 = vsel %vm698_vm2, %v3683_v48, %v3655_v49  ;;  %v3640_v19 = vsel %vm732_vm1, %v3608_v54, %v3624_v22  ;;  %v3656_v6 = vsel %vm732_vm1, %v3624_v22, %v3608_v54  ;;  %v3626_v21 = vrot.slane %v10341_v40, 7 }
 0x5c9   : > { %v10449_v35 = vpack.c.bf16 %v3639_v62, %v3738_v15  ;;  %v3740_v27 = vsel %vm698_vm2, %v3687_v18, %v3656_v6  ;;  %7424 = vmatprep.subr.bf16.mxu1 %v8357_v47  ;;  %v3641_v46 = vsel %vm732_vm1, %v3609_v41, %v3625_v55  ;;  %v3657_v53 = vsel %vm732_vm1, %v3625_v55, %v3609_v41  ;;  %v8359_v15 = vld [vmem:[%s11410_s7 + $0x18] sm:$0xff]  }
 0x5ca   : > { %v10460_v30 = vpack.c.bf16 %v3640_v19, %v3740_v27  ;;  %v3742_v36 = vsel %vm698_vm2, %v3691_v39, %v3657_v53  ;;  %v3642_v9 = vsel %vm732_vm1, %v3610_v31, %v3626_v21  ;;  %v3658_v3 = vsel %vm732_vm1, %v3626_v21, %v3610_v31 }
 0x5cb   : > { %v10468_v24 = vpack.c.bf16 %v3641_v46, %v3742_v36  ;;  %v3695_v48 = vrot.slane %v10339_v16, %v11550_v59  ;;  %v3611_v54 = vrot.slane %v10343_v11, 7  ;;  %v3627_v22 = vrot.slane %v10345_v58, 7 }
 0x5cc   : > { %7425 = vmatpush3.bf16.msra.mxu1 %v8357_v47  ;;  %v3699_v18 = vrot.slane %v10343_v11, %v11550_v59  ;;  %v3612_v41 = vrot.slane %v10347_v25, 7  ;;  %v3628_v55 = vrot.slane %v10349_v4, 7  ;;  %v3703_v62 = vrot.slane %v10347_v25, %v11550_v59 }
 0x5cd   : > { %v3744_v49 = vsel %vm698_vm2, %v3695_v48, %v3658_v3  ;;  %v3643_v39 = vsel %vm732_vm1, %v3611_v54, %v3627_v22  ;;  %v3659_v31 = vsel %vm732_vm1, %v3627_v22, %v3611_v54  ;;  %7426 = vmatprep.subr.bf16.mxu1 %v8358_v1  ;;  %v3613_v47 = vrot.slane %v10351_v10, 7 }
 0x5ce   : > { %v10490_v19 = vpack.c.bf16 %v3642_v9, %v3744_v49  ;;  %v3746_v6 = vsel %vm698_vm2, %v3699_v18, %v3659_v31  ;;  %v3644_v21 = vsel %vm732_vm1, %v3612_v41, %v3628_v55  ;;  %v3660_v27 = vsel %vm732_vm1, %v3628_v55, %v3612_v41 }
 0x5cf   : > { %7395 = vmatmul.mubr.msk.bf16.gmra.mrb[4].mxu1 %vm391_vm0, %v10449_v35  ;;  %v10500_v46 = vpack.c.bf16 %v3643_v39, %v3746_v6  ;;  %v3748_v53 = vsel %vm698_vm2, %v3703_v62, %v3660_v27  ;;  %v3629_v36 = vrot.slane %v10353_v7, 7  ;;  %v3707_v9 = vrot.slane %v10351_v10, %v11550_v59 }
 0x5d0   : > { %7398 = vmatprep.mubr.msk.bf16.mxu1 %vm391_vm0, %v10460_v30  ;;  %v10509_v3 = vpack.c.bf16 %v3644_v21, %v3748_v53  ;;  %7427 = vmatpush3.bf16.msra.mxu1 %v8358_v1  ;;  %v3614_v48 = vrot.slane %v10355_v50, 7  ;;  %v3630_v54 = vrot.slane %v10357_v26, 7  ;;  %v3711_v22 = vrot.slane %v10355_v50, %v11550_v59  ;;  %v10524_v1 = vld [vmem:[%s11410_s7 + $0xc0] sm:$0xff]  }
 0x5d1   : > { %v3645_v18 = vsel %vm732_vm1, %v3613_v47, %v3629_v36  ;;  %v3661_v41 = vsel %vm732_vm1, %v3629_v36, %v3613_v47  ;;  %v3615_v55 = vrot.slane %v10359_v0, 7  ;;  %v3631_v62 = vrot.slane %v10361_v57, 7  ;;  %7428 = vmatprep.subr.bf16.mxu1 %v8359_v15 }
 0x5d2   : > { %v3750_v49 = vsel %vm698_vm2, %v3707_v9, %v3661_v41  ;;  %v3646_v39 = vsel %vm732_vm1, %v3614_v48, %v3630_v54  ;;  %v3662_v31 = vsel %vm732_vm1, %v3630_v54, %v3614_v48  ;;  %v3715_v47 = vrot.slane %v10359_v0, %v11550_v59 }
 0x5d3   : > { %v10534_v6 = vpack.c.bf16 %v3645_v18, %v3750_v49  ;;  %v3752_v21 = vsel %vm698_vm2, %v3711_v22, %v3662_v31  ;;  %v3647_v27 = vsel %vm732_vm1, %v3615_v55, %v3631_v62  ;;  %v3663_v53 = vsel %vm732_vm1, %v3631_v62, %v3615_v55 }
 0x5d4   : > { %v10542_v36 = vpack.c.bf16 %v3646_v39, %v3752_v21  ;;  %v3754_v9 = vsel %vm698_vm2, %v3715_v47, %v3663_v53  ;;  %v3616_v48 = vrot.slane %v10363_v51, 7  ;;  %v3632_v54 = vrot.slane %v10365_v2, 7  ;;  %7429 = vmatpush3.bf16.msra.mxu1 %v8359_v15 }
 0x5d5   : > { %v10548_v18 = vpack.c.bf16 %v3647_v27, %v3754_v9  ;;  %v3719_v22 = vrot.slane %v10363_v51, %v11550_v59  ;;  %v3617_v41 = vrot.slane %v10367_v17, 7  ;;  %v3633_v49 = vrot.slane %v10369_v33, 7  ;;  %7462 = vmatprep.subr.bf16.mxu1 %v10524_v1 }
 0x5d6   : > { %v3648_v55 = vsel %vm732_vm1, %v3616_v48, %v3632_v54  ;;  %v3664_v62 = vsel %vm732_vm1, %v3632_v54, %v3616_v48  ;;  %v3723_v15 = vrot.slane %v10367_v17, %v11550_v59  ;;  %v3618_v39 = vrot.slane %v10371_v14, 7 }
 0x5d7   : > { %7399 = vmatmul.mubr.msk.bf16.gmra.mrb[8].mxu1 %vm391_vm0, %v10468_v24  ;;  %v3756_v31 = vsel %vm698_vm2, %v3719_v22, %v3664_v62  ;;  %v3649_v47 = vsel %vm732_vm1, %v3617_v41, %v3633_v49  ;;  %v3665_v21 = vsel %vm732_vm1, %v3633_v49, %v3617_v41  ;;  %v3634_v27 = vrot.slane %v10373_v44, 7 }
 0x5d8   : > { %7402 = vmatprep.mubr.msk.bf16.mxu1 %vm391_vm0, %v10490_v19  ;;  %v10573_v53 = vpack.c.bf16 %v3648_v55, %v3756_v31  ;;  %v3758_v9 = vsel %vm698_vm2, %v3723_v15, %v3665_v21  ;;  %v3727_v48 = vrot.slane %v10371_v14, %v11550_v59  ;;  %v3619_v54 = vrot.slane %v10375_v60, 7 }
 0x5d9   : > { %v10580_v22 = vpack.c.bf16 %v3649_v47, %v3758_v9  ;;  %v3650_v41 = vsel %vm732_vm1, %v3618_v39, %v3634_v27  ;;  %v3666_v49 = vsel %vm732_vm1, %v3634_v27, %v3618_v39  ;;  %v3635_v62 = vrot.slane %v10377_v29, 7 }
 0x5da   : > { %v3760_v55 = vsel %vm698_vm2, %v3727_v48, %v3666_v49  ;;  %v3731_v15 = vrot.slane %v10375_v60, %v11550_v59  ;;  %v10593_v31 = vpack.c.bf16 %v10317_v28, %v10315_v43  ;;  %v10597_v47 = vpack.c.bf16 %v10321_v8, %v10319_v13 }
 0x5db   : > { %v10599_v21 = vpack.c.bf16 %v3650_v41, %v3760_v55  ;;  %v3651_v39 = vsel %vm732_vm1, %v3619_v54, %v3635_v62  ;;  %v3667_v27 = vsel %vm732_vm1, %v3635_v62, %v3619_v54  ;;  %v10607_v9 = vpack.c.bf16 %v10325_v45, %v10323_v61 }
 0x5dc   : > { %11551 = vst [vmem:[#allocation18_spill] sm:$0xff] %v10593_v31  ;;  %11552 = vst [vmem:[#allocation19_spill] sm:$0xff] %v10597_v47  ;;  %v3762_v59 = vsel %vm698_vm2, %v3731_v15, %v3667_v27  ;;  %v10613_v48 = vpack.c.bf16 %v10329_v42, %v10327_v52  ;;  %v10617_v41 = vpack.c.bf16 %v10333_v37, %v10331_v38 }
 0x5dd   : > { %11553 = vst [vmem:[#allocation20_spill] sm:$0xff] %v10607_v9  ;;  %v10621_v49 = vpack.c.bf16 %v10337_v34, %v10335_v32  ;;  %v10623_v54 = vpack.c.bf16 %v3651_v39, %v3762_v59  ;;  %v10627_v62 = vpack.c.bf16 %v10341_v40, %v10339_v16  ;;  %v10631_v55 = vpack.c.bf16 %v10345_v58, %v10343_v11 }
 0x5de   : > { %11554 = vst [vmem:[#allocation21_spill] sm:$0xff] %v10613_v48  ;;  %11555 = vst [vmem:[#allocation22_spill] sm:$0xff] %v10617_v41  ;;  %v10635_v15 = vpack.c.bf16 %v10349_v4, %v10347_v25  ;;  %v10639_v27 = vpack.c.bf16 %v10353_v7, %v10351_v10  ;;  %v10643_v39 = vpack.c.bf16 %v10357_v26, %v10355_v50  ;;  %v3766_v41 = vrot.slane %v10323_v61, 1 }
 0x5df   : > { %11556 = vst [vmem:[#allocation24_spill] sm:$0xff] %v10621_v49  ;;  %11557 = vst [vmem:[#allocation25_spill] sm:$0xff] %v10627_v62  ;;  %v10647_v59 = vpack.c.bf16 %v10361_v57, %v10359_v0  ;;  %v10651_v62 = vpack.c.bf16 %v10365_v2, %v10363_v51  ;;  %7403 = vmatmul.mubr.msk.bf16.gmra.mrb[12].mxu1 %vm391_vm0, %v10500_v46  ;;  %v3781_v49 = vrot.slane %v10321_v8, 1 }
 0x5e0   : > { %11558 = vst [vmem:[#allocation5_spill] sm:$0xff] %v10631_v55  ;;  %11559 = vst [vmem:[#allocation6_spill] sm:$0xff] %v10635_v15  ;;  %v10657_v15 = vpack.c.bf16 %v10369_v33, %v10367_v17  ;;  %7406 = vmatprep.mubr.msk.bf16.mxu1 %vm391_vm0, %v10509_v3  ;;  %v3831_v55 = vrot.slane %v10317_v28, %v8956_v12 }
 0x5e1   : > { %11560 = vst [vmem:[#allocation7_spill] sm:$0xff] %v10639_v27  ;;  %11561 = vst [vmem:[#allocation8_spill] sm:$0xff] %v10643_v39  ;;  %v10661_v27 = vpack.c.bf16 %v10373_v44, %v10371_v14  ;;  %v10665_v39 = vpack.c.bf16 %v10377_v29, %v10375_v60 }
 0x5e2   : > { %11562 = vst [vmem:[#allocation9_spill] sm:$0xff] %v10647_v59  ;;  %11563 = vst [vmem:[#allocation10_spill] sm:$0xff] %v10651_v62  ;;  %v3764_v59 = vrot.slane %v10315_v43, 1  ;;  %v3780_v62 = vrot.slane %v10317_v28, 1  ;;  %v3839_v43 = vrot.slane %v10325_v45, %v8956_v12 }
 0x5e3   : > { %11564 = vst [vmem:[#allocation11_spill] sm:$0xff] %v10657_v15  ;;  %11565 = vst [vmem:[#allocation12_spill] sm:$0xff] %v10661_v27  ;;  %v3765_v15 = vrot.slane %v10319_v13, 1  ;;  %v3835_v27 = vrot.slane %v10321_v8, %v8956_v12 }
 0x5e4   : > { %11566 = vst [vmem:[#allocation13_spill] sm:$0xff] %v10665_v39  ;;  %v3782_v39 = vrot.slane %v10325_v45, 1  ;;  %v3796_v48 = vsel %vm899_vm3, %v3764_v59, %v3780_v62  ;;  %v3812_v28 = vsel %vm899_vm3, %v3780_v62, %v3764_v59 }
 0x5e5   : > { %v3797_v13 = vsel %vm899_vm3, %v3765_v15, %v3781_v49  ;;  %v3813_v9 = vsel %vm899_vm3, %v3781_v49, %v3765_v15  ;;  %v3893_v8 = vsel %vm866_vm4, %v3831_v55, %v3812_v28  ;;  %v3767_v49 = vrot.slane %v10327_v52, 1 }
 0x5e6   : > { %v3895_v61 = vsel %vm866_vm4, %v3835_v27, %v3813_v9  ;;  %v3798_v45 = vsel %vm899_vm3, %v3766_v41, %v3782_v39  ;;  %v3814_v47 = vsel %vm899_vm3, %v3782_v39, %v3766_v41  ;;  %v10697_v31 = vpack.c.bf16 %v3893_v8, %v3796_v48 }
 0x5e7   : > { %v10699_v62 = vpack.c.bf16 %v3895_v61, %v3797_v13  ;;  %v3897_v59 = vsel %vm866_vm4, %v3839_v43, %v3814_v47  ;;  %v3783_v55 = vrot.slane %v10329_v42, 1  ;;  %v3843_v9 = vrot.slane %v10329_v42, %v8956_v12  ;;  %7407 = vmatmul.mubr.msk.bf16.gmra.mrb[16].mxu1 %vm391_vm0, %v10534_v6 }
 0x5e8   : > { %v10704_v15 = vpack.c.bf16 %v3897_v59, %v3798_v45  ;;  %v3768_v27 = vrot.slane %v10331_v38, 1  ;;  %v3784_v41 = vrot.slane %v10333_v37, 1  ;;  %v3847_v48 = vrot.slane %v10333_v37, %v8956_v12  ;;  %7410 = vmatprep.mubr.msk.bf16.mxu1 %vm391_vm0, %v10542_v36 }
 0x5e9   : > { %v3769_v39 = vrot.slane %v10335_v32, 1  ;;  %v3785_v47 = vrot.slane %v10337_v34, 1  ;;  %v3799_v52 = vsel %vm899_vm3, %v3767_v49, %v3783_v55  ;;  %v3815_v42 = vsel %vm899_vm3, %v3783_v55, %v3767_v49 }
 0x5ea   : > { %v3851_v38 = vrot.slane %v10337_v34, %v8956_v12  ;;  %v3770_v43 = vrot.slane %v10339_v16, 1  ;;  %v3899_v37 = vsel %vm866_vm4, %v3843_v9, %v3815_v42  ;;  %v3800_v32 = vsel %vm899_vm3, %v3768_v27, %v3784_v41 }
 0x5eb   : > { %v3816_v28 = vsel %vm899_vm3, %v3784_v41, %v3768_v27  ;;  %v3801_v13 = vsel %vm899_vm3, %v3769_v39, %v3785_v47  ;;  %v10734_v8 = vpack.c.bf16 %v3899_v37, %v3799_v52  ;;  %v3817_v16 = vsel %vm899_vm3, %v3785_v47, %v3769_v39 }
 0x5ec   : > { %v3901_v34 = vsel %vm866_vm4, %v3847_v48, %v3816_v28  ;;  %v3786_v61 = vrot.slane %v10341_v40, 1  ;;  %v3903_v59 = vsel %vm866_vm4, %v3851_v38, %v3817_v16  ;;  %v3855_v49 = vrot.slane %v10341_v40, %v8956_v12 }
 0x5ed   : > { %v10741_v45 = vpack.c.bf16 %v3901_v34, %v3800_v32  ;;  %v3771_v55 = vrot.slane %v10343_v11, 1  ;;  %v10748_v9 = vpack.c.bf16 %v3903_v59, %v3801_v13  ;;  %v3787_v48 = vrot.slane %v10345_v58, 1 }
 0x5ee   : > { %v3802_v27 = vsel %vm899_vm3, %v3770_v43, %v3786_v61  ;;  %v3818_v41 = vsel %vm899_vm3, %v3786_v61, %v3770_v43  ;;  %v3859_v47 = vrot.slane %v10345_v58, %v8956_v12  ;;  %v3772_v40 = vrot.slane %v10347_v25, 1 }
 0x5ef   : > { %v3905_v39 = vsel %vm866_vm4, %v3855_v49, %v3818_v41  ;;  %v3788_v11 = vrot.slane %v10349_v4, 1  ;;  %v3803_v42 = vsel %vm899_vm3, %v3771_v55, %v3787_v48  ;;  %v3819_v38 = vsel %vm899_vm3, %v3787_v48, %v3771_v55  ;;  %7411 = vmatmul.mubr.msk.bf16.gmra.mrb[20].mxu1 %vm391_vm0, %v10548_v18 }
 0x5f0   : > { %v10761_v52 = vpack.c.bf16 %v3905_v39, %v3802_v27  ;;  %v3863_v43 = vrot.slane %v10349_v4, %v8956_v12  ;;  %v3907_v37 = vsel %vm866_vm4, %v3859_v47, %v3819_v38  ;;  %v3773_v32 = vrot.slane %v10351_v10, 1  ;;  %7414 = vmatprep.mubr.msk.bf16.mxu1 %vm391_vm0, %v10573_v53 }
 0x5f1   : > { %v3804_v58 = vsel %vm899_vm3, %v3772_v40, %v3788_v11  ;;  %v3820_v25 = vsel %vm899_vm3, %v3788_v11, %v3772_v40  ;;  %v10778_v28 = vpack.c.bf16 %v3907_v37, %v3803_v42  ;;  %v3789_v4 = vrot.slane %v10353_v7, 1 }
 0x5f2   : > { %v3909_v13 = vsel %vm866_vm4, %v3863_v43, %v3820_v25  ;;  %v3867_v34 = vrot.slane %v10353_v7, %v8956_v12  ;;  %v3774_v10 = vrot.slane %v10355_v50, 1  ;;  %v3790_v61 = vrot.slane %v10357_v26, 1 }
 0x5f3   : > { %v10787_v16 = vpack.c.bf16 %v3909_v13, %v3804_v58  ;;  %v3871_v59 = vrot.slane %v10357_v26, %v8956_v12  ;;  %v3805_v49 = vsel %vm899_vm3, %v3773_v32, %v3789_v4  ;;  %v3821_v55 = vsel %vm899_vm3, %v3789_v4, %v3773_v32 }
 0x5f4   : > { %v3775_v7 = vrot.slane %v10359_v0, 1  ;;  %v3791_v27 = vrot.slane %v10361_v57, 1  ;;  %v3911_v41 = vsel %vm866_vm4, %v3867_v34, %v3821_v55  ;;  %v3806_v50 = vsel %vm899_vm3, %v3774_v10, %v3790_v61 }
 0x5f5   : > { %v3822_v48 = vsel %vm899_vm3, %v3790_v61, %v3774_v10  ;;  %v3875_v26 = vrot.slane %v10361_v57, %v8956_v12  ;;  %v10807_v39 = vpack.c.bf16 %v3911_v41, %v3805_v49  ;;  %v3776_v38 = vrot.slane %v10363_v51, 1 }
 0x5f6   : > { %v3913_v47 = vsel %vm866_vm4, %v3871_v59, %v3822_v48  ;;  %v3807_v0 = vsel %vm899_vm3, %v3775_v7, %v3791_v27  ;;  %v3823_v40 = vsel %vm899_vm3, %v3791_v27, %v3775_v7  ;;  %v3792_v57 = vrot.slane %v10365_v2, 1 }
 0x5f7   : > { %v10815_v11 = vpack.c.bf16 %v3913_v47, %v3806_v50  ;;  %v3915_v42 = vsel %vm866_vm4, %v3875_v26, %v3823_v40  ;;  %v3879_v37 = vrot.slane %v10365_v2, %v8956_v12  ;;  %v3777_v58 = vrot.slane %v10367_v17, 1  ;;  %7415 = vmatmul.mubr.msk.bf16.gmra.mrb[24].mxu1 %vm391_vm0, %v10580_v22  ;;  %v11577_v40 = vld [vmem:[#allocation8_spill] sm:$0xff] }
 0x5f8   : > { %v10821_v43 = vpack.c.bf16 %v3915_v42, %v3807_v0  ;;  %v3793_v25 = vrot.slane %v10369_v33, 1  ;;  %v3808_v32 = vsel %vm899_vm3, %v3776_v38, %v3792_v57  ;;  %v3824_v13 = vsel %vm899_vm3, %v3792_v57, %v3776_v38  ;;  %7418 = vmatprep.mubr.msk.bf16.mxu1 %vm391_vm0, %v10599_v21  ;;  %v11576_v0 = vld [vmem:[#allocation7_spill] sm:$0xff]  ;;  %v11578_v42 = vld [vmem:[#allocation9_spill] sm:$0xff]  ;;  %v11579_v38 = vld [vmem:[#allocation10_spill] sm:$0xff] }
 0x5f9   : > { %v3883_v51 = vrot.slane %v10369_v33, %v8956_v12  ;;  %v3778_v4 = vrot.slane %v10371_v14, 1  ;;  %v3917_v2 = vsel %vm866_vm4, %v3879_v37, %v3824_v13  ;;  %v3794_v10 = vrot.slane %v10373_v44, 1  ;;  %v11580_v57 = vld [vmem:[#allocation11_spill] sm:$0xff]  ;;  %v11581_v37 = vld [vmem:[#allocation12_spill] sm:$0xff]  ;;  %v8376_v13 = vld [vmem:[%s11410_s7 + $0x40] sm:$0xff]  }
 0x5fa   : > { %v3809_v17 = vsel %vm899_vm3, %v3777_v58, %v3793_v25  ;;  %v3825_v34 = vsel %vm899_vm3, %v3793_v25, %v3777_v58  ;;  %v10845_v33 = vpack.c.bf16 %v3917_v2, %v3808_v32  ;;  %v3887_v61 = vrot.slane %v10373_v44, %v8956_v12  ;;  %v8373_v58 = vld [vmem:[%s11410_s7 + $0xe8] sm:$0xff]   ;;  %v8374_v25 = vld [vmem:[%s11410_s7 + $0xf0] sm:$0xff]   ;;  %v8375_v32 = vld [vmem:[%s11410_s7 + $0xf8] sm:$0xff]  }
 0x5fb   : > { %v3919_v14 = vsel %vm866_vm4, %v3883_v51, %v3825_v34  ;;  %v3779_v59 = vrot.slane %v10375_v60, 1  ;;  %v3810_v55 = vsel %vm899_vm3, %v3778_v4, %v3794_v10  ;;  %v3826_v7 = vsel %vm899_vm3, %v3794_v10, %v3778_v4  ;;  %v11582_v51 = vld [vmem:[#allocation13_spill] sm:$0xff]  ;;  %v8377_v4 = vld [vmem:[%s11410_s7 + $0x48] sm:$0xff]   ;;  %v8378_v2 = vld [vmem:[%s11410_s7 + $0x50] sm:$0xff]  }
 0x5fc   : > { %v10852_v49 = vpack.c.bf16 %v3919_v14, %v3809_v17  ;;  %v3795_v27 = vrot.slane %v10377_v29, 1  ;;  %v3921_v41 = vsel %vm866_vm4, %v3887_v61, %v3826_v7  ;;  %v3891_v50 = vrot.slane %v10377_v29, %v8956_v12  ;;  %v8361_v12 = vld [vmem:[%s11410_s7 + $0xc8] sm:$0xff]   ;;  %v8364_v29 = vld [vmem:[%s11410_s7 + $0x20] sm:$0xff]   ;;  %v8379_v17 = vld [vmem:[%s11410_s7 + $0x58] sm:$0xff]  }
 0x5fd   : > { %v10863_v48 = vpack.c.bf16 %v3921_v41, %v3810_v55  ;;  %v8380_v34 = vld [vmem:[%s11410_s7 + $0xa0] sm:$0xff]   ;;  %v8381_v10 = vld [vmem:[%s11410_s7 + $0xa8] sm:$0xff]   ;;  %v8382_v14 = vld [vmem:[%s11410_s7 + $0xb0] sm:$0xff]  }
 0x5fe   : > { %v3811_v44 = vsel %vm899_vm3, %v3779_v59, %v3795_v27  ;;  %v3827_v60 = vsel %vm899_vm3, %v3795_v27, %v3779_v59  ;;  %v8383_v61 = vld [vmem:[%s11410_s7 + $0xb8] sm:$0xff]   ;;  %v8384_v59 = vld [vmem:[%s11410_s7 + $0x100] sm:$0xff]   ;;  %v8385_v55 = vld [vmem:[%s11410_s7 + $0x108] sm:$0xff]  }
 0x5ff   : > { %v3923_v26 = vsel %vm866_vm4, %v3891_v50, %v3827_v60  ;;  %7419 = vmatmul.mubr.msk.bf16.gmra.mrb[28].mxu1 %vm391_vm0, %v10623_v54  ;;  %v8386_v7 = vld [vmem:[%s11410_s7 + $0x110] sm:$0xff]   ;;  %v8394_v27 = vld [vmem:[%s8602_s29 + $0x18] sm:$0xff]  ;;  %v8395_v50 = vld [vmem:[%s8602_s29 + $0x8] sm:$0xff] }
 0x600   : > { %v10871_v47 = vpack.c.bf16 %v3923_v26, %v3811_v44  ;;  %7430 = vmatprep.mubr.msk.bf16.mxu1 %vm391_vm0, %v10407_v23 }
 0x607   : > { %7431 = vmatmul.mubr.msk.bf16.vlgmr.msra.gmra.mrb[0].mxu1 %vm391_vm0, %v10407_v23  ;;  %v8365_v23 = vld [vmem:[%s11410_s7 + $0x28] sm:$0xff]  }
 0x608   : > { %7463 = vmatpush3.bf16.msra.mxu1 %v10524_v1  ;;  %7434 = vmatprep.mubr.msk.bf16.mxu1 %vm391_vm0, %v10409_v20  ;;  %v8366_v1 = vld [vmem:[%s11410_s7 + $0x30] sm:$0xff]  }
 0x609   : > { %7464 = vmatprep.subr.bf16.mxu1 %v8361_v12 }
 0x60c   : > { %7465 = vmatpush3.bf16.msra.mxu1 %v8361_v12 }
 0x60d   : > { %7466 = vmatprep.subr.bf16.mxu1 %v8362_v56 }
 0x60f   : > { %7435 = vmatmul.mubr.msk.bf16.gmra.mrb[4].mxu1 %vm391_vm0, %v10414_v5 }
 0x610   : > { %7438 = vmatprep.mubr.msk.bf16.mxu1 %vm391_vm0, %v10449_v35  ;;  %7467 = vmatpush3.bf16.msra.mxu1 %v8362_v56  ;;  %v8396_v56 = vld [vmem:[%s8602_s29 + $0x30] sm:$0xff] }
 0x611   : > { %7468 = vmatprep.subr.bf16.mxu1 %v8363_v63 }
 0x614   : > { %7469 = vmatpush3.bf16.msra.mxu1 %v8363_v63 }
 0x615   : > { %7502 = vmatprep.subr.bf16.mxu1 %v8364_v29 }
 0x617   : > { %7439 = vmatmul.mubr.msk.bf16.gmra.mrb[8].mxu1 %vm391_vm0, %v10460_v30 }
 0x618   : > { %7442 = vmatprep.mubr.msk.bf16.mxu1 %vm391_vm0, %v10468_v24 }
 0x61f   : > { %7443 = vmatmul.mubr.msk.bf16.gmra.mrb[12].mxu1 %vm391_vm0, %v10490_v19 }
 0x620   : > { %7446 = vmatprep.mubr.msk.bf16.mxu1 %vm391_vm0, %v10500_v46 }
 0x627   : > { %7447 = vmatmul.mubr.msk.bf16.gmra.mrb[16].mxu1 %vm391_vm0, %v10509_v3 }
 0x628   : > { %7450 = vmatprep.mubr.msk.bf16.mxu1 %vm391_vm0, %v10534_v6 }
 0x62f   : > { %7451 = vmatmul.mubr.msk.bf16.gmra.mrb[20].mxu1 %vm391_vm0, %v10542_v36 }
 0x630   : > { %7454 = vmatprep.mubr.msk.bf16.mxu1 %vm391_vm0, %v10548_v18 }
 0x637   : > { %7455 = vmatmul.mubr.msk.bf16.gmra.mrb[24].mxu1 %vm391_vm0, %v10573_v53 }
 0x638   : > { %7458 = vmatprep.mubr.msk.bf16.mxu1 %vm391_vm0, %v10580_v22 }
 0x63f   : > { %7459 = vmatmul.mubr.msk.bf16.gmra.mrb[28].mxu1 %vm391_vm0, %v10599_v21 }
 0x640   : > { %7470 = vmatprep.mubr.msk.bf16.mxu1 %vm391_vm0, %v10409_v20  ;;  %v8367_v20 = vld [vmem:[%s11410_s7 + $0x38] sm:$0xff]  }
 0x647   : > { %7471 = vmatmul.mubr.msk.bf16.vlgmr.msra.gmra.mrb[0].mxu1 %vm391_vm0, %v10414_v5  ;;  %v8368_v5 = vld [vmem:[%s11410_s7 + $0x80] sm:$0xff]  }
 0x648   : > { %7503 = vmatpush3.bf16.msra.mxu1 %v8364_v29  ;;  %7474 = vmatprep.mubr.msk.bf16.mxu1 %vm391_vm0, %v10449_v35  ;;  %v11567_v35 = vld [vmem:[#allocation18_spill] sm:$0xff] }
 0x649   : > { %7504 = vmatprep.subr.bf16.mxu1 %v8365_v23 }
 0x64c   : > { %7505 = vmatpush3.bf16.msra.mxu1 %v8365_v23 }
 0x64d   : > { %7506 = vmatprep.subr.bf16.mxu1 %v8366_v1 }
 0x64f   : > { %7475 = vmatmul.mubr.msk.bf16.gmra.mrb[4].mxu1 %vm391_vm0, %v10460_v30  ;;  %v8369_v30 = vld [vmem:[%s11410_s7 + $0x88] sm:$0xff]  }
 0x650   : > { %7478 = vmatprep.mubr.msk.bf16.mxu1 %vm391_vm0, %v10468_v24  ;;  %7507 = vmatpush3.bf16.msra.mxu1 %v8366_v1  ;;  %v11568_v24 = vld [vmem:[#allocation19_spill] sm:$0xff]  ;;  %v8397_v1 = vld [vmem:[%s8602_s29 + $0x20] sm:$0xff] }
 0x651   : > { %7508 = vmatprep.subr.bf16.mxu1 %v8367_v20 }
 0x654   : > { %7509 = vmatpush3.bf16.msra.mxu1 %v8367_v20 }
 0x655   : > { %7542 = vmatprep.subr.bf16.mxu1 %v8368_v5 }
 0x657   : > { %7479 = vmatmul.mubr.msk.bf16.gmra.mrb[8].mxu1 %vm391_vm0, %v10490_v19  ;;  %v8370_v19 = vld [vmem:[%s11410_s7 + $0x90] sm:$0xff]  }
 0x658   : > { %7482 = vmatprep.mubr.msk.bf16.mxu1 %vm391_vm0, %v10500_v46  ;;  %v8371_v46 = vld [vmem:[%s11410_s7 + $0x98] sm:$0xff]  }
 0x65f   : > { %7483 = vmatmul.mubr.msk.bf16.gmra.mrb[12].mxu1 %vm391_vm0, %v10509_v3  ;;  %v11569_v3 = vld [vmem:[#allocation20_spill] sm:$0xff] }
 0x660   : > { %7486 = vmatprep.mubr.msk.bf16.mxu1 %vm391_vm0, %v10534_v6  ;;  %v11570_v6 = vld [vmem:[#allocation21_spill] sm:$0xff] }
 0x667   : > { %7487 = vmatmul.mubr.msk.bf16.gmra.mrb[16].mxu1 %vm391_vm0, %v10542_v36  ;;  %v8372_v36 = vld [vmem:[%s11410_s7 + $0xe0] sm:$0xff]  }
 0x668   : > { %7490 = vmatprep.mubr.msk.bf16.mxu1 %vm391_vm0, %v10548_v18  ;;  %v11571_v18 = vld [vmem:[#allocation22_spill] sm:$0xff] }
 0x66f   : > { %7491 = vmatmul.mubr.msk.bf16.gmra.mrb[20].mxu1 %vm391_vm0, %v10573_v53  ;;  %v11572_v53 = vld [vmem:[#allocation24_spill] sm:$0xff] }
 0x670   : > { %7494 = vmatprep.mubr.msk.bf16.mxu1 %vm391_vm0, %v10580_v22  ;;  %v11573_v22 = vld [vmem:[#allocation25_spill] sm:$0xff] }
 0x677   : > { %7495 = vmatmul.mubr.msk.bf16.gmra.mrb[24].mxu1 %vm391_vm0, %v10599_v21  ;;  %v11574_v21 = vld [vmem:[#allocation5_spill] sm:$0xff] }
 0x678   : > { %7498 = vmatprep.mubr.msk.bf16.mxu1 %vm391_vm0, %v10623_v54 }
 0x67f   : > { %7499 = vmatmul.mubr.msk.bf16.gmra.mrb[28].mxu1 %vm391_vm0, %v10623_v54  ;;  %v11575_v54 = vld [vmem:[#allocation6_spill] sm:$0xff] }
 0x680   : > { %7510 = vmatprep.mubr.msk.bf16.mxu1 %vm391_vm0, %v11567_v35 }
 0x687   : > { %7511 = vmatmul.mubr.msk.bf16.vlgmr.msra.gmra.mrb[0].mxu1 %vm391_vm0, %v11567_v35 }
 0x688   : > { %7543 = vmatpush3.bf16.msra.mxu1 %v8368_v5  ;;  %7514 = vmatprep.mubr.msk.bf16.mxu1 %vm391_vm0, %v11568_v24 }
 0x689   : > { %7544 = vmatprep.subr.bf16.mxu1 %v8369_v30 }
 0x68c   : > { %7545 = vmatpush3.bf16.msra.mxu1 %v8369_v30 }
 0x68d   : > { %7546 = vmatprep.subr.bf16.mxu1 %v8370_v19 }
 0x68f   : > { %7515 = vmatmul.mubr.msk.bf16.gmra.mrb[4].mxu1 %vm391_vm0, %v11569_v3 }
 0x690   : > { %7518 = vmatprep.mubr.msk.bf16.mxu1 %vm391_vm0, %v11570_v6  ;;  %7547 = vmatpush3.bf16.msra.mxu1 %v8370_v19 }
 0x691   : > { %7548 = vmatprep.subr.bf16.mxu1 %v8371_v46 }
 0x694   : > { %7549 = vmatpush3.bf16.msra.mxu1 %v8371_v46 }
 0x695   : > { %7582 = vmatprep.subr.bf16.mxu1 %v8372_v36 }
 0x697   : > { %7519 = vmatmul.mubr.msk.bf16.gmra.mrb[8].mxu1 %vm391_vm0, %v11571_v18 }
 0x698   : > { %7522 = vmatprep.mubr.msk.bf16.mxu1 %vm391_vm0, %v11572_v53 }
 0x69f   : > { %7523 = vmatmul.mubr.msk.bf16.gmra.mrb[12].mxu1 %vm391_vm0, %v11573_v22 }
 0x6a0   : > { %7526 = vmatprep.mubr.msk.bf16.mxu1 %vm391_vm0, %v11574_v21 }
 0x6a7   : > { %7527 = vmatmul.mubr.msk.bf16.gmra.mrb[16].mxu1 %vm391_vm0, %v11575_v54 }
 0x6a8   : > { %7530 = vmatprep.mubr.msk.bf16.mxu1 %vm391_vm0, %v11576_v0 }
 0x6af   : > { %7531 = vmatmul.mubr.msk.bf16.gmra.mrb[20].mxu1 %vm391_vm0, %v11577_v40 }
 0x6b0   : > { %7534 = vmatprep.mubr.msk.bf16.mxu1 %vm391_vm0, %v11578_v42 }
 0x6b7   : > { %7535 = vmatmul.mubr.msk.bf16.gmra.mrb[24].mxu1 %vm391_vm0, %v11579_v38 }
 0x6b8   : > { %7538 = vmatprep.mubr.msk.bf16.mxu1 %vm391_vm0, %v11580_v57 }
 0x6bf   : > { %7539 = vmatmul.mubr.msk.bf16.gmra.mrb[28].mxu1 %vm391_vm0, %v11581_v37 }
 0x6c0   : > { %7550 = vmatprep.mubr.msk.bf16.mxu1 %vm391_vm0, %v11567_v35  ;;  %v8398_v35 = vld [vmem:[%s8602_s29 + $0x38] sm:$0xff] }
 0x6c7   : > { %7551 = vmatmul.mubr.msk.bf16.vlgmr.msra.gmra.mrb[0].mxu1 %vm391_vm0, %v11568_v24 }
 0x6c8   : > { %7583 = vmatpush3.bf16.msra.mxu1 %v8372_v36  ;;  %7554 = vmatprep.mubr.msk.bf16.mxu1 %vm391_vm0, %v11569_v3 }
 0x6c9   : > { %7584 = vmatprep.subr.bf16.mxu1 %v8373_v58 }
 0x6cc   : > { %7585 = vmatpush3.bf16.msra.mxu1 %v8373_v58 }
 0x6cd   : > { %7586 = vmatprep.subr.bf16.mxu1 %v8374_v25 }
 0x6cf   : > { %7555 = vmatmul.mubr.msk.bf16.gmra.mrb[4].mxu1 %vm391_vm0, %v11570_v6 }
 0x6d0   : > { %7558 = vmatprep.mubr.msk.bf16.mxu1 %vm391_vm0, %v11571_v18  ;;  %7587 = vmatpush3.bf16.msra.mxu1 %v8374_v25 }
 0x6d1   : > { %7588 = vmatprep.subr.bf16.mxu1 %v8375_v32 }
 0x6d4   : > { %7589 = vmatpush3.bf16.msra.mxu1 %v8375_v32 }
 0x6d5   : > { %7622 = vmatprep.subr.bf16.mxu1 %v8376_v13 }
 0x6d7   : > { %7559 = vmatmul.mubr.msk.bf16.gmra.mrb[8].mxu1 %vm391_vm0, %v11572_v53 }
 0x6d8   : > { %7562 = vmatprep.mubr.msk.bf16.mxu1 %vm391_vm0, %v11573_v22 }
 0x6df   : > { %7563 = vmatmul.mubr.msk.bf16.gmra.mrb[12].mxu1 %vm391_vm0, %v11574_v21 }
 0x6e0   : > { %7566 = vmatprep.mubr.msk.bf16.mxu1 %vm391_vm0, %v11575_v54 }
 0x6e7   : > { %7567 = vmatmul.mubr.msk.bf16.gmra.mrb[16].mxu1 %vm391_vm0, %v11576_v0 }
 0x6e8   : > { %7570 = vmatprep.mubr.msk.bf16.mxu1 %vm391_vm0, %v11577_v40 }
 0x6ef   : > { %7571 = vmatmul.mubr.msk.bf16.gmra.mrb[20].mxu1 %vm391_vm0, %v11578_v42 }
 0x6f0   : > { %7574 = vmatprep.mubr.msk.bf16.mxu1 %vm391_vm0, %v11579_v38 }
 0x6f7   : > { %7575 = vmatmul.mubr.msk.bf16.gmra.mrb[24].mxu1 %vm391_vm0, %v11580_v57 }
 0x6f8   : > { %7578 = vmatprep.mubr.msk.bf16.mxu1 %vm391_vm0, %v11581_v37 }
 0x6ff   : > { %7579 = vmatmul.mubr.msk.bf16.gmra.mrb[28].mxu1 %vm391_vm0, %v11582_v51 }
 0x700   : > { %7590 = vmatprep.mubr.msk.bf16.mxu1 %vm391_vm0, %v11568_v24  ;;  %v8399_v24 = vld [vmem:[%s8602_s29 + $0x28] sm:$0xff] }
 0x707   : > { %7591 = vmatmul.mubr.msk.bf16.vlgmr.msra.gmra.mrb[0].mxu1 %vm391_vm0, %v11569_v3 }
 0x708   : > { %7623 = vmatpush3.bf16.msra.mxu1 %v8376_v13  ;;  %7594 = vmatprep.mubr.msk.bf16.mxu1 %vm391_vm0, %v11570_v6 }
 0x709   : > { %7624 = vmatprep.subr.bf16.mxu1 %v8377_v4 }
 0x70c   : > { %7625 = vmatpush3.bf16.msra.mxu1 %v8377_v4 }
 0x70d   : > { %7626 = vmatprep.subr.bf16.mxu1 %v8378_v2 }
 0x70f   : > { %7595 = vmatmul.mubr.msk.bf16.gmra.mrb[4].mxu1 %vm391_vm0, %v11571_v18 }
 0x710   : > { %7598 = vmatprep.mubr.msk.bf16.mxu1 %vm391_vm0, %v11572_v53  ;;  %7627 = vmatpush3.bf16.msra.mxu1 %v8378_v2  ;;  %v8400_v53 = vld [vmem:[%s8602_s29 + $0x50] sm:$0xff] }
 0x711   : > { %7628 = vmatprep.subr.bf16.mxu1 %v8379_v17  ;;  %v8404_v2 = vld [vmem:[%s8602_s29 + $0x70] sm:$0xff] }
 0x714   : > { %7629 = vmatpush3.bf16.msra.mxu1 %v8379_v17 }
 0x715   : > { %7662 = vmatprep.subr.bf16.mxu1 %v8380_v34 }
 0x717   : > { %7599 = vmatmul.mubr.msk.bf16.gmra.mrb[8].mxu1 %vm391_vm0, %v11573_v22 }
 0x718   : > { %7602 = vmatprep.mubr.msk.bf16.mxu1 %vm391_vm0, %v11574_v21 }
 0x71f   : > { %7603 = vmatmul.mubr.msk.bf16.gmra.mrb[12].mxu1 %vm391_vm0, %v11575_v54 }
 0x720   : > { %7606 = vmatprep.mubr.msk.bf16.mxu1 %vm391_vm0, %v11576_v0  ;;  %v8401_v0 = vld [vmem:[%s8602_s29 + $0x40] sm:$0xff] }
 0x727   : > { %7607 = vmatmul.mubr.msk.bf16.gmra.mrb[16].mxu1 %vm391_vm0, %v11577_v40 }
 0x728   : > { %7610 = vmatprep.mubr.msk.bf16.mxu1 %vm391_vm0, %v11578_v42 }
 0x72f   : > { %7611 = vmatmul.mubr.msk.bf16.gmra.mrb[20].mxu1 %vm391_vm0, %v11579_v38  ;;  %v8402_v38 = vld [vmem:[%s8602_s29 + $0x58] sm:$0xff] }
 0x730   : > { %7614 = vmatprep.mubr.msk.bf16.mxu1 %vm391_vm0, %v11580_v57 }
 0x737   : > { %7615 = vmatmul.mubr.msk.bf16.gmra.mrb[24].mxu1 %vm391_vm0, %v11581_v37  ;;  %v8403_v37 = vld [vmem:[%s8602_s29 + $0x48] sm:$0xff] }
 0x738   : > { %7618 = vmatprep.mubr.msk.bf16.mxu1 %vm391_vm0, %v11582_v51 }
 0x73f   : > { %7619 = vmatmul.mubr.msk.bf16.gmra.mrb[28].mxu1 %vm391_vm0, %v11582_v51 }
 0x740   : > { %7630 = vmatprep.mubr.msk.bf16.mxu1 %vm391_vm0, %v10697_v31 }
 0x747   : > { %7631 = vmatmul.mubr.msk.bf16.vlgmr.msra.gmra.mrb[0].mxu1 %vm391_vm0, %v10697_v31 }
 0x748   : > { %7663 = vmatpush3.bf16.msra.mxu1 %v8380_v34  ;;  %7634 = vmatprep.mubr.msk.bf16.mxu1 %vm391_vm0, %v10699_v62 }
 0x749   : > { %7664 = vmatprep.subr.bf16.mxu1 %v8381_v10 }
 0x74c   : > { %7665 = vmatpush3.bf16.msra.mxu1 %v8381_v10 }
 0x74d   : > { %7666 = vmatprep.subr.bf16.mxu1 %v8382_v14 }
 0x74f   : > { %7635 = vmatmul.mubr.msk.bf16.gmra.mrb[4].mxu1 %vm391_vm0, %v10704_v15 }
 0x750   : > { %7638 = vmatprep.mubr.msk.bf16.mxu1 %vm391_vm0, %v10734_v8  ;;  %7667 = vmatpush3.bf16.msra.mxu1 %v8382_v14  ;;  %v8405_v14 = vld [vmem:[%s8602_s29 + $0x60] sm:$0xff] }
 0x751   : > { %7668 = vmatprep.subr.bf16.mxu1 %v8383_v61 }
 0x754   : > { %7669 = vmatpush3.bf16.msra.mxu1 %v8383_v61 }
 0x755   : > { %7702 = vmatprep.subr.bf16.mxu1 %v8384_v59 }
 0x757   : > { %7639 = vmatmul.mubr.msk.bf16.gmra.mrb[8].mxu1 %vm391_vm0, %v10741_v45 }
 0x758   : > { %7642 = vmatprep.mubr.msk.bf16.mxu1 %vm391_vm0, %v10748_v9 }
 0x75f   : > { %7643 = vmatmul.mubr.msk.bf16.gmra.mrb[12].mxu1 %vm391_vm0, %v10761_v52 }
 0x760   : > { %7646 = vmatprep.mubr.msk.bf16.mxu1 %vm391_vm0, %v10778_v28 }
 0x767   : > { %7647 = vmatmul.mubr.msk.bf16.gmra.mrb[16].mxu1 %vm391_vm0, %v10787_v16 }
 0x768   : > { %7650 = vmatprep.mubr.msk.bf16.mxu1 %vm391_vm0, %v10807_v39 }
 0x76f   : > { %7651 = vmatmul.mubr.msk.bf16.gmra.mrb[20].mxu1 %vm391_vm0, %v10815_v11 }
 0x770   : > { %7654 = vmatprep.mubr.msk.bf16.mxu1 %vm391_vm0, %v10821_v43 }
 0x777   : > { %7655 = vmatmul.mubr.msk.bf16.gmra.mrb[24].mxu1 %vm391_vm0, %v10845_v33 }
 0x778   : > { %7658 = vmatprep.mubr.msk.bf16.mxu1 %vm391_vm0, %v10852_v49 }
 0x77f   : > { %7659 = vmatmul.mubr.msk.bf16.gmra.mrb[28].mxu1 %vm391_vm0, %v10863_v48 }
 0x780   : > { %7670 = vmatprep.mubr.msk.bf16.mxu1 %vm391_vm0, %v10697_v31  ;;  %v8387_v31 = vld [vmem:[%s11410_s7 + $0x118] sm:$0xff]  }
 0x787   : > { %7671 = vmatmul.mubr.msk.bf16.vlgmr.msra.gmra.mrb[0].mxu1 %vm391_vm0, %v10699_v62 }
 0x788   : > { %7703 = vmatpush3.bf16.msra.mxu1 %v8384_v59  ;;  %7674 = vmatprep.mubr.msk.bf16.mxu1 %vm391_vm0, %v10704_v15 }
 0x789   : > { %7704 = vmatprep.subr.bf16.mxu1 %v8385_v55 }
 0x78c   : > { %7705 = vmatpush3.bf16.msra.mxu1 %v8385_v55  ;;  %v8406_v55 = vld [vmem:[%s8602_s29 + $0x78] sm:$0xff] }
 0x78d   : > { %7706 = vmatprep.subr.bf16.mxu1 %v8386_v7 }
 0x78f   : > { %7675 = vmatmul.mubr.msk.bf16.gmra.mrb[4].mxu1 %vm391_vm0, %v10734_v8 }
 0x790   : > { %7678 = vmatprep.mubr.msk.bf16.mxu1 %vm391_vm0, %v10741_v45  ;;  %7707 = vmatpush3.bf16.msra.mxu1 %v8386_v7 }
 0x791   : > { %7708 = vmatprep.subr.bf16.mxu1 %v8387_v31 }
 0x794   : > { %7709 = vmatpush3.bf16.msra.mxu1 %v8387_v31  ;;  %v8407_v31 = vld [vmem:[%s8602_s29 + $0x68] sm:$0xff] }
 0x797   : > { %7679 = vmatmul.mubr.msk.bf16.gmra.mrb[8].mxu1 %vm391_vm0, %v10748_v9 }
 0x798   : > { %7682 = vmatprep.mubr.msk.bf16.mxu1 %vm391_vm0, %v10761_v52 }
 0x79f   : > { %7683 = vmatmul.mubr.msk.bf16.gmra.mrb[12].mxu1 %vm391_vm0, %v10778_v28 }
 0x7a0   : > { %7686 = vmatprep.mubr.msk.bf16.mxu1 %vm391_vm0, %v10787_v16 }
 0x7a7   : > { %7687 = vmatmul.mubr.msk.bf16.gmra.mrb[16].mxu1 %vm391_vm0, %v10807_v39 }
 0x7a8   : > { %7690 = vmatprep.mubr.msk.bf16.mxu1 %vm391_vm0, %v10815_v11 }
 0x7af   : > { %7691 = vmatmul.mubr.msk.bf16.gmra.mrb[20].mxu1 %vm391_vm0, %v10821_v43 }
 0x7b0   : > { %7694 = vmatprep.mubr.msk.bf16.mxu1 %vm391_vm0, %v10845_v33 }
 0x7b7   : > { %7695 = vmatmul.mubr.msk.bf16.gmra.mrb[24].mxu1 %vm391_vm0, %v10852_v49 }
 0x7b8   : > { %7698 = vmatprep.mubr.msk.bf16.mxu1 %vm391_vm0, %v10863_v48 }
 0x7bf   : > { %7699 = vmatmul.mubr.msk.bf16.gmra.mrb[28].mxu1 %vm391_vm0, %v10871_v47 }
 0x7c0   : > { %7710 = vmatprep.mubr.msk.bf16.mxu1 %vm391_vm0, %v10699_v62  ;;  %v11217_v62 = vld [vmem:[%s11411_s8] ss:$0 sm:$0xff] }
 0x7c7   : > { %7711 = vmatmul.mubr.msk.bf16.vlgmr.msra.gmra.mrb[0].mxu1 %vm391_vm0, %v10704_v15 }
 0x7c8   : > { %7714 = vmatprep.mubr.msk.bf16.mxu1 %vm391_vm0, %v10734_v8 }
 0x7cf   : > { %7715 = vmatmul.mubr.msk.bf16.gmra.mrb[4].mxu1 %vm391_vm0, %v10741_v45 }
 0x7d0   : > { %7718 = vmatprep.mubr.msk.bf16.mxu1 %vm391_vm0, %v10748_v9 }
 0x7d7   : > { %7719 = vmatmul.mubr.msk.bf16.gmra.mrb[8].mxu1 %vm391_vm0, %v10761_v52 }
 0x7d8   : > { %7722 = vmatprep.mubr.msk.bf16.mxu1 %vm391_vm0, %v10778_v28  ;;  %v8392_v28 = vld [vmem:[%s8602_s29 + $0x10] sm:$0xff] }
 0x7df   : > { %7723 = vmatmul.mubr.msk.bf16.gmra.mrb[12].mxu1 %vm391_vm0, %v10787_v16 }
 0x7e0   : > { %7726 = vmatprep.mubr.msk.bf16.mxu1 %vm391_vm0, %v10807_v39 }
 0x7e7   : > { %7727 = vmatmul.mubr.msk.bf16.gmra.mrb[16].mxu1 %vm391_vm0, %v10815_v11 }
 0x7e8   : > { %7730 = vmatprep.mubr.msk.bf16.mxu1 %vm391_vm0, %v10821_v43  ;;  %v8393_v43 = vld [vmem:[%s8602_s29] sm:$0xff] }
 0x7ef   : > { %7731 = vmatmul.mubr.msk.bf16.gmra.mrb[20].mxu1 %vm391_vm0, %v10845_v33 }
 0x7f0   : > { %7734 = vmatprep.mubr.msk.bf16.mxu1 %vm391_vm0, %v10852_v49 }
 0x7f7   : > { %7735 = vmatmul.mubr.msk.bf16.gmra.mrb[24].mxu1 %vm391_vm0, %v10863_v48 }
 0x7f8   : > { %7738 = vmatprep.mubr.msk.bf16.mxu1 %vm391_vm0, %v10871_v47 }
 0x7ff   : > { %7739 = vmatmul.mubr.msk.bf16.gmra.mrb[28].mxu1 %vm391_vm0, %v10871_v47 }
 0x89a   : > { %v7712_v15 = vpop.f32.mrb[0].mxu1 }
 0x89b   : > { %v6086_v8 = vadd.f32 %v7712_v15, %v11217_v62  ;;  %v5918_v45 = vpop.f32.mrb[1].mxu1 }
 0x89c   : > { %v6084_v9 = vadd.f32 %v11217_v62, %v5918_v45  ;;  %v7713_v52 = vpop.f32.mrb[2].mxu1 }
 0x89d   : > { %v6118_v16 = vadd.f32 %v8392_v28, %v6086_v8  ;;  %v6087_v39 = vadd.f32 %v7713_v52, %v11217_v62  ;;  %v5921_v11 = vpop.f32.mrb[3].mxu1 }
 0x89e   : > { %v6116_v33 = vadd.f32 %v8393_v43, %v6084_v9  ;;  %v6085_v49 = vadd.f32 %v11217_v62, %v5921_v11 }
 0x89f   : > { %6150 = vst.msk [vmem:[%s11227_s25 + $0x10] sm:$0xff] %vm391_vm0, %v6118_v16  ;;  %v6119_v41 = vadd.f32 %v8394_v27, %v6087_v39  ;;  %v8408_v16 = vld [vmem:[%s8602_s29 + $0x90] sm:$0xff] }
 0x8a0   : > { %6148 = vst.msk [vmem:[%s11227_s25] sm:$0xff] %vm391_vm0, %v6116_v33  ;;  %v6117_v48 = vadd.f32 %v8395_v50, %v6085_v49  ;;  %v8409_v33 = vld [vmem:[%s8602_s29 + $0x80] sm:$0xff] }
 0x8a1   : > { %6151 = vst.msk [vmem:[%s11227_s25 + $0x18] sm:$0xff] %vm391_vm0, %v6119_v41  ;;  %v8410_v41 = vld [vmem:[%s8602_s29 + $0x98] sm:$0xff] }
 0x8a2   : > { %6149 = vst.msk [vmem:[%s11227_s25 + $0x8] sm:$0xff] %vm391_vm0, %v6117_v48  ;;  %v7716_v44 = vpop.f32.mrb[4].mxu1  ;;  %v8411_v48 = vld [vmem:[%s8602_s29 + $0x88] sm:$0xff] }
 0x8a3   : > { %v6090_v60 = vadd.f32 %v7716_v44, %v11217_v62  ;;  %v5934_v26 = vpop.f32.mrb[5].mxu1 }
 0x8a4   : > { %v6088_v47 = vadd.f32 %v11217_v62, %v5934_v26  ;;  %v7717_v12 = vpop.f32.mrb[6].mxu1 }
 0x8a5   : > { %v6122_v63 = vadd.f32 %v8396_v56, %v6090_v60  ;;  %v6091_v29 = vadd.f32 %v7717_v12, %v11217_v62  ;;  %v5937_v23 = vpop.f32.mrb[7].mxu1 }
 0x8a6   : > { %v6120_v20 = vadd.f32 %v8397_v1, %v6088_v47  ;;  %v6089_v5 = vadd.f32 %v11217_v62, %v5937_v23 }
 0x8a7   : > { %6154 = vst.msk [vmem:[%s11227_s25 + $0x30] sm:$0xff] %vm391_vm0, %v6122_v63  ;;  %v6123_v30 = vadd.f32 %v8398_v35, %v6091_v29  ;;  %v8412_v63 = vld [vmem:[%s8602_s29 + $0xb0] sm:$0xff] }
 0x8a8   : > { %6152 = vst.msk [vmem:[%s11227_s25 + $0x20] sm:$0xff] %vm391_vm0, %v6120_v20  ;;  %v6121_v19 = vadd.f32 %v8399_v24, %v6089_v5  ;;  %v8413_v20 = vld [vmem:[%s8602_s29 + $0xa0] sm:$0xff] }
 0x8a9   : > { %6155 = vst.msk [vmem:[%s11227_s25 + $0x38] sm:$0xff] %vm391_vm0, %v6123_v30  ;;  %v8414_v30 = vld [vmem:[%s8602_s29 + $0xb8] sm:$0xff] }
 0x8aa   : > { %6153 = vst.msk [vmem:[%s11227_s25 + $0x28] sm:$0xff] %vm391_vm0, %v6121_v19  ;;  %v7720_v46 = vpop.f32.mrb[8].mxu1  ;;  %v8415_v19 = vld [vmem:[%s8602_s29 + $0xa8] sm:$0xff] }
 0x8ab   : > { %v6094_v3 = vadd.f32 %v7720_v46, %v11217_v62  ;;  %v5950_v6 = vpop.f32.mrb[9].mxu1 }
 0x8ac   : > { %v6092_v36 = vadd.f32 %v11217_v62, %v5950_v6  ;;  %v7721_v18 = vpop.f32.mrb[10].mxu1 }
 0x8ad   : > { %v6126_v22 = vadd.f32 %v8400_v53, %v6094_v3  ;;  %v6095_v21 = vadd.f32 %v7721_v18, %v11217_v62  ;;  %v5953_v54 = vpop.f32.mrb[11].mxu1 }
 0x8ae   : > { %v6124_v40 = vadd.f32 %v8401_v0, %v6092_v36  ;;  %v6093_v42 = vadd.f32 %v11217_v62, %v5953_v54 }
 0x8af   : > { %6158 = vst.msk [vmem:[%s11227_s25 + $0x50] sm:$0xff] %vm391_vm0, %v6126_v22  ;;  %v6127_v57 = vadd.f32 %v8402_v38, %v6095_v21  ;;  %v8416_v22 = vld [vmem:[%s8602_s29 + $0xd0] sm:$0xff] }
 0x8b0   : > { %6156 = vst.msk [vmem:[%s11227_s25 + $0x40] sm:$0xff] %vm391_vm0, %v6124_v40  ;;  %v6125_v58 = vadd.f32 %v8403_v37, %v6093_v42  ;;  %v8417_v40 = vld [vmem:[%s8602_s29 + $0xc0] sm:$0xff] }
 0x8b1   : > { %6159 = vst.msk [vmem:[%s11227_s25 + $0x58] sm:$0xff] %vm391_vm0, %v6127_v57  ;;  %v8418_v57 = vld [vmem:[%s8602_s29 + $0xd8] sm:$0xff] }
 0x8b2   : > { %6157 = vst.msk [vmem:[%s11227_s25 + $0x48] sm:$0xff] %vm391_vm0, %v6125_v58  ;;  %v7724_v25 = vpop.f32.mrb[12].mxu1  ;;  %v8419_v58 = vld [vmem:[%s8602_s29 + $0xc8] sm:$0xff] }
 0x8b3   : > { %v6098_v32 = vadd.f32 %v7724_v25, %v11217_v62  ;;  %v5966_v13 = vpop.f32.mrb[13].mxu1 }
 0x8b4   : > { %v6096_v51 = vadd.f32 %v11217_v62, %v5966_v13  ;;  %v7725_v4 = vpop.f32.mrb[14].mxu1 }
 0x8b5   : > { %v6130_v17 = vadd.f32 %v8404_v2, %v6098_v32  ;;  %v6099_v34 = vadd.f32 %v7725_v4, %v11217_v62  ;;  %v5969_v10 = vpop.f32.mrb[15].mxu1 }
 0x8b6   : > { %v6128_v61 = vadd.f32 %v8405_v14, %v6096_v51  ;;  %v6097_v59 = vadd.f32 %v11217_v62, %v5969_v10 }
 0x8b7   : > { %6162 = vst.msk [vmem:[%s11227_s25 + $0x70] sm:$0xff] %vm391_vm0, %v6130_v17  ;;  %v6131_v7 = vadd.f32 %v8406_v55, %v6099_v34  ;;  %v8420_v17 = vld [vmem:[%s8602_s29 + $0xf0] sm:$0xff] }
 0x8b8   : > { %6160 = vst.msk [vmem:[%s11227_s25 + $0x60] sm:$0xff] %vm391_vm0, %v6128_v61  ;;  %v6129_v15 = vadd.f32 %v8407_v31, %v6097_v59  ;;  %v8421_v61 = vld [vmem:[%s8602_s29 + $0xe0] sm:$0xff] }
 0x8b9   : > { %6163 = vst.msk [vmem:[%s11227_s25 + $0x78] sm:$0xff] %vm391_vm0, %v6131_v7  ;;  %v8422_v7 = vld [vmem:[%s8602_s29 + $0xf8] sm:$0xff] }
 0x8ba   : > { %6161 = vst.msk [vmem:[%s11227_s25 + $0x68] sm:$0xff] %vm391_vm0, %v6129_v15  ;;  %v7728_v8 = vpop.f32.mrb[16].mxu1  ;;  %v8423_v15 = vld [vmem:[%s8602_s29 + $0xe8] sm:$0xff] }
 0x8bb   : > { %v6102_v45 = vadd.f32 %v7728_v8, %v11217_v62  ;;  %v5982_v9 = vpop.f32.mrb[17].mxu1 }
 0x8bc   : > { %v6100_v52 = vadd.f32 %v11217_v62, %v5982_v9  ;;  %v7729_v28 = vpop.f32.mrb[18].mxu1 }
 0x8bd   : > { %v6134_v39 = vadd.f32 %v8408_v16, %v6102_v45  ;;  %v6103_v11 = vadd.f32 %v7729_v28, %v11217_v62  ;;  %v5985_v43 = vpop.f32.mrb[19].mxu1 }
 0x8be   : > { %v6132_v49 = vadd.f32 %v8409_v33, %v6100_v52  ;;  %v6101_v27 = vadd.f32 %v11217_v62, %v5985_v43 }
 0x8bf   : > { %6166 = vst.msk [vmem:[%s11227_s25 + $0x90] sm:$0xff] %vm391_vm0, %v6134_v39  ;;  %v6135_v50 = vadd.f32 %v8410_v41, %v6103_v11 }
 0x8c0   : > { %6164 = vst.msk [vmem:[%s11227_s25 + $0x80] sm:$0xff] %vm391_vm0, %v6132_v49  ;;  %v6133_v44 = vadd.f32 %v8411_v48, %v6101_v27 }
 0x8c1   : > { %6167 = vst.msk [vmem:[%s11227_s25 + $0x98] sm:$0xff] %vm391_vm0, %v6135_v50 }
 0x8c2   : > { %6165 = vst.msk [vmem:[%s11227_s25 + $0x88] sm:$0xff] %vm391_vm0, %v6133_v44  ;;  %v7732_v60 = vpop.f32.mrb[20].mxu1 }
 0x8c3   : > { %v6106_v26 = vadd.f32 %v7732_v60, %v11217_v62  ;;  %v5998_v47 = vpop.f32.mrb[21].mxu1 }
 0x8c4   : > { %v6104_v12 = vadd.f32 %v11217_v62, %v5998_v47  ;;  %v7733_v56 = vpop.f32.mrb[22].mxu1 }
 0x8c5   : > { %v6138_v29 = vadd.f32 %v8412_v63, %v6106_v26  ;;  %v6107_v23 = vadd.f32 %v7733_v56, %v11217_v62  ;;  %v6001_v1 = vpop.f32.mrb[23].mxu1 }
 0x8c6   : > { %v6136_v5 = vadd.f32 %v8413_v20, %v6104_v12  ;;  %v6105_v35 = vadd.f32 %v11217_v62, %v6001_v1 }
 0x8c7   : > { %6170 = vst.msk [vmem:[%s11227_s25 + $0xb0] sm:$0xff] %vm391_vm0, %v6138_v29  ;;  %v6139_v24 = vadd.f32 %v8414_v30, %v6107_v23 }
 0x8c8   : > { %6168 = vst.msk [vmem:[%s11227_s25 + $0xa0] sm:$0xff] %vm391_vm0, %v6136_v5  ;;  %v6137_v46 = vadd.f32 %v8415_v19, %v6105_v35 }
 0x8c9   : > { %6171 = vst.msk [vmem:[%s11227_s25 + $0xb8] sm:$0xff] %vm391_vm0, %v6139_v24 }
 0x8ca   : > { %6169 = vst.msk [vmem:[%s11227_s25 + $0xa8] sm:$0xff] %vm391_vm0, %v6137_v46  ;;  %v7736_v3 = vpop.f32.mrb[24].mxu1 }
 0x8cb   : > { %v6110_v6 = vadd.f32 %v7736_v3, %v11217_v62  ;;  %v6014_v36 = vpop.f32.mrb[25].mxu1 }
 0x8cc   : > { %v6108_v18 = vadd.f32 %v11217_v62, %v6014_v36  ;;  %v7737_v53 = vpop.f32.mrb[26].mxu1 }
 0x8cd   : > { %v6142_v21 = vadd.f32 %v8416_v22, %v6110_v6  ;;  %v6111_v54 = vadd.f32 %v7737_v53, %v11217_v62  ;;  %v6017_v0 = vpop.f32.mrb[27].mxu1 }
 0x8ce   : > { %v6140_v42 = vadd.f32 %v8417_v40, %v6108_v18  ;;  %v6109_v38 = vadd.f32 %v11217_v62, %v6017_v0 }
 0x8cf   : > { %6174 = vst.msk [vmem:[%s11227_s25 + $0xd0] sm:$0xff] %vm391_vm0, %v6142_v21  ;;  %v6143_v37 = vadd.f32 %v8418_v57, %v6111_v54 }
 0x8d0   : > { %6172 = vst.msk [vmem:[%s11227_s25 + $0xc0] sm:$0xff] %vm391_vm0, %v6140_v42  ;;  %v6141_v25 = vadd.f32 %v8419_v58, %v6109_v38 }
 0x8d1   : > { %6175 = vst.msk [vmem:[%s11227_s25 + $0xd8] sm:$0xff] %vm391_vm0, %v6143_v37 }
 0x8d2   : > { %6173 = vst.msk [vmem:[%s11227_s25 + $0xc8] sm:$0xff] %vm391_vm0, %v6141_v25  ;;  %v7740_v32 = vpop.f32.mrb[28].mxu1 }
 0x8d3   : > { %v6114_v13 = vadd.f32 %v7740_v32, %v11217_v62  ;;  %v6030_v51 = vpop.f32.mrb[29].mxu1 }
 0x8d4   : > { %v6112_v4 = vadd.f32 %v11217_v62, %v6030_v51  ;;  %v7741_v2 = vpop.f32.mrb[30].mxu1 }
 0x8d5   : > { %v6146_v34 = vadd.f32 %v8420_v17, %v6114_v13  ;;  %v6115_v10 = vadd.f32 %v7741_v2, %v11217_v62  ;;  %v6033_v14 = vpop.f32.mrb[31].mxu1 }
 0x8d6   : > { %v6144_v59 = vadd.f32 %v8421_v61, %v6112_v4  ;;  %v6113_v55 = vadd.f32 %v11217_v62, %v6033_v14 }
 0x8d7   : > { %6178 = vst.msk [vmem:[%s11227_s25 + $0xf0] sm:$0xff] %vm391_vm0, %v6146_v34  ;;  %v6147_v31 = vadd.f32 %v8422_v7, %v6115_v10 }
 0x8d8   : > { %6176 = vst.msk [vmem:[%s11227_s25 + $0xe0] sm:$0xff] %vm391_vm0, %v6144_v59  ;;  %v6145_v8 = vadd.f32 %v8423_v15, %v6113_v55 }
 0x8d9   : > { %6179 = vst.msk [vmem:[%s11227_s25 + $0xf8] sm:$0xff] %vm391_vm0, %v6147_v31 }
 0x8da   : > { %6177 = vst.msk [vmem:[%s11227_s25 + $0xe8] sm:$0xff] %vm391_vm0, %v6145_v8 }
 0x8db   : > { %8437 = shalt.err (!%p8434_p3)
}
 0x8dc   : > { %s8438_s29 = scalar_lea.hbm %s11349_s30, 4096  ;;  %s8442_s26 = scalar_lea.hbm %s11413_s10, 8192 }
 0x8dd   : > { %p8439_p4 = scmp.ne.s32.totalorder %s11349_s30, %s8438_s29  ;;  %p8443_p9 = scmp.lt.u32.totalorder %s11349_s30, %s11413_s10 }
 0x8de   : > { %p8444_p10 = scmp.lt.u32.totalorder %s8442_s26, %s8438_s29  ;;  %p8446_p12 = scmp.lt.u32.totalorder %s8438_s29, %s11349_s30 }
 0x8df   : > { %p8440_p7 = pnand %p8439_p4, %p8587_p5 }
 0x8e0   : > { %p8445_p11 = por %p8444_p10, %p8443_p9 }
 0x8e1   : > { %p8441_p8 = pneg %p8440_p7 }
 0x8e2   : > { %p8447_p13 = por %p8446_p12, %p8445_p11 }
 0x8e4   : > { %p8448_p0 = pnand %p8447_p13, %p8441_p8 }
 0x8e6   : > { %8451 = shalt.err (!%p8448_p0)
}
 0x8e7   : > { %s8492_s11 = smov 128   ;;  %s8493_s18 = smov 8  }
 0x8e8   : > { %8272 = dma.vmem_to_hbm [thread:$0]  (%p8587_p5), %s11351_s27, 4096, %s11349_s30, %s11362_s0, %s8492_s11, %s8492_s11, %s8493_s18  }
 0x8e9 PF: > { %p8278_p1 = scmp.ge.s32.totalorder %s8486_s16, 2  ;;  %s6209_s20 = sand.u32 1, %s8474_s13  }
 0x8ea   : > { %s6210_s21 = scalar_lea.sflag [#allocation3], %s6209_s20 }
 0x8eb   : > { %p8275_p2 = pnand %p8278_p1, %p8591_p6 }
 0x8ed   : > { %8469 = dma.done.wait (!%p8275_p2), %s6210_s21, 4096  }
 0x8ee   : > { %8471 = vsyncadd (!%p8275_p2), %s6210_s21, 4294963200  ;;  %p20_p3 = scmp.ge.s32.totalorder %s8574_s19, 4   ;;  %s11583_s13 = smov %s8478_s14 }
 0x8ef   : > { %s11584_s14 = smov %s8482_s15  ;;  %s11585_s15 = smov %s8585_s22 }
 0x8f0   : > { %s11586_s16 = smov %s8574_s19  ;;  %22 = sbr.rel (!%p20_p3) target bundleno = 5 (0x5), region = 95 }
 0x8f7   :  { %6215 = vsyncpa [#allocation3], 1 }
 0x8f8   :  { %6217 = vsyncpa [#allocation3 + $0x1], 1 }

</bundles_post_ra>
